<compile_context>
chip_gen: v7x
topology: tpu7x:2x2x1
jax: 0.10.0
libtpu: 0.0.40
codegen_flags: <defaults>
</compile_context>

<pallas_src>
import functools

import jax
import jax.numpy as jnp
from jax.experimental import pallas as pl
from jax.experimental.pallas import tpu as pltpu

HIGHEST = jax.lax.Precision.HIGHEST


def _band_conv_weights(w, W):
    """(KH, KW, Cin, Cout) -> (KH, W*Cin, W*Cout) block-banded matrices.

    With the input laid out lane-dense as rows (H) x lanes (W*Cin) and
    zero-padded only along H, a 'SAME' 2-D convolution is
        out_rows[h] = sum_ki in_padded_rows[h + ki] @ band[ki]
    W-direction zero padding is encoded by the band structure (out-of-range
    taps simply have zero entries).
    """
    KH, KW, Cin, Cout = w.shape
    pw = KW // 2
    wo = jnp.arange(W)[:, None]                   # output column index
    wi = jnp.arange(W)[None, :]                   # input  column index
    kj = wi - wo + pw                             # (W_out, W_in)
    valid = (kj >= 0) & (kj < KW)
    g = w[:, jnp.clip(kj, 0, KW - 1), :, :]       # (KH, W_out, W_in, Cin, Cout)
    g = g * valid[None, :, :, None, None].astype(w.dtype)
    g = jnp.transpose(g, (0, 2, 3, 1, 4))         # (KH, W_in, Cin, W_out, Cout)
    return g.reshape(KH, W * Cin, W * Cout)


def phycell_kernel(x_ref, h_ref, wgx_ref, wgh_ref, bg_ref,
                   w1_ref, b1_ref, gamma_ref, beta_ref,
                   w2_ref, b2_ref, a_ref,
                   out_ref, xpad_ref, hpad_ref,
                   *, H, KH, ph, eps):
    x = x_ref[0]                                  # (H, W*C)  f32
    h = h_ref[0]                                  # (H, W*C)  f32

    # H-direction zero padding, built once in VMEM (nothing padded in wrapper).
    xpad_ref[...] = jnp.zeros(xpad_ref.shape, xpad_ref.dtype)
    hpad_ref[...] = jnp.zeros(hpad_ref.shape, hpad_ref.dtype)
    xpad_ref[1:1 + H, :] = x
    hpad_ref[ph:ph + H, :] = h

    bf = jnp.bfloat16

    # ---- convgate: 3x3 conv on cat([x, h]) as two banded matmuls per row tap
    cc = jnp.zeros(x.shape, jnp.float32)
    for ki in range(3):
        xp = xpad_ref[ki:ki + H, :].astype(bf)
        hp = hpad_ref[ph - 1 + ki:ph - 1 + ki + H, :].astype(bf)
        cc = cc + jnp.dot(xp, wgx_ref[ki], preferred_element_type=jnp.float32)
        cc = cc + jnp.dot(hp, wgh_ref[ki], preferred_element_type=jnp.float32)
    k_gate = jax.nn.sigmoid(cc + bg_ref[...])

    # ---- F.conv1: KHxKW conv on hidden, one banded matmul per row tap
    f = jnp.zeros((H, w1_ref.shape[2]), jnp.float32)
    for ki in range(KH):
        hp = hpad_ref[ki:ki + H, :].astype(bf)
        f = f + jnp.dot(hp, w1_ref[ki], preferred_element_type=jnp.float32)
    f = f + b1_ref[...]

    # ---- GroupNorm(n_groups): per-lane group mean / var via projection A.
    # A both reduces over (W, channels-in-group) and broadcasts back per lane.
    colsum = jnp.sum(f, axis=0, keepdims=True)                       # (1, W*Fh)
    mean = jnp.dot(colsum, a_ref[...],
                   preferred_element_type=jnp.float32, precision=HIGHEST)
    d = f - mean                                                     # two-pass var
    colsq = jnp.sum(d * d, axis=0, keepdims=True)
    var = jnp.dot(colsq, a_ref[...],
                  preferred_element_type=jnp.float32, precision=HIGHEST)
    fn = d * jax.lax.rsqrt(var + eps) * gamma_ref[...] + beta_ref[...]

    # ---- F.conv2: 1x1 conv as one block-diagonal matmul back to W*C lanes
    ft = jnp.dot(fn.astype(bf), w2_ref[...],
                 preferred_element_type=jnp.float32) + b2_ref[...]

    # ---- PhyCell update: pure full-vreg VPU work
    ht = h + ft
    out_ref[0] = (ht + k_gate * (x - ht)).astype(out_ref.dtype)


@functools.partial(jax.jit, static_argnames=("n_groups", "eps"))
def phycell_cell(x_nchw, h_nchw, wg, bg, w1, b1, gamma, beta, w2, b2,
                 *, n_groups=7, eps=1e-5):
    """x_nchw, h_nchw: (B, C, H, W) float32.  Returns next_hidden (B, C, H, W)."""
    B, C, H, W = x_nchw.shape
    KH, KW, Cin, Fh = w1.shape
    assert Cin == C and Fh % n_groups == 0
    assert KH % 2 == 1 and KW % 2 == 1 and KH >= 3
    gsz = Fh // n_groups
    WC, WF = W * C, W * Fh
    ph = KH // 2
    f32, bf = jnp.float32, jnp.bfloat16

    # lane-dense activations: (B, H, W*C) -- channels fastest on the lane axis
    x2 = jnp.transpose(x_nchw, (0, 2, 3, 1)).reshape(B, H, WC).astype(f32)
    h2 = jnp.transpose(h_nchw, (0, 2, 3, 1)).reshape(B, H, WC).astype(f32)

    # banded / block-diagonal weight matrices, bf16 for single-pass MXU
    wgx = _band_conv_weights(wg[:, :, :C, :], W).astype(bf)          # (3, WC, WC)
    wgh = _band_conv_weights(wg[:, :, C:, :], W).astype(bf)          # (3, WC, WC)
    w1b = _band_conv_weights(w1, W).astype(bf)                       # (KH, WC, WF)
    w2b = jnp.einsum('uv,fc->ufvc', jnp.eye(W, dtype=f32), w2
                     ).reshape(WF, WC).astype(bf)                    # (WF, WC)

    # GroupNorm projection: per-lane group mean = (row-sum of f) @ A
    cidx = jnp.arange(WF) % Fh
    same = (cidx[:, None] // gsz) == (cidx[None, :] // gsz)
    a_mat = same.astype(f32) / float(H * W * gsz)                    # (WF, WF)

    # per-lane broadcast of the 1-D parameters
    bg_row = jnp.tile(bg.astype(f32), W).reshape(1, WC)
    b1_row = jnp.tile(b1.astype(f32), W).reshape(1, WF)
    ga_row = jnp.tile(gamma.astype(f32), W).reshape(1, WF)
    be_row = jnp.tile(beta.astype(f32), W).reshape(1, WF)
    b2_row = jnp.tile(b2.astype(f32), W).reshape(1, WC)

    kernel = functools.partial(phycell_kernel, H=H, KH=KH, ph=ph, eps=eps)

    per_batch = lambda b: (b, 0, 0)
    whole3 = lambda b: (0, 0, 0)
    whole2 = lambda b: (0, 0)

    out = pl.pallas_call(
        kernel,
        out_shape=jax.ShapeDtypeStruct((B, H, WC), f32),
        grid=(B,),
        in_specs=[
            pl.BlockSpec((1, H, WC), per_batch),          # x  (lane-dense)
            pl.BlockSpec((1, H, WC), per_batch),          # h  (lane-dense)
            pl.BlockSpec((3, WC, WC), whole3),            # gate weights, x part
            pl.BlockSpec((3, WC, WC), whole3),            # gate weights, h part
            pl.BlockSpec((1, WC), whole2),                # gate bias
            pl.BlockSpec((KH, WC, WF), whole3),           # F.conv1 banded weights
            pl.BlockSpec((1, WF), whole2),                # F.conv1 bias
            pl.BlockSpec((1, WF), whole2),                # GroupNorm gamma
            pl.BlockSpec((1, WF), whole2),                # GroupNorm beta
            pl.BlockSpec((WF, WC), whole2),               # F.conv2 block-diag weights
            pl.BlockSpec((1, WC), whole2),                # F.conv2 bias
            pl.BlockSpec((WF, WF), whole2),               # GroupNorm projection A
        ],
        out_specs=pl.BlockSpec((1, H, WC), per_batch),
        scratch_shapes=[
            pltpu.VMEM((H + 2, WC), f32),                 # x zero-padded along H
            pltpu.VMEM((H + 2 * ph, WC), f32),            # h zero-padded along H
        ],
        compiler_params=pltpu.CompilerParams(
            dimension_semantics=("parallel",)),           # B=2 -> both v7x cores
    )(x2, h2, wgx, wgh, bg_row, w1b, b1_row, ga_row, be_row, w2b, b2_row, a_mat)

    # back to NCHW like the PyTorch module
    return jnp.transpose(out.reshape(B, H, W, C), (0, 3, 1, 2))


def phycell_ref(x_nchw, h_nchw, wg, bg, w1, b1, gamma, beta, w2, b2,
                *, n_groups=7, eps=1e-5):
    """Pure-JAX reference (PyTorch forward semantics, matmuls in matching
    bf16-in / f32-accumulate precision so the comparison is apples-to-apples)."""
    f32, bf = jnp.float32, jnp.bfloat16
    x = jnp.transpose(x_nchw, (0, 2, 3, 1))
    h = jnp.transpose(h_nchw, (0, 2, 3, 1))
    xh = jnp.concatenate([x, h], axis=-1)
    cc = jax.lax.conv_general_dilated(
        xh.astype(bf), wg.astype(bf), (1, 1), 'SAME',
        dimension_numbers=('NHWC', 'HWIO', 'NHWC'),
        preferred_element_type=f32) + bg
    K = jax.nn.sigmoid(cc)
    f = jax.lax.conv_general_dilated(
        h.astype(bf), w1.astype(bf), (1, 1), 'SAME',
        dimension_numbers=('NHWC', 'HWIO', 'NHWC'),
        preferred_element_type=f32) + b1
    B, H, W, Fh = f.shape
    fg = f.reshape(B, H, W, n_groups, Fh // n_groups)
    mean = fg.mean(axis=(1, 2, 4), keepdims=True)
    var = ((fg - mean) ** 2).mean(axis=(1, 2, 4), keepdims=True)
    fn = ((fg - mean) / jnp.sqrt(var + eps)).reshape(B, H, W, Fh) * gamma + beta
    ft = jnp.einsum('bhwf,fc->bhwc', fn.astype(bf), w2.astype(bf),
                    preferred_element_type=f32) + b2
    ht = h + ft
    nh = ht + K * (x - ht)
    return jnp.transpose(nh, (0, 3, 1, 2))


if __name__ == "__main__":
    # Shapes consistent with the module (GroupNorm(7, F_hidden) => Fh % 7 == 0).
    # W * C = 16 * 8 = 128 -> fully lane-dense layout inside the kernel.
    B, C, H, W = 2, 8, 16, 16          # input_dim = 8
    Fh, KH, KW = 14, 7, 7              # F_hidden_dim = 14, kernel_size = (7, 7)

    key = jax.random.PRNGKey(0)
    ks = jax.random.split(key, 10)
    x = jax.random.normal(ks[0], (B, C, H, W), jnp.float32)
    hidden = jax.random.normal(ks[1], (B, C, H, W), jnp.float32)

    # deterministic synthetic parameters (shapes from PhyCell_Cell.__init__)
    wg = 0.10 * jax.random.normal(ks[2], (3, 3, 2 * C, C), jnp.float32)   # convgate
    bg = 0.10 * jax.random.normal(ks[3], (C,), jnp.float32)
    w1 = 0.05 * jax.random.normal(ks[4], (KH, KW, C, Fh), jnp.float32)    # F.conv1
    b1 = 0.10 * jax.random.normal(ks[5], (Fh,), jnp.float32)
    gamma = 1.0 + 0.10 * jax.random.normal(ks[6], (Fh,), jnp.float32)     # GroupNorm
    beta = 0.10 * jax.random.normal(ks[7], (Fh,), jnp.float32)
    w2 = 0.10 * jax.random.normal(ks[8], (Fh, C), jnp.float32)            # F.conv2 (1x1)
    b2 = 0.10 * jax.random.normal(ks[9], (C,), jnp.float32)

    out = phycell_cell(x, hidden, wg, bg, w1, b1, gamma, beta, w2, b2)
    out = jax.block_until_ready(out)

    ref = phycell_ref(x, hidden, wg, bg, w1, b1, gamma, beta, w2, b2)
    assert out.shape == (B, C, H, W)
    err = float(jnp.max(jnp.abs(out - ref)))
    assert jnp.allclose(out, ref, atol=5e-3, rtol=5e-3), err

    print("KERNEL_OK")
</pallas_src>

<mosaic_0001>
module attributes {stable_mosaic.version = 11 : i64} {
  func.func @phycell_kernel(%arg0: i32, %arg1: memref<1x16x128xf32, #tpu.memory_space<vmem>>, %arg2: memref<1x16x128xf32, #tpu.memory_space<vmem>>, %arg3: memref<3x128x128xbf16, #tpu.memory_space<vmem>>, %arg4: memref<3x128x128xbf16, #tpu.memory_space<vmem>>, %arg5: memref<1x128xf32, #tpu.memory_space<vmem>>, %arg6: memref<7x128x224xbf16, #tpu.memory_space<vmem>>, %arg7: memref<1x224xf32, #tpu.memory_space<vmem>>, %arg8: memref<1x224xf32, #tpu.memory_space<vmem>>, %arg9: memref<1x224xf32, #tpu.memory_space<vmem>>, %arg10: memref<224x128xbf16, #tpu.memory_space<vmem>>, %arg11: memref<1x128xf32, #tpu.memory_space<vmem>>, %arg12: memref<224x224xf32, #tpu.memory_space<vmem>>, %arg13: memref<1x16x128xf32, #tpu.memory_space<vmem>>, %arg14: memref<18x128xf32, #tpu.memory_space<vmem>>, %arg15: memref<22x128xf32, #tpu.memory_space<vmem>>) attributes {dimension_semantics = [#tpu.dimension_semantics<parallel>], iteration_bounds = array<i64: 2>, scalar_prefetch = 0 : i64, scratch_operands = 2 : i64, tpu.core_type = #tpu.core_type<tc>, window_params = [{transform_indices = @transform_0, window_bounds = array<i64: 1, 16, 128>}, {transform_indices = @transform_1, window_bounds = array<i64: 1, 16, 128>}, {pipeline_mode = #tpu.pipeline_mode<synchronous>, transform_indices = @transform_2, window_bounds = array<i64: 3, 128, 128>}, {pipeline_mode = #tpu.pipeline_mode<synchronous>, transform_indices = @transform_3, window_bounds = array<i64: 3, 128, 128>}, {pipeline_mode = #tpu.pipeline_mode<synchronous>, transform_indices = @transform_4, window_bounds = array<i64: 1, 128>}, {pipeline_mode = #tpu.pipeline_mode<synchronous>, transform_indices = @transform_5, window_bounds = array<i64: 7, 128, 224>}, {pipeline_mode = #tpu.pipeline_mode<synchronous>, transform_indices = @transform_6, window_bounds = array<i64: 1, 224>}, {pipeline_mode = #tpu.pipeline_mode<synchronous>, transform_indices = @transform_7, window_bounds = array<i64: 1, 224>}, {pipeline_mode = #tpu.pipeline_mode<synchronous>, transform_indices = @transform_8, window_bounds = array<i64: 1, 224>}, {pipeline_mode = #tpu.pipeline_mode<synchronous>, transform_indices = @transform_9, window_bounds = array<i64: 224, 128>}, {pipeline_mode = #tpu.pipeline_mode<synchronous>, transform_indices = @transform_10, window_bounds = array<i64: 1, 128>}, {pipeline_mode = #tpu.pipeline_mode<synchronous>, transform_indices = @transform_11, window_bounds = array<i64: 224, 224>}, {transform_indices = @transform_12, window_bounds = array<i64: 1, 16, 128>}]} {
    %c0 = arith.constant 0 : index
    %c0_0 = arith.constant 0 : index
    %c0_1 = arith.constant 0 : index
    %0 = vector.load %arg1[%c0, %c0_0, %c0_1] : memref<1x16x128xf32, #tpu.memory_space<vmem>>, vector<1x16x128xf32>
    %1 = vector.shape_cast %0 : vector<1x16x128xf32> to vector<16x128xf32>
    %c0_2 = arith.constant 0 : index
    %c0_3 = arith.constant 0 : index
    %c0_4 = arith.constant 0 : index
    %2 = vector.load %arg2[%c0_2, %c0_3, %c0_4] : memref<1x16x128xf32, #tpu.memory_space<vmem>>, vector<1x16x128xf32>
    %3 = vector.shape_cast %2 : vector<1x16x128xf32> to vector<16x128xf32>
    %cst = arith.constant 0.000000e+00 : f32
    %4 = vector.broadcast %cst : f32 to vector<18x128xf32>
    %c0_5 = arith.constant 0 : index
    %c0_6 = arith.constant 0 : index
    %5 = vector.load %arg14[%c0_5, %c0_6] : memref<18x128xf32, #tpu.memory_space<vmem>>, vector<18x128xf32>
    tpu.vector_store %arg14[%c0_5, %c0_6], %4 {strides = array<i32>} : memref<18x128xf32, #tpu.memory_space<vmem>>, vector<18x128xf32>,
    %cst_7 = arith.constant 0.000000e+00 : f32
    %6 = vector.broadcast %cst_7 : f32 to vector<22x128xf32>
    %c0_8 = arith.constant 0 : index
    %c0_9 = arith.constant 0 : index
    %7 = vector.load %arg15[%c0_8, %c0_9] : memref<22x128xf32, #tpu.memory_space<vmem>>, vector<22x128xf32>
    tpu.vector_store %arg15[%c0_8, %c0_9], %6 {strides = array<i32>} : memref<22x128xf32, #tpu.memory_space<vmem>>, vector<22x128xf32>,
    %c1 = arith.constant 1 : index
    %c0_10 = arith.constant 0 : index
    %8 = vector.load %arg14[%c1, %c0_10] : memref<18x128xf32, #tpu.memory_space<vmem>>, vector<16x128xf32>
    tpu.vector_store %arg14[%c1, %c0_10], %1 {strides = array<i32>} : memref<18x128xf32, #tpu.memory_space<vmem>>, vector<16x128xf32>,
    %c3 = arith.constant 3 : index
    %c0_11 = arith.constant 0 : index
    %9 = vector.load %arg15[%c3, %c0_11] : memref<22x128xf32, #tpu.memory_space<vmem>>, vector<16x128xf32>
    tpu.vector_store %arg15[%c3, %c0_11], %3 {strides = array<i32>} : memref<22x128xf32, #tpu.memory_space<vmem>>, vector<16x128xf32>,
    %cst_12 = arith.constant 0.000000e+00 : f32
    %10 = vector.broadcast %cst_12 : f32 to vector<16x128xf32>
    %c0_13 = arith.constant 0 : index
    %c0_14 = arith.constant 0 : index
    %11 = vector.load %arg14[%c0_13, %c0_14] : memref<18x128xf32, #tpu.memory_space<vmem>>, vector<16x128xf32>
    %12 = arith.truncf %11 : vector<16x128xf32> to vector<16x128xbf16>
    %c2 = arith.constant 2 : index
    %c0_15 = arith.constant 0 : index
    %13 = vector.load %arg15[%c2, %c0_15] : memref<22x128xf32, #tpu.memory_space<vmem>>, vector<16x128xf32>
    %14 = arith.truncf %13 : vector<16x128xf32> to vector<16x128xbf16>
    %c0_16 = arith.constant 0 : index
    %c0_17 = arith.constant 0 : index
    %c0_18 = arith.constant 0 : index
    %15 = vector.load %arg3[%c0_16, %c0_17, %c0_18] : memref<3x128x128xbf16, #tpu.memory_space<vmem>>, vector<1x128x128xbf16>
    %16 = vector.shape_cast %15 : vector<1x128x128xbf16> to vector<128x128xbf16>
    %cst_19 = arith.constant dense<0.000000e+00> : vector<16x128xf32>
    %17 = tpu.matmul %12, %16, %cst_19 {dimension_numbers = #tpu.dot_dimension_numbers<[1], [0], [0], [1], [0, 0, 1, 1], [], []>} : vector<16x128xbf16>, vector<128x128xbf16>, vector<16x128xf32> -> vector<16x128xf32>
    %18 = arith.addf %10, %17 : vector<16x128xf32>
    %c0_20 = arith.constant 0 : index
    %c0_21 = arith.constant 0 : index
    %c0_22 = arith.constant 0 : index
    %19 = vector.load %arg4[%c0_20, %c0_21, %c0_22] : memref<3x128x128xbf16, #tpu.memory_space<vmem>>, vector<1x128x128xbf16>
    %20 = vector.shape_cast %19 : vector<1x128x128xbf16> to vector<128x128xbf16>
    %cst_23 = arith.constant dense<0.000000e+00> : vector<16x128xf32>
    %21 = tpu.matmul %14, %20, %cst_23 {dimension_numbers = #tpu.dot_dimension_numbers<[1], [0], [0], [1], [0, 0, 1, 1], [], []>} : vector<16x128xbf16>, vector<128x128xbf16>, vector<16x128xf32> -> vector<16x128xf32>
    %22 = arith.addf %18, %21 : vector<16x128xf32>
    %c1_24 = arith.constant 1 : index
    %c0_25 = arith.constant 0 : index
    %23 = vector.load %arg14[%c1_24, %c0_25] : memref<18x128xf32, #tpu.memory_space<vmem>>, vector<16x128xf32>
    %24 = arith.truncf %23 : vector<16x128xf32> to vector<16x128xbf16>
    %c3_26 = arith.constant 3 : index
    %c0_27 = arith.constant 0 : index
    %25 = vector.load %arg15[%c3_26, %c0_27] : memref<22x128xf32, #tpu.memory_space<vmem>>, vector<16x128xf32>
    %26 = arith.truncf %25 : vector<16x128xf32> to vector<16x128xbf16>
    %c1_28 = arith.constant 1 : index
    %c0_29 = arith.constant 0 : index
    %c0_30 = arith.constant 0 : index
    %27 = vector.load %arg3[%c1_28, %c0_29, %c0_30] : memref<3x128x128xbf16, #tpu.memory_space<vmem>>, vector<1x128x128xbf16>
    %28 = vector.shape_cast %27 : vector<1x128x128xbf16> to vector<128x128xbf16>
    %cst_31 = arith.constant dense<0.000000e+00> : vector<16x128xf32>
    %29 = tpu.matmul %24, %28, %cst_31 {dimension_numbers = #tpu.dot_dimension_numbers<[1], [0], [0], [1], [0, 0, 1, 1], [], []>} : vector<16x128xbf16>, vector<128x128xbf16>, vector<16x128xf32> -> vector<16x128xf32>
    %30 = arith.addf %22, %29 : vector<16x128xf32>
    %c1_32 = arith.constant 1 : index
    %c0_33 = arith.constant 0 : index
    %c0_34 = arith.constant 0 : index
    %31 = vector.load %arg4[%c1_32, %c0_33, %c0_34] : memref<3x128x128xbf16, #tpu.memory_space<vmem>>, vector<1x128x128xbf16>
    %32 = vector.shape_cast %31 : vector<1x128x128xbf16> to vector<128x128xbf16>
    %cst_35 = arith.constant dense<0.000000e+00> : vector<16x128xf32>
    %33 = tpu.matmul %26, %32, %cst_35 {dimension_numbers = #tpu.dot_dimension_numbers<[1], [0], [0], [1], [0, 0, 1, 1], [], []>} : vector<16x128xbf16>, vector<128x128xbf16>, vector<16x128xf32> -> vector<16x128xf32>
    %34 = arith.addf %30, %33 : vector<16x128xf32>
    %c2_36 = arith.constant 2 : index
    %c0_37 = arith.constant 0 : index
    %35 = vector.load %arg14[%c2_36, %c0_37] : memref<18x128xf32, #tpu.memory_space<vmem>>, vector<16x128xf32>
    %36 = arith.truncf %35 : vector<16x128xf32> to vector<16x128xbf16>
    %c4 = arith.constant 4 : index
    %c0_38 = arith.constant 0 : index
    %37 = vector.load %arg15[%c4, %c0_38] : memref<22x128xf32, #tpu.memory_space<vmem>>, vector<16x128xf32>
    %38 = arith.truncf %37 : vector<16x128xf32> to vector<16x128xbf16>
    %c2_39 = arith.constant 2 : index
    %c0_40 = arith.constant 0 : index
    %c0_41 = arith.constant 0 : index
    %39 = vector.load %arg3[%c2_39, %c0_40, %c0_41] : memref<3x128x128xbf16, #tpu.memory_space<vmem>>, vector<1x128x128xbf16>
    %40 = vector.shape_cast %39 : vector<1x128x128xbf16> to vector<128x128xbf16>
    %cst_42 = arith.constant dense<0.000000e+00> : vector<16x128xf32>
    %41 = tpu.matmul %36, %40, %cst_42 {dimension_numbers = #tpu.dot_dimension_numbers<[1], [0], [0], [1], [0, 0, 1, 1], [], []>} : vector<16x128xbf16>, vector<128x128xbf16>, vector<16x128xf32> -> vector<16x128xf32>
    %42 = arith.addf %34, %41 : vector<16x128xf32>
    %c2_43 = arith.constant 2 : index
    %c0_44 = arith.constant 0 : index
    %c0_45 = arith.constant 0 : index
    %43 = vector.load %arg4[%c2_43, %c0_44, %c0_45] : memref<3x128x128xbf16, #tpu.memory_space<vmem>>, vector<1x128x128xbf16>
    %44 = vector.shape_cast %43 : vector<1x128x128xbf16> to vector<128x128xbf16>
    %cst_46 = arith.constant dense<0.000000e+00> : vector<16x128xf32>
    %45 = tpu.matmul %38, %44, %cst_46 {dimension_numbers = #tpu.dot_dimension_numbers<[1], [0], [0], [1], [0, 0, 1, 1], [], []>} : vector<16x128xbf16>, vector<128x128xbf16>, vector<16x128xf32> -> vector<16x128xf32>
    %46 = arith.addf %42, %45 : vector<16x128xf32>
    %c0_47 = arith.constant 0 : index
    %c0_48 = arith.constant 0 : index
    %47 = vector.load %arg5[%c0_47, %c0_48] : memref<1x128xf32, #tpu.memory_space<vmem>>, vector<1x128xf32>
    %48 = vector.broadcast %47 : vector<1x128xf32> to vector<16x128xf32>
    %49 = arith.addf %46, %48 : vector<16x128xf32>
    %50 = arith.negf %49 : vector<16x128xf32>
    %51 = math.exp %50 : vector<16x128xf32>
    %cst_49 = arith.constant 1.000000e+00 : f32
    %52 = vector.broadcast %cst_49 : f32 to vector<16x128xf32>
    %53 = arith.addf %52, %51 : vector<16x128xf32>
    %54 = arith.divf %52, %53 : vector<16x128xf32>
    %cst_50 = arith.constant 0.000000e+00 : f32
    %55 = vector.broadcast %cst_50 : f32 to vector<16x224xf32>
    %c0_51 = arith.constant 0 : index
    %c0_52 = arith.constant 0 : index
    %56 = vector.load %arg15[%c0_51, %c0_52] : memref<22x128xf32, #tpu.memory_space<vmem>>, vector<16x128xf32>
    %57 = arith.truncf %56 : vector<16x128xf32> to vector<16x128xbf16>
    %c0_53 = arith.constant 0 : index
    %c0_54 = arith.constant 0 : index
    %c0_55 = arith.constant 0 : index
    %58 = vector.load %arg6[%c0_53, %c0_54, %c0_55] : memref<7x128x224xbf16, #tpu.memory_space<vmem>>, vector<1x128x224xbf16>
    %59 = vector.shape_cast %58 : vector<1x128x224xbf16> to vector<128x224xbf16>
    %cst_56 = arith.constant dense<0.000000e+00> : vector<16x224xf32>
    %60 = tpu.matmul %57, %59, %cst_56 {dimension_numbers = #tpu.dot_dimension_numbers<[1], [0], [0], [1], [0, 0, 1, 1], [], []>} : vector<16x128xbf16>, vector<128x224xbf16>, vector<16x224xf32> -> vector<16x224xf32>
    %61 = arith.addf %55, %60 : vector<16x224xf32>
    %c1_57 = arith.constant 1 : index
    %c0_58 = arith.constant 0 : index
    %62 = vector.load %arg15[%c1_57, %c0_58] : memref<22x128xf32, #tpu.memory_space<vmem>>, vector<16x128xf32>
    %63 = arith.truncf %62 : vector<16x128xf32> to vector<16x128xbf16>
    %c1_59 = arith.constant 1 : index
    %c0_60 = arith.constant 0 : index
    %c0_61 = arith.constant 0 : index
    %64 = vector.load %arg6[%c1_59, %c0_60, %c0_61] : memref<7x128x224xbf16, #tpu.memory_space<vmem>>, vector<1x128x224xbf16>
    %65 = vector.shape_cast %64 : vector<1x128x224xbf16> to vector<128x224xbf16>
    %cst_62 = arith.constant dense<0.000000e+00> : vector<16x224xf32>
    %66 = tpu.matmul %63, %65, %cst_62 {dimension_numbers = #tpu.dot_dimension_numbers<[1], [0], [0], [1], [0, 0, 1, 1], [], []>} : vector<16x128xbf16>, vector<128x224xbf16>, vector<16x224xf32> -> vector<16x224xf32>
    %67 = arith.addf %61, %66 : vector<16x224xf32>
    %c2_63 = arith.constant 2 : index
    %c0_64 = arith.constant 0 : index
    %68 = vector.load %arg15[%c2_63, %c0_64] : memref<22x128xf32, #tpu.memory_space<vmem>>, vector<16x128xf32>
    %69 = arith.truncf %68 : vector<16x128xf32> to vector<16x128xbf16>
    %c2_65 = arith.constant 2 : index
    %c0_66 = arith.constant 0 : index
    %c0_67 = arith.constant 0 : index
    %70 = vector.load %arg6[%c2_65, %c0_66, %c0_67] : memref<7x128x224xbf16, #tpu.memory_space<vmem>>, vector<1x128x224xbf16>
    %71 = vector.shape_cast %70 : vector<1x128x224xbf16> to vector<128x224xbf16>
    %cst_68 = arith.constant dense<0.000000e+00> : vector<16x224xf32>
    %72 = tpu.matmul %69, %71, %cst_68 {dimension_numbers = #tpu.dot_dimension_numbers<[1], [0], [0], [1], [0, 0, 1, 1], [], []>} : vector<16x128xbf16>, vector<128x224xbf16>, vector<16x224xf32> -> vector<16x224xf32>
    %73 = arith.addf %67, %72 : vector<16x224xf32>
    %c3_69 = arith.constant 3 : index
    %c0_70 = arith.constant 0 : index
    %74 = vector.load %arg15[%c3_69, %c0_70] : memref<22x128xf32, #tpu.memory_space<vmem>>, vector<16x128xf32>
    %75 = arith.truncf %74 : vector<16x128xf32> to vector<16x128xbf16>
    %c3_71 = arith.constant 3 : index
    %c0_72 = arith.constant 0 : index
    %c0_73 = arith.constant 0 : index
    %76 = vector.load %arg6[%c3_71, %c0_72, %c0_73] : memref<7x128x224xbf16, #tpu.memory_space<vmem>>, vector<1x128x224xbf16>
    %77 = vector.shape_cast %76 : vector<1x128x224xbf16> to vector<128x224xbf16>
    %cst_74 = arith.constant dense<0.000000e+00> : vector<16x224xf32>
    %78 = tpu.matmul %75, %77, %cst_74 {dimension_numbers = #tpu.dot_dimension_numbers<[1], [0], [0], [1], [0, 0, 1, 1], [], []>} : vector<16x128xbf16>, vector<128x224xbf16>, vector<16x224xf32> -> vector<16x224xf32>
    %79 = arith.addf %73, %78 : vector<16x224xf32>
    %c4_75 = arith.constant 4 : index
    %c0_76 = arith.constant 0 : index
    %80 = vector.load %arg15[%c4_75, %c0_76] : memref<22x128xf32, #tpu.memory_space<vmem>>, vector<16x128xf32>
    %81 = arith.truncf %80 : vector<16x128xf32> to vector<16x128xbf16>
    %c4_77 = arith.constant 4 : index
    %c0_78 = arith.constant 0 : index
    %c0_79 = arith.constant 0 : index
    %82 = vector.load %arg6[%c4_77, %c0_78, %c0_79] : memref<7x128x224xbf16, #tpu.memory_space<vmem>>, vector<1x128x224xbf16>
    %83 = vector.shape_cast %82 : vector<1x128x224xbf16> to vector<128x224xbf16>
    %cst_80 = arith.constant dense<0.000000e+00> : vector<16x224xf32>
    %84 = tpu.matmul %81, %83, %cst_80 {dimension_numbers = #tpu.dot_dimension_numbers<[1], [0], [0], [1], [0, 0, 1, 1], [], []>} : vector<16x128xbf16>, vector<128x224xbf16>, vector<16x224xf32> -> vector<16x224xf32>
    %85 = arith.addf %79, %84 : vector<16x224xf32>
    %c5 = arith.constant 5 : index
    %c0_81 = arith.constant 0 : index
    %86 = vector.load %arg15[%c5, %c0_81] : memref<22x128xf32, #tpu.memory_space<vmem>>, vector<16x128xf32>
    %87 = arith.truncf %86 : vector<16x128xf32> to vector<16x128xbf16>
    %c5_82 = arith.constant 5 : index
    %c0_83 = arith.constant 0 : index
    %c0_84 = arith.constant 0 : index
    %88 = vector.load %arg6[%c5_82, %c0_83, %c0_84] : memref<7x128x224xbf16, #tpu.memory_space<vmem>>, vector<1x128x224xbf16>
    %89 = vector.shape_cast %88 : vector<1x128x224xbf16> to vector<128x224xbf16>
    %cst_85 = arith.constant dense<0.000000e+00> : vector<16x224xf32>
    %90 = tpu.matmul %87, %89, %cst_85 {dimension_numbers = #tpu.dot_dimension_numbers<[1], [0], [0], [1], [0, 0, 1, 1], [], []>} : vector<16x128xbf16>, vector<128x224xbf16>, vector<16x224xf32> -> vector<16x224xf32>
    %91 = arith.addf %85, %90 : vector<16x224xf32>
    %c6 = arith.constant 6 : index
    %c0_86 = arith.constant 0 : index
    %92 = vector.load %arg15[%c6, %c0_86] : memref<22x128xf32, #tpu.memory_space<vmem>>, vector<16x128xf32>
    %93 = arith.truncf %92 : vector<16x128xf32> to vector<16x128xbf16>
    %c6_87 = arith.constant 6 : index
    %c0_88 = arith.constant 0 : index
    %c0_89 = arith.constant 0 : index
    %94 = vector.load %arg6[%c6_87, %c0_88, %c0_89] : memref<7x128x224xbf16, #tpu.memory_space<vmem>>, vector<1x128x224xbf16>
    %95 = vector.shape_cast %94 : vector<1x128x224xbf16> to vector<128x224xbf16>
    %cst_90 = arith.constant dense<0.000000e+00> : vector<16x224xf32>
    %96 = tpu.matmul %93, %95, %cst_90 {dimension_numbers = #tpu.dot_dimension_numbers<[1], [0], [0], [1], [0, 0, 1, 1], [], []>} : vector<16x128xbf16>, vector<128x224xbf16>, vector<16x224xf32> -> vector<16x224xf32>
    %97 = arith.addf %91, %96 : vector<16x224xf32>
    %c0_91 = arith.constant 0 : index
    %c0_92 = arith.constant 0 : index
    %98 = vector.load %arg7[%c0_91, %c0_92] : memref<1x224xf32, #tpu.memory_space<vmem>>, vector<1x224xf32>
    %99 = vector.broadcast %98 : vector<1x224xf32> to vector<16x224xf32>
    %100 = arith.addf %97, %99 : vector<16x224xf32>
    %cst_93 = arith.constant dense<0.000000e+00> : vector<224xf32>
    %101 = vector.multi_reduction <add>, %100, %cst_93 [0] : vector<16x224xf32> to vector<224xf32>
    %102 = vector.shape_cast %101 : vector<224xf32> to vector<1x224xf32>
    %c0_94 = arith.constant 0 : index
    %c0_95 = arith.constant 0 : index
    %103 = vector.load %arg12[%c0_94, %c0_95] : memref<224x224xf32, #tpu.memory_space<vmem>>, vector<224x224xf32>
    %cst_96 = arith.constant dense<0.000000e+00> : vector<1x224xf32>
    %104 = tpu.matmul %102, %103, %cst_96 {dimension_numbers = #tpu.dot_dimension_numbers<[1], [0], [0], [1], [0, 0, 1, 1], [], []>, precision = #tpu.contract_precision<fp32>} : vector<1x224xf32>, vector<224x224xf32>, vector<1x224xf32> -> vector<1x224xf32>
    %105 = vector.broadcast %104 : vector<1x224xf32> to vector<16x224xf32>
    %106 = arith.subf %100, %105 : vector<16x224xf32>
    %107 = arith.mulf %106, %106 : vector<16x224xf32>
    %cst_97 = arith.constant dense<0.000000e+00> : vector<224xf32>
    %108 = vector.multi_reduction <add>, %107, %cst_97 [0] : vector<16x224xf32> to vector<224xf32>
    %109 = vector.shape_cast %108 : vector<224xf32> to vector<1x224xf32>
    %c0_98 = arith.constant 0 : index
    %c0_99 = arith.constant 0 : index
    %110 = vector.load %arg12[%c0_98, %c0_99] : memref<224x224xf32, #tpu.memory_space<vmem>>, vector<224x224xf32>
    %cst_100 = arith.constant dense<0.000000e+00> : vector<1x224xf32>
    %111 = tpu.matmul %109, %110, %cst_100 {dimension_numbers = #tpu.dot_dimension_numbers<[1], [0], [0], [1], [0, 0, 1, 1], [], []>, precision = #tpu.contract_precision<fp32>} : vector<1x224xf32>, vector<224x224xf32>, vector<1x224xf32> -> vector<1x224xf32>
    %cst_101 = arith.constant 9.99999974E-6 : f32
    %112 = vector.broadcast %cst_101 : f32 to vector<1x224xf32>
    %113 = arith.addf %111, %112 : vector<1x224xf32>
    %114 = math.rsqrt %113 : vector<1x224xf32>
    %115 = vector.broadcast %114 : vector<1x224xf32> to vector<16x224xf32>
    %116 = arith.mulf %106, %115 : vector<16x224xf32>
    %c0_102 = arith.constant 0 : index
    %c0_103 = arith.constant 0 : index
    %117 = vector.load %arg8[%c0_102, %c0_103] : memref<1x224xf32, #tpu.memory_space<vmem>>, vector<1x224xf32>
    %118 = vector.broadcast %117 : vector<1x224xf32> to vector<16x224xf32>
    %119 = arith.mulf %116, %118 : vector<16x224xf32>
    %c0_104 = arith.constant 0 : index
    %c0_105 = arith.constant 0 : index
    %120 = vector.load %arg9[%c0_104, %c0_105] : memref<1x224xf32, #tpu.memory_space<vmem>>, vector<1x224xf32>
    %121 = vector.broadcast %120 : vector<1x224xf32> to vector<16x224xf32>
    %122 = arith.addf %119, %121 : vector<16x224xf32>
    %123 = arith.truncf %122 : vector<16x224xf32> to vector<16x224xbf16>
    %c0_106 = arith.constant 0 : index
    %c0_107 = arith.constant 0 : index
    %124 = vector.load %arg10[%c0_106, %c0_107] : memref<224x128xbf16, #tpu.memory_space<vmem>>, vector<224x128xbf16>
    %cst_108 = arith.constant dense<0.000000e+00> : vector<16x128xf32>
    %125 = tpu.matmul %123, %124, %cst_108 {dimension_numbers = #tpu.dot_dimension_numbers<[1], [0], [0], [1], [0, 0, 1, 1], [], []>} : vector<16x224xbf16>, vector<224x128xbf16>, vector<16x128xf32> -> vector<16x128xf32>
    %c0_109 = arith.constant 0 : index
    %c0_110 = arith.constant 0 : index
    %126 = vector.load %arg11[%c0_109, %c0_110] : memref<1x128xf32, #tpu.memory_space<vmem>>, vector<1x128xf32>
    %127 = vector.broadcast %126 : vector<1x128xf32> to vector<16x128xf32>
    %128 = arith.addf %125, %127 : vector<16x128xf32>
    %129 = arith.addf %3, %128 : vector<16x128xf32>
    %130 = arith.subf %1, %129 : vector<16x128xf32>
    %131 = arith.mulf %54, %130 : vector<16x128xf32>
    %132 = arith.addf %129, %131 : vector<16x128xf32>
    %c0_111 = arith.constant 0 : index
    %c0_112 = arith.constant 0 : index
    %c0_113 = arith.constant 0 : index
    %133 = vector.load %arg13[%c0_111, %c0_112, %c0_113] : memref<1x16x128xf32, #tpu.memory_space<vmem>>, vector<1x16x128xf32>
    %134 = vector.shape_cast %133 : vector<1x16x128xf32> to vector<16x128xf32>
    %135 = vector.shape_cast %132 : vector<16x128xf32> to vector<1x16x128xf32>
    tpu.vector_store %arg13[%c0_111, %c0_112, %c0_113], %135 {strides = array<i32>} : memref<1x16x128xf32, #tpu.memory_space<vmem>>, vector<1x16x128xf32>,
    return
  }
  func.func @transform_0(%arg0: i32) -> (i32, i32, i32) {
    %c0_i32 = arith.constant 0 : i32
    %c0_i32_0 = arith.constant 0 : i32
    %c0_i32_1 = arith.constant 0 : i32
    return %arg0, %c0_i32, %c0_i32_0 : i32, i32, i32
  }
  func.func @transform_1(%arg0: i32) -> (i32, i32, i32) {
    %c0_i32 = arith.constant 0 : i32
    %c0_i32_0 = arith.constant 0 : i32
    %c0_i32_1 = arith.constant 0 : i32
    return %arg0, %c0_i32, %c0_i32_0 : i32, i32, i32
  }
  func.func @transform_2(%arg0: i32) -> (i32, i32, i32) {
    %c0_i32 = arith.constant 0 : i32
    %c0_i32_0 = arith.constant 0 : i32
    %c0_i32_1 = arith.constant 0 : i32
    %c0_i32_2 = arith.constant 0 : i32
    return %c0_i32, %c0_i32_0, %c0_i32_1 : i32, i32, i32
  }
  func.func @transform_3(%arg0: i32) -> (i32, i32, i32) {
    %c0_i32 = arith.constant 0 : i32
    %c0_i32_0 = arith.constant 0 : i32
    %c0_i32_1 = arith.constant 0 : i32
    %c0_i32_2 = arith.constant 0 : i32
    return %c0_i32, %c0_i32_0, %c0_i32_1 : i32, i32, i32
  }
  func.func @transform_4(%arg0: i32) -> (i32, i32) {
    %c0_i32 = arith.constant 0 : i32
    %c0_i32_0 = arith.constant 0 : i32
    %c0_i32_1 = arith.constant 0 : i32
    return %c0_i32, %c0_i32_0 : i32, i32
  }
  func.func @transform_5(%arg0: i32) -> (i32, i32, i32) {
    %c0_i32 = arith.constant 0 : i32
    %c0_i32_0 = arith.constant 0 : i32
    %c0_i32_1 = arith.constant 0 : i32
    %c0_i32_2 = arith.constant 0 : i32
    return %c0_i32, %c0_i32_0, %c0_i32_1 : i32, i32, i32
  }
  func.func @transform_6(%arg0: i32) -> (i32, i32) {
    %c0_i32 = arith.constant 0 : i32
    %c0_i32_0 = arith.constant 0 : i32
    %c0_i32_1 = arith.constant 0 : i32
    return %c0_i32, %c0_i32_0 : i32, i32
  }
  func.func @transform_7(%arg0: i32) -> (i32, i32) {
    %c0_i32 = arith.constant 0 : i32
    %c0_i32_0 = arith.constant 0 : i32
    %c0_i32_1 = arith.constant 0 : i32
    return %c0_i32, %c0_i32_0 : i32, i32
  }
  func.func @transform_8(%arg0: i32) -> (i32, i32) {
    %c0_i32 = arith.constant 0 : i32
    %c0_i32_0 = arith.constant 0 : i32
    %c0_i32_1 = arith.constant 0 : i32
    return %c0_i32, %c0_i32_0 : i32, i32
  }
  func.func @transform_9(%arg0: i32) -> (i32, i32) {
    %c0_i32 = arith.constant 0 : i32
    %c0_i32_0 = arith.constant 0 : i32
    %c0_i32_1 = arith.constant 0 : i32
    return %c0_i32, %c0_i32_0 : i32, i32
  }
  func.func @transform_10(%arg0: i32) -> (i32, i32) {
    %c0_i32 = arith.constant 0 : i32
    %c0_i32_0 = arith.constant 0 : i32
    %c0_i32_1 = arith.constant 0 : i32
    return %c0_i32, %c0_i32_0 : i32, i32
  }
  func.func @transform_11(%arg0: i32) -> (i32, i32) {
    %c0_i32 = arith.constant 0 : i32
    %c0_i32_0 = arith.constant 0 : i32
    %c0_i32_1 = arith.constant 0 : i32
    return %c0_i32, %c0_i32_0 : i32, i32
  }
  func.func @transform_12(%arg0: i32) -> (i32, i32, i32) {
    %c0_i32 = arith.constant 0 : i32
    %c0_i32_0 = arith.constant 0 : i32
    %c0_i32_1 = arith.constant 0 : i32
    return %arg0, %c0_i32, %c0_i32_0 : i32, i32, i32
  }
}

</mosaic_0001>

<bundles_post_ra>
// kernel: tile.33
= control target key start
LH: loop header
LB: loop body
LE: loop exit
PB: predicated region body
PF: predicated region fallthrough
CT: control target
= control target key end

     0   :  { %s28_s0 = inlined_call_operand.vmem [shape: f32[14], index: 0, kind: input, shape index: {}]   ;;  %s29_s1 = inlined_call_operand.vmem [shape: f32[16,14], index: 1, kind: output, shape index: {}]  }
   0x1   :  { %v4_v0 = vld [vmem:[%s28_s0] ss:$0 sm:$0xff] }
   0x2   :  { %5 = vst [vmem:[%s29_s1] sm:$0xff] %v4_v0  ;;  %8 = vst [vmem:[%s29_s1 + $0x8] sm:$0xff] %v4_v0 }

// kernel: tile.34
= control target key start
LH: loop header
LB: loop body
LE: loop exit
PB: predicated region body
PF: predicated region fallthrough
CT: control target
= control target key end

     0   :  { %vm9_vm0 = vcmask 15360   ;;  %s151_s12 = smov 126   ;;  %s152_s13 = smov 98   ;;  %vm3_vm1 = vcmask 113664   ;;  %vm13_vm2 = vcmask 97280   ;;  %vm16_vm3 = vcmask 1048560   ;;  %s233_s0 = inlined_call_operand.vmem [shape: f32[16,14], index: 0, kind: input, shape index: {}]   ;;  %s234_s1 = inlined_call_operand.vmem [shape: f32[1,224], index: 1, kind: output, shape index: {}]  }
   0x1   :  { %v119_v0 = vld [vmem:[%s233_s0 + $0x9] sm:$0x1]   ;;  %v122_v3 = vld [vmem:[%s233_s0 + $0x7] sm:$0x1]   ;;  %v121_v4 = vld [vmem:[%s233_s0 + $0x8] sm:$0x1]  }
   0x2   :  { %v120_v1 = vld [vmem:[%s233_s0 + $0x9] sm:$0x1]   ;;  %26 = vrot.lane.b32.xlu1 %v122_v3, %s152_s13  ;;  %v123_v5 = vld [vmem:[%s233_s0 + $0x6] sm:$0x1]   ;;  %s153_s18 = smov 112   ;;  %s154_s19 = smov 84  }
   0x3   :  { %v10_v2 = vsel %vm9_vm0, %v120_v1, %v119_v0  ;;  %v124_v6 = vld [vmem:[%s233_s0 + $0xf] sm:$0x1]   ;;  %v125_v7 = vld [vmem:[%s233_s0 + $0x5] sm:$0x1]   ;;  %v2_v8 = vld [vmem:[%s233_s0] sm:$0x1]  }
   0x4   :  { %11 = vrot.lane.b32.xlu0 %v10_v2, %s151_s12  ;;  %4 = vst.msk [vmem:[#allocation0] sm:$0x1] %vm3_vm1, %v2_v8   ;;  %s155_s26 = smov 82   ;;  %s156_s27 = smov 70   ;;  %v126_v9 = vld [vmem:[%s233_s0 + $0xe] sm:$0x1]  }
   0x5   :  { %v127_v10 = vld [vmem:[%s233_s0 + $0x4] sm:$0x1]   ;;  %s157_s3 = smov 68   ;;  %s158_s4 = smov 56   ;;  %v128_v11 = vld [vmem:[%s233_s0 + $0xd] sm:$0x1]  }
   0x6   :  { %32 = vrot.lane.b32.xlu1 %v123_v5, %s154_s19  ;;  %v129_v12 = vld [vmem:[%s233_s0 + $0x3] sm:$0x1]   ;;  %s159_s9 = smov 54   ;;  %s160_s10 = smov 42   ;;  %v130_v13 = vld [vmem:[%s233_s0 + $0xc] sm:$0x1]  }
   0x7   :  { %v131_v14 = vld [vmem:[%s233_s0 + $0x2] sm:$0x1]   ;;  %s161_s15 = smov 40   ;;  %s162_s16 = smov 28   ;;  %v132_v15 = vld [vmem:[%s233_s0 + $0xb] sm:$0x1]  }
   0x8   :  { %20 = vrot.lane.b32.xlu0 %v121_v4, %s153_s18  ;;  %v133_v16 = vld [vmem:[%s233_s0 + $0x1] sm:$0x1]   ;;  %s163_s21 = smov 26   ;;  %s164_s22 = smov 14   ;;  %v134_v17 = vld [vmem:[%s233_s0 + $0xa] sm:$0x1]  }
   0x9   :  { %s165_s0 = smov 12   ;;  %vm22_vm4 = vcmask 1032064   ;;  %vm28_vm5 = vcmask 917264   ;;  %vm34_vm6 = vcmask 802464   ;;  %vm40_vm7 = vcmask 786064  }
   0xa   :  { %45 = vrot.lane.b32.xlu1 %v125_v7, %s156_s27  ;;  %vm47_vm8 = vcmask 687664   ;;  %vm53_vm9 = vcmask 671264   ;;  %vm60_vm10 = vcmask 572864   ;;  %vm66_vm11 = vcmask 556464  }
   0xb   :  { %vm73_vm12 = vcmask 458064   ;;  %vm79_vm13 = vcmask 441664   ;;  %vm86_vm14 = vcmask 343264   ;;  %vm92_vm15 = vcmask 326864  }
   0xc   :  { %38 = vrot.lane.b32.xlu0 %v124_v6, %s155_s26  ;;  %vm99_vm0 = vcmask 228464   ;;  %vm105_vm1 = vcmask 212064  }
   0xe   :  { %58 = vrot.lane.b32.xlu1 %v127_v10, %s158_s4 }
  0x10   :  { %51 = vrot.lane.b32.xlu0 %v126_v9, %s157_s3 }
  0x12   :  { %71 = vrot.lane.b32.xlu1 %v129_v12, %s160_s10 }
  0x14   :  { %64 = vrot.lane.b32.xlu0 %v128_v11, %s159_s9 }
  0x16   :  { %84 = vrot.lane.b32.xlu1 %v131_v14, %s162_s16 }
  0x18   :  { %77 = vrot.lane.b32.xlu0 %v130_v13, %s161_s15 }
  0x1a   :  { %97 = vrot.lane.b32.xlu1 %v133_v16, %s164_s22 }
  0x1c   :  { %90 = vrot.lane.b32.xlu0 %v132_v15, %s163_s21 }
  0x20   :  { %103 = vrot.lane.b32.xlu0 %v134_v17, %s165_s0 }
  0x74   :  { %v27_v19 = vpop.permute.xlu1 %26  }
  0x76   :  { %v12_v18 = vpop.permute.xlu0 %11  }
  0x77   :  { %15 = vst.msk [vmem:[#allocation0 + $0x8] sm:$0x1] %vm13_vm2, %v12_v18  }
  0x78   :  { %17 = vst.msk [vmem:[#allocation0] sm:$0x1] %vm16_vm3, %v12_v18   ;;  %v33_v21 = vpop.permute.xlu1 %32  }
  0x7a   :  { %v21_v20 = vpop.permute.xlu0 %20  }
  0x7b   :  { %23 = vst.msk [vmem:[#allocation0] sm:$0x1] %vm22_vm4, %v21_v20  }
  0x7c   :  { %29 = vst.msk [vmem:[#allocation0] sm:$0x1] %vm28_vm5, %v27_v19   ;;  %v46_v23 = vpop.permute.xlu1 %45  }
  0x7d   :  { %35 = vst.msk [vmem:[#allocation0] sm:$0x1] %vm34_vm6, %v33_v21  }
  0x7e   :  { %v39_v22 = vpop.permute.xlu0 %38   ;;  %48 = vst.msk [vmem:[#allocation0] sm:$0x1] %vm47_vm8, %v46_v23  }
  0x7f   :  { %42 = vst.msk [vmem:[#allocation0 + $0x8] sm:$0x1] %vm40_vm7, %v39_v22  }
  0x80   :  { %v59_v25 = vpop.permute.xlu1 %58  }
  0x81   :  { %61 = vst.msk [vmem:[#allocation0] sm:$0x1] %vm60_vm10, %v59_v25  }
  0x82   :  { %v52_v24 = vpop.permute.xlu0 %51  }
  0x83   :  { %55 = vst.msk [vmem:[#allocation0 + $0x8] sm:$0x1] %vm53_vm9, %v52_v24  }
  0x84   :  { %v72_v27 = vpop.permute.xlu1 %71  }
  0x85   :  { %74 = vst.msk [vmem:[#allocation0] sm:$0x1] %vm73_vm12, %v72_v27  }
  0x86   :  { %v65_v26 = vpop.permute.xlu0 %64  }
  0x87   :  { %68 = vst.msk [vmem:[#allocation0 + $0x8] sm:$0x1] %vm66_vm11, %v65_v26  }
  0x88   :  { %v85_v29 = vpop.permute.xlu1 %84  }
  0x89   :  { %87 = vst.msk [vmem:[#allocation0] sm:$0x1] %vm86_vm14, %v85_v29  }
  0x8a   :  { %v78_v28 = vpop.permute.xlu0 %77  }
  0x8b   :  { %81 = vst.msk [vmem:[#allocation0 + $0x8] sm:$0x1] %vm79_vm13, %v78_v28  }
  0x8c   :  { %v98_v31 = vpop.permute.xlu1 %97  }
  0x8d   :  { %100 = vst.msk [vmem:[#allocation0] sm:$0x1] %vm99_vm0, %v98_v31  }
  0x8e   :  { %v91_v30 = vpop.permute.xlu0 %90  }
  0x8f   :  { %94 = vst.msk [vmem:[#allocation0 + $0x8] sm:$0x1] %vm92_vm15, %v91_v30  }
  0x92   :  { %v104_v32 = vpop.permute.xlu0 %103  }
  0x93   :  { %107 = vst.msk [vmem:[#allocation0 + $0x8] sm:$0x1] %vm105_vm1, %v104_v32  }
  0x94   :  { %v111_v33 = vld [vmem:[#allocation0] sm:$0x1] }
  0x95   :  { %113 = vst [vmem:[%s234_s1] sm:$0x1] %v111_v33 }
  0x9a   :  { %v115_v34 = vld [vmem:[#allocation0 + $0x8] sm:$0x1] }
  0x9b   :  { %135 = vst [vmem:[%s234_s1 + $0x1] sm:$0x1] %v115_v34 }

// kernel: tile.28
= control target key start
LH: loop header
LB: loop body
LE: loop exit
PB: predicated region body
PF: predicated region fallthrough
CT: control target
= control target key end

     0   :  { %s28_s0 = inlined_call_operand.vmem [shape: f32[8], index: 0, kind: input, shape index: {}]   ;;  %s29_s1 = inlined_call_operand.vmem [shape: f32[16,8], index: 1, kind: output, shape index: {}]  }
   0x1   :  { %v4_v0 = vld [vmem:[%s28_s0] ss:$0 sm:$0xff] }
   0x2   :  { %5 = vst [vmem:[%s29_s1] sm:$0xff] %v4_v0  ;;  %8 = vst [vmem:[%s29_s1 + $0x8] sm:$0xff] %v4_v0 }

// kernel: tile.29
= control target key start
LH: loop header
LB: loop body
LE: loop exit
PB: predicated region body
PF: predicated region fallthrough
CT: control target
= control target key end

     0   :  { %s131_s10 = smov 120   ;;  %s132_s11 = smov 104   ;;  %vm3_vm0 = vcmask 64512   ;;  %vm9_vm1 = vcmask 1048512   ;;  %vm15_vm2 = vcmask 982912   ;;  %vm21_vm3 = vcmask 917312   ;;  %s207_s0 = inlined_call_operand.vmem [shape: f32[16,8], index: 0, kind: input, shape index: {}]   ;;  %s208_s1 = inlined_call_operand.vmem [shape: f32[1,128], index: 1, kind: output, shape index: {}]  }
   0x1   :  { %v101_v0 = vld [vmem:[%s207_s0 + $0xf] sm:$0x1]   ;;  %v103_v1 = vld [vmem:[%s207_s0 + $0xd] sm:$0x1]   ;;  %v102_v2 = vld [vmem:[%s207_s0 + $0xe] sm:$0x1]  }
   0x2   :  { %7 = vrot.lane.b32.xlu0 %v101_v0, %s131_s10  ;;  %19 = vrot.lane.b32.xlu1 %v103_v1, %s132_s11  ;;  %v104_v3 = vld [vmem:[%s207_s0 + $0xc] sm:$0x1]   ;;  %s133_s16 = smov 112   ;;  %s134_s17 = smov 96   ;;  %v105_v4 = vld [vmem:[%s207_s0 + $0xb] sm:$0x1]  }
   0x3   :  { %v106_v5 = vld [vmem:[%s207_s0 + $0xa] sm:$0x1]   ;;  %v2_v6 = vld [vmem:[%s207_s0] sm:$0x1]   ;;  %s135_s24 = smov 88   ;;  %s136_s25 = smov 80  }
   0x4   :  { %4 = vst.msk [vmem:[#allocation0] sm:$0x1] %vm3_vm0, %v2_v6   ;;  %v107_v7 = vld [vmem:[%s207_s0 + $0x9] sm:$0x1]   ;;  %v108_v8 = vld [vmem:[%s207_s0 + $0x8] sm:$0x1]  }
   0x5   :  { %s137_s30 = smov 72   ;;  %s138_s2 = smov 64   ;;  %v109_v9 = vld [vmem:[%s207_s0 + $0x7] sm:$0x1]   ;;  %v110_v10 = vld [vmem:[%s207_s0 + $0x6] sm:$0x1]  }
   0x6   :  { %13 = vrot.lane.b32.xlu0 %v102_v2, %s133_s16  ;;  %25 = vrot.lane.b32.xlu1 %v104_v3, %s134_s17  ;;  %s139_s7 = smov 56   ;;  %s140_s8 = smov 48   ;;  %v111_v11 = vld [vmem:[%s207_s0 + $0x5] sm:$0x1]   ;;  %v112_v12 = vld [vmem:[%s207_s0 + $0x4] sm:$0x1]  }
   0x7   :  { %s141_s13 = smov 40   ;;  %s142_s14 = smov 32   ;;  %v113_v13 = vld [vmem:[%s207_s0 + $0x3] sm:$0x1]   ;;  %v114_v14 = vld [vmem:[%s207_s0 + $0x2] sm:$0x1]  }
   0x8   :  { %s143_s19 = smov 24   ;;  %s144_s20 = smov 16   ;;  %v115_v15 = vld [vmem:[%s207_s0 + $0x1] sm:$0x1]   ;;  %vm27_vm4 = vcmask 851712   ;;  %vm33_vm5 = vcmask 786112  }
   0x9   :  { %s145_s0 = smov 8   ;;  %vm39_vm6 = vcmask 720512   ;;  %vm45_vm7 = vcmask 654912   ;;  %vm51_vm8 = vcmask 589312   ;;  %vm57_vm9 = vcmask 523712  }
   0xa   :  { %31 = vrot.lane.b32.xlu0 %v105_v4, %s135_s24  ;;  %37 = vrot.lane.b32.xlu1 %v106_v5, %s136_s25  ;;  %vm63_vm10 = vcmask 458112   ;;  %vm69_vm11 = vcmask 392512   ;;  %vm75_vm12 = vcmask 326912   ;;  %vm81_vm13 = vcmask 261312  }
   0xb   :  { %vm87_vm14 = vcmask 195712   ;;  %vm93_vm15 = vcmask 130112  }
   0xe   :  { %43 = vrot.lane.b32.xlu0 %v107_v7, %s137_s30  ;;  %49 = vrot.lane.b32.xlu1 %v108_v8, %s138_s2 }
  0x12   :  { %55 = vrot.lane.b32.xlu0 %v109_v9, %s139_s7  ;;  %61 = vrot.lane.b32.xlu1 %v110_v10, %s140_s8 }
  0x16   :  { %67 = vrot.lane.b32.xlu0 %v111_v11, %s141_s13  ;;  %73 = vrot.lane.b32.xlu1 %v112_v12, %s142_s14 }
  0x1a   :  { %79 = vrot.lane.b32.xlu0 %v113_v13, %s143_s19  ;;  %85 = vrot.lane.b32.xlu1 %v114_v14, %s144_s20 }
  0x1e   :  { %91 = vrot.lane.b32.xlu0 %v115_v15, %s145_s0 }
  0x74   :  { %v8_v16 = vpop.permute.xlu0 %7   ;;  %v20_v17 = vpop.permute.xlu1 %19  }
  0x75   :  { %10 = vst.msk [vmem:[#allocation0] sm:$0x1] %vm9_vm1, %v8_v16  }
  0x78   :  { %v14_v18 = vpop.permute.xlu0 %13   ;;  %v26_v19 = vpop.permute.xlu1 %25  }
  0x79   :  { %16 = vst.msk [vmem:[#allocation0] sm:$0x1] %vm15_vm2, %v14_v18  }
  0x7a   :  { %22 = vst.msk [vmem:[#allocation0] sm:$0x1] %vm21_vm3, %v20_v17  }
  0x7b   :  { %28 = vst.msk [vmem:[#allocation0] sm:$0x1] %vm27_vm4, %v26_v19  }
  0x7c   :  { %v32_v20 = vpop.permute.xlu0 %31   ;;  %v38_v21 = vpop.permute.xlu1 %37  }
  0x7d   :  { %34 = vst.msk [vmem:[#allocation0] sm:$0x1] %vm33_vm5, %v32_v20  }
  0x7e   :  { %40 = vst.msk [vmem:[#allocation0] sm:$0x1] %vm39_vm6, %v38_v21  }
  0x80   :  { %v44_v22 = vpop.permute.xlu0 %43   ;;  %v50_v23 = vpop.permute.xlu1 %49  }
  0x81   :  { %46 = vst.msk [vmem:[#allocation0] sm:$0x1] %vm45_vm7, %v44_v22  }
  0x82   :  { %52 = vst.msk [vmem:[#allocation0] sm:$0x1] %vm51_vm8, %v50_v23  }
  0x84   :  { %v56_v24 = vpop.permute.xlu0 %55   ;;  %v62_v25 = vpop.permute.xlu1 %61  }
  0x85   :  { %58 = vst.msk [vmem:[#allocation0] sm:$0x1] %vm57_vm9, %v56_v24  }
  0x86   :  { %64 = vst.msk [vmem:[#allocation0] sm:$0x1] %vm63_vm10, %v62_v25  }
  0x88   :  { %v68_v26 = vpop.permute.xlu0 %67   ;;  %v74_v27 = vpop.permute.xlu1 %73  }
  0x89   :  { %70 = vst.msk [vmem:[#allocation0] sm:$0x1] %vm69_vm11, %v68_v26  }
  0x8a   :  { %76 = vst.msk [vmem:[#allocation0] sm:$0x1] %vm75_vm12, %v74_v27  }
  0x8c   :  { %v80_v28 = vpop.permute.xlu0 %79   ;;  %v86_v29 = vpop.permute.xlu1 %85  }
  0x8d   :  { %82 = vst.msk [vmem:[#allocation0] sm:$0x1] %vm81_vm13, %v80_v28  }
  0x8e   :  { %88 = vst.msk [vmem:[#allocation0] sm:$0x1] %vm87_vm14, %v86_v29  }
  0x90   :  { %v92_v30 = vpop.permute.xlu0 %91  }
  0x91   :  { %94 = vst.msk [vmem:[#allocation0] sm:$0x1] %vm93_vm15, %v92_v30  }
  0x98   :  { %v98_v31 = vld [vmem:[#allocation0] sm:$0x1] }
  0x99   :  { %100 = vst [vmem:[%s208_s1] sm:$0x1] %v98_v31 }

// kernel: phycell_cell.1
= control target key start
LH: loop header
LB: loop body
LE: loop exit
PB: predicated region body
PF: predicated region fallthrough
CT: control target
= control target key end

     0   :  { %s6496_s21 = smov 0   ;;  %s8967_s0 = inlined_call_operand.vmem [shape: f32[2,16,128], index: 0, kind: input, shape index: {}]   ;;  %s8968_s1 = inlined_call_operand.vmem [shape: f32[2,16,128], index: 1, kind: input, shape index: {}]   ;;  %s8969_s2 = inlined_call_operand.vmem [shape: bf16[3,128,128], index: 2, kind: input, shape index: {}]   ;;  %s8970_s3 = inlined_call_operand.vmem [shape: bf16[3,128,128], index: 3, kind: input, shape index: {}]   ;;  %s8971_s4 = inlined_call_operand.vmem [shape: f32[1,128], index: 4, kind: input, shape index: {}]   ;;  %s8972_s5 = inlined_call_operand.vmem [shape: bf16[7,128,224], index: 5, kind: input, shape index: {}]   ;;  %s8973_s6 = inlined_call_operand.vmem [shape: f32[1,224], index: 6, kind: input, shape index: {}]   ;;  %s8974_s7 = inlined_call_operand.vmem [shape: f32[1,224], index: 7, kind: input, shape index: {}]   ;;  %s8975_s8 = inlined_call_operand.vmem [shape: f32[1,224], index: 8, kind: input, shape index: {}]   ;;  %s8976_s9 = inlined_call_operand.vmem [shape: bf16[224,128], index: 9, kind: input, shape index: {}]   ;;  %s8977_s10 = inlined_call_operand.vmem [shape: f32[1,128], index: 10, kind: input, shape index: {}]   ;;  %s8978_s11 = inlined_call_operand.vmem [shape: f32[224,224], index: 11, kind: input, shape index: {}]   ;;  %s8979_s12 = inlined_call_operand.vmem [shape: f32[2,16,128], index: 12, kind: output, shape index: {}]  }
   0x1 LB: > { %s4916_s22 = sadd.s32 4294967295, %s6426_s21   ;;  %p4920_p0 = scmp.ge.s32.totalorder %s6426_s21, 1  ;;  %s6426_s21 = sphi %s6496_s21, %s22_s21  }
   0x2   : > { %p372_p1 = scmp.lt.s32.totalorder %s6426_s21, 3 }
   0x4   : > { %p373_p2 = pnand %p4920_p0, %p372_p1 }
   0x6   : > { %376 = sbr.rel (%p373_p2) target bundleno = 1751 (0x6d7), region = 68 }
   0xd   : > { %v6174_v0 = vld [vmem:[%s8970_s3] sm:$0xff]   ;;  %v6428_v1 = vmov 0.0   ;;  %v6176_v3 = vld [vmem:[%s8970_s3 + $0x8] sm:$0xff]   ;;  %vm6429_vm0 = vmmov 0   ;;  %p419_p3 = scmp.lt.s32.totalorder %s4916_s22, 1  ;;  %v6178_v5 = vld [vmem:[%s8970_s3 + $0x10] sm:$0xff]  }
   0xe   : > { %5325 = vmatprep.subr.bf16.mxu1 %v6428_v1  ;;  %439 = vst [vmem:[#allocation2] sm:$0xff] %v6428_v1  ;;  %440 = vst [vmem:[#allocation2 + $0x8] sm:$0xff] %v6428_v1  ;;  %5365 = vmatprep.subr.bf16.mxu0 %v6428_v1  ;;  %v6175_v2 = vld [vmem:[%s8969_s2 + $0x40] sm:$0xff]   ;;  %v6177_v4 = vld [vmem:[%s8969_s2 + $0x48] sm:$0xff]   ;;  %v8988_v54 = vmov 0   ;;  %vm2164_vm1 = vcmask 785408  }
   0xf   : > { %441 = vst [vmem:[#allocation2 + $0x10] sm:$0x3] %v6428_v1  ;;  %442 = vst [vmem:[#allocation3] sm:$0xff] %v6428_v1  ;;  %5326 = vmatpush3.bf16.msra.mxu1 %v6174_v0  ;;  %5381 = vmatprep.mubr.msk.bf16.mxu0 %vm6429_vm0, %v6428_v1  ;;  %s9722_s22 = smov (!%p419_p3, %s4916_s22), 1  ;;  %v6179_v6 = vld [vmem:[%s8969_s2 + $0x50] sm:$0xff]   ;;  %v6180_v7 = vld [vmem:[%s8970_s3 + $0x18] sm:$0xff]  }
  0x10   : > { %443 = vst [vmem:[#allocation3 + $0x8] sm:$0xff] %v6428_v1  ;;  %444 = vst [vmem:[#allocation3 + $0x10] sm:$0x3f] %v6428_v1  ;;  %5366 = vmatpush3.bf16.msra.mxu0 %v6175_v2  ;;  %5327 = vmatprep.subr.bf16.mxu1 %v6428_v1  ;;  %s6541_s19 = sshll.u32 %s9722_s22, 4  ;;  %v6181_v8 = vld [vmem:[%s8969_s2 + $0x58] sm:$0xff]   ;;  %v6182_v9 = vld [vmem:[%s8970_s3 + $0x20] sm:$0xff]  }
  0x11   : > { %5367 = vmatprep.subr.bf16.mxu0 %v6428_v1  ;;  %5341 = vmatprep.mubr.msk.bf16.mxu1 %vm6429_vm0, %v6428_v1  ;;  %s423_s26 = scalar_lea.vmem %s8967_s0, %s6541_s19  ;;  %s428_s22 = scalar_lea.vmem %s8968_s1, %s6541_s19  ;;  %v6183_v10 = vld [vmem:[%s8969_s2 + $0x60] sm:$0xff]   ;;  %v6184_v15 = vld [vmem:[%s8970_s3 + $0x28] sm:$0xff]   ;;  %v6186_v17 = vld [vmem:[%s8970_s3 + $0x30] sm:$0xff]  }
  0x12   : > { %v435_v11 = vld [vmem:[%s423_s26] sm:$0xff]  ;;  %v436_v12 = vld [vmem:[%s423_s26 + $0x8] sm:$0xff]  ;;  %v6187_v18 = vld [vmem:[%s8969_s2 + $0x70] sm:$0xff]   ;;  %s433_s20 = scalar_lea.vmem %s8979_s12, %s6541_s19 }
  0x13   : > { %5328 = vmatpush3.bf16.msra.mxu1 %v6176_v3  ;;  %v6564_v13 = vld [vmem:[%s428_s22] sm:$0xff]  ;;  %445 = vst [vmem:[#allocation2 + $0x1] sm:$0xff] %v435_v11  ;;  %446 = vst [vmem:[#allocation2 + $0x9] sm:$0xff] %v436_v12  ;;  %v6566_v14 = vld [vmem:[%s428_s22 + $0x8] sm:$0xff]  ;;  %v667_v24 = vpack.c.bf16 %v436_v12, %v435_v11 }
  0x14   : > { %5368 = vmatpush3.bf16.msra.mxu0 %v6177_v4  ;;  %5329 = vmatprep.subr.bf16.mxu1 %v6428_v1  ;;  %447 = vst [vmem:[#allocation3 + $0x3] sm:$0xff] %v6564_v13  ;;  %448 = vst [vmem:[#allocation3 + $0xb] sm:$0xff] %v6566_v14  ;;  %v6185_v16 = vld [vmem:[%s8969_s2 + $0x68] sm:$0xff]   ;;  %v6188_v19 = vld [vmem:[%s8970_s3 + $0x38] sm:$0xff]   ;;  %v6753_v12 = vpack.c.bf16 %v6566_v14, %v6564_v13 }
  0x15   : > { %5369 = vmatprep.subr.bf16.mxu0 %v6428_v1  ;;  %v6189_v22 = vld [vmem:[%s8969_s2 + $0x78] sm:$0xff]   ;;  %v6190_v25 = vld [vmem:[%s8969_s2] sm:$0xff]   ;;  %v6192_v27 = vld [vmem:[%s8969_s2 + $0x8] sm:$0xff]  }
  0x16   : > { %v6191_v26 = vld [vmem:[%s8969_s2 + $0x80] sm:$0xff]   ;;  %v6193_v28 = vld [vmem:[%s8969_s2 + $0x88] sm:$0xff]   ;;  %v6194_v29 = vld [vmem:[%s8969_s2 + $0x10] sm:$0xff]  }
  0x17   : > { %5330 = vmatpush3.bf16.msra.mxu1 %v6178_v5  ;;  %v6195_v30 = vld [vmem:[%s8969_s2 + $0x90] sm:$0xff]   ;;  %v6196_v31 = vld [vmem:[%s8969_s2 + $0x18] sm:$0xff]   ;;  %v6198_v33 = vld [vmem:[%s8969_s2 + $0x20] sm:$0xff]  }
  0x18   : > { %5370 = vmatpush3.bf16.msra.mxu0 %v6179_v6  ;;  %5331 = vmatprep.subr.bf16.mxu1 %v6428_v1  ;;  %v6197_v32 = vld [vmem:[%s8969_s2 + $0x98] sm:$0xff]   ;;  %v6199_v34 = vld [vmem:[%s8969_s2 + $0xa0] sm:$0xff]   ;;  %v6200_v35 = vld [vmem:[%s8969_s2 + $0x28] sm:$0xff]  }
  0x19   : > { %5371 = vmatprep.subr.bf16.mxu0 %v6428_v1  ;;  %v6201_v36 = vld [vmem:[%s8969_s2 + $0xa8] sm:$0xff]   ;;  %v6202_v37 = vld [vmem:[%s8969_s2 + $0x30] sm:$0xff]   ;;  %v6204_v39 = vld [vmem:[%s8969_s2 + $0x38] sm:$0xff]  }
  0x1a   : > { %v6203_v38 = vld [vmem:[%s8969_s2 + $0xb0] sm:$0xff]   ;;  %v449_v40 = vld [vmem:[#allocation2] sm:$0xff]  ;;  %v6205_v41 = vld [vmem:[%s8969_s2 + $0xb8] sm:$0xff]  }
  0x1b   : > { %5332 = vmatpush3.bf16.msra.mxu1 %v6180_v7  ;;  %v452_v20 = vld [vmem:[#allocation3 + $0x2] sm:$0xff]  ;;  %v453_v21 = vld [vmem:[#allocation3 + $0xa] sm:$0xff]  ;;  %v888_v44 = vld [vmem:[#allocation2 + $0xa] sm:$0xff] }
  0x1c   : > { %5372 = vmatpush3.bf16.msra.mxu0 %v6181_v8  ;;  %5333 = vmatprep.subr.bf16.mxu1 %v6428_v1  ;;  %v6594_v23 = vpack.c.bf16 %v453_v21, %v452_v20  ;;  %v450_v42 = vld [vmem:[#allocation2 + $0x8] sm:$0xff]  ;;  %v6209_v48 = vld [vmem:[%s8970_s3 + $0x40] sm:$0xff]   ;;  %v6212_v50 = vld [vmem:[%s8972_s5 + $0x94] ss:$8 sps:$4 sm:$0xff]  }
  0x1d   : > { %5373 = vmatprep.subr.bf16.mxu0 %v6428_v1  ;;  %v887_v43 = vld [vmem:[#allocation2 + $0x2] sm:$0xff]  ;;  %v451_v46 = vpack.c.bf16 %v450_v42, %v449_v40  ;;  %v6210_v52 = vld [vmem:[%s8972_s5 + $0x90] ss:$8 sps:$4 sm:$0xff]   ;;  %v6220_v57 = vld [vmem:[%s8972_s5 + $0xb4] ss:$8 sps:$4 sm:$0xff]  }
  0x1e   : > { %v6208_v45 = vld [vmem:[%s8972_s5 + $0x84] ss:$8 sps:$4 sm:$0xff]   ;;  %v889_v47 = vpack.c.bf16 %v888_v44, %v887_v43  ;;  %v6206_v49 = vld [vmem:[%s8972_s5 + $0x80] ss:$8 sps:$4 sm:$0xff]   ;;  %v6217_v55 = vld [vmem:[%s8970_s3 + $0x50] sm:$0xff]  }
  0x1f   : > { %5334 = vmatpush3.bf16.msra.mxu1 %v6182_v9  ;;  %v6213_v51 = vld [vmem:[%s8970_s3 + $0x48] sm:$0xff]   ;;  %v6221_v58 = vld [vmem:[%s8970_s3 + $0x58] sm:$0xff]   ;;  %v6225_v61 = vld [vmem:[%s8970_s3 + $0x60] sm:$0xff]  }
  0x20   : > { %5374 = vmatpush3.bf16.msra.mxu0 %v6183_v10  ;;  %5335 = vmatprep.subr.bf16.mxu1 %v6428_v1  ;;  %v6216_v53 = vld [vmem:[%s8972_s5 + $0xa4] ss:$8 sps:$4 sm:$0xff]   ;;  %v6214_v56 = vld [vmem:[%s8972_s5 + $0xa0] ss:$8 sps:$4 sm:$0xff]   ;;  %v6218_v59 = vld [vmem:[%s8972_s5 + $0xb0] ss:$8 sps:$4 sm:$0xff]  }
  0x21   : > { %5375 = vmatprep.subr.bf16.mxu0 %v6428_v1  ;;  %v6224_v60 = vld [vmem:[%s8972_s5 + $0xc4] ss:$8 sps:$4 sm:$0xff]   ;;  %v6222_v62 = vld [vmem:[%s8972_s5 + $0xc0] ss:$8 sps:$4 sm:$0xff]   ;;  %v6228_v63 = vld [vmem:[%s8972_s5 + $0xd4] ss:$8 sps:$4 sm:$0xff]  }
  0x22   : > { %v6229_v0 = vld [vmem:[%s8970_s3 + $0x68] sm:$0xff]   ;;  %v6226_v2 = vld [vmem:[%s8972_s5 + $0xd0] ss:$8 sps:$4 sm:$0xff]   ;;  %v6236_v6 = vld [vmem:[%s8972_s5 + $0xf4] ss:$8 sps:$4 sm:$0xff]  }
  0x23   : > { %5336 = vmatpush3.bf16.msra.mxu1 %v6184_v15  ;;  %v6232_v3 = vld [vmem:[%s8972_s5 + $0xe4] ss:$8 sps:$4 sm:$0xff]   ;;  %v6233_v4 = vld [vmem:[%s8970_s3 + $0x70] sm:$0xff]   ;;  %v6230_v5 = vld [vmem:[%s8972_s5 + $0xe0] ss:$8 sps:$4 sm:$0xff]  }
  0x24   : > { %5376 = vmatpush3.bf16.msra.mxu0 %v6185_v16  ;;  %5337 = vmatprep.subr.bf16.mxu1 %v6428_v1  ;;  %v6234_v7 = vld [vmem:[%s8972_s5 + $0xf0] ss:$8 sps:$4 sm:$0xff]   ;;  %v1150_v10 = vld [vmem:[#allocation3 + $0x9] sm:$0xff] }
  0x25   : > { %5377 = vmatprep.subr.bf16.mxu0 %v6428_v1  ;;  %v6237_v8 = vld [vmem:[%s8970_s3 + $0x78] sm:$0xff]   ;;  %v6240_v11 = vld [vmem:[%s8972_s5 + $0x4] ss:$8 sps:$4 sm:$0xff]   ;;  %v6249_v20 = vld [vmem:[%s8970_s3 + $0x90] sm:$0xff]  }
  0x26   : > { %v1149_v9 = vld [vmem:[#allocation3 + $0x1] sm:$0xff]  ;;  %v6245_v13 = vld [vmem:[%s8970_s3 + $0x88] sm:$0xff]  }
  0x27   : > { %5338 = vmatpush3.bf16.msra.mxu1 %v6186_v17  ;;  %v6241_v15 = vld [vmem:[%s8970_s3 + $0x80] sm:$0xff]   ;;  %v1151_v16 = vpack.c.bf16 %v1150_v10, %v1149_v9  ;;  %v6242_v14 = vld [vmem:[%s8972_s5 + $0x10] ss:$8 sps:$4 sm:$0xff]   ;;  %v6317_v10 = vld [vmem:[%s8972_s5 + $0x1f4] ss:$8 sps:$4 sm:$0xff]  }
  0x28   : > { %5378 = vmatpush3.bf16.msra.mxu0 %v6187_v18  ;;  %5339 = vmatprep.subr.bf16.mxu1 %v6428_v1  ;;  %v6238_v17 = vld [vmem:[%s8972_s5] ss:$8 sps:$4 sm:$0xff]   ;;  %v6244_v18 = vld [vmem:[%s8972_s5 + $0x14] ss:$8 sps:$4 sm:$0xff]   ;;  %v6272_v40 = vld [vmem:[%s8972_s5 + $0x104] ss:$8 sps:$4 sm:$0xff]  }
  0x29   : > { %5379 = vmatprep.subr.bf16.mxu0 %v6428_v1  ;;  %v6246_v21 = vld [vmem:[%s8972_s5 + $0x20] ss:$8 sps:$4 sm:$0xff]  }
  0x2a   : > { %v1131_v42 = vld [vmem:[#allocation3 + $0x8] sm:$0xff] }
  0x2b   : > { %5340 = vmatpush3.bf16.msra.mxu1 %v6188_v19  ;;  %v6248_v19 = vld [vmem:[%s8972_s5 + $0x24] ss:$8 sps:$4 sm:$0xff]   ;;  %v6312_v9 = vld [vmem:[%s8972_s5 + $0x1e0] ss:$8 sps:$4 sm:$0xff]  }
  0x2c   : > { %5380 = vmatpush3.bf16.msra.mxu0 %v6189_v22  ;;  %5345 = vmatprep.subr.bf16.mxu1 %v6428_v1  ;;  %v6252_v22 = vld [vmem:[%s8972_s5 + $0x34] ss:$8 sps:$4 sm:$0xff]  }
  0x2d   : > { %5405 = vmatprep.subr.bf16.mxu0 %v6428_v1 }
  0x2e   : > { %5342 = vmatmul.mubr.bf16.vlgmr.msra.gmra.mrb[0].mxu1 %v6594_v23 }
  0x2f   : > { %5382 = vmatmul.mubr.bf16.vlgmr.msra.gmra.mrb[0].mxu0 %v667_v24  ;;  %5346 = vmatpush3.bf16.msra.mxu1 %v6190_v25  ;;  %v6253_v24 = vld [vmem:[%s8970_s3 + $0x98] sm:$0xff]  }
  0x30   : > { %5406 = vmatpush3.bf16.msra.mxu0 %v6191_v26  ;;  %5347 = vmatprep.subr.bf16.mxu1 %v6428_v1  ;;  %v6250_v25 = vld [vmem:[%s8972_s5 + $0x30] ss:$8 sps:$4 sm:$0xff]   ;;  %v6256_v26 = vld [vmem:[%s8972_s5 + $0x44] ss:$8 sps:$4 sm:$0xff]  }
  0x31   : > { %5407 = vmatprep.subr.bf16.mxu0 %v6428_v1  ;;  %5361 = vmatprep.mubr.msk.bf16.mxu1 %vm6429_vm0, %v6428_v1 }
  0x32   : > { %5421 = vmatprep.mubr.msk.bf16.mxu0 %vm6429_vm0, %v6428_v1 }
  0x33   : > { %5348 = vmatpush3.bf16.msra.mxu1 %v6192_v27  ;;  %v6257_v27 = vld [vmem:[%s8970_s3 + $0xa0] sm:$0xff]  }
  0x34   : > { %5408 = vmatpush3.bf16.msra.mxu0 %v6193_v28  ;;  %5349 = vmatprep.subr.bf16.mxu1 %v6428_v1  ;;  %v6254_v28 = vld [vmem:[%s8972_s5 + $0x40] ss:$8 sps:$4 sm:$0xff]  }
  0x35   : > { %5409 = vmatprep.subr.bf16.mxu0 %v6428_v1 }
  0x37   : > { %5350 = vmatpush3.bf16.msra.mxu1 %v6194_v29  ;;  %v6260_v29 = vld [vmem:[%s8972_s5 + $0x54] ss:$8 sps:$4 sm:$0xff]  }
  0x38   : > { %5410 = vmatpush3.bf16.msra.mxu0 %v6195_v30  ;;  %5351 = vmatprep.subr.bf16.mxu1 %v6428_v1  ;;  %v6258_v30 = vld [vmem:[%s8972_s5 + $0x50] ss:$8 sps:$4 sm:$0xff]  }
  0x39   : > { %5411 = vmatprep.subr.bf16.mxu0 %v6428_v1 }
  0x3b   : > { %5352 = vmatpush3.bf16.msra.mxu1 %v6196_v31  ;;  %v6261_v31 = vld [vmem:[%s8970_s3 + $0xa8] sm:$0xff]  }
  0x3c   : > { %5412 = vmatpush3.bf16.msra.mxu0 %v6197_v32  ;;  %5353 = vmatprep.subr.bf16.mxu1 %v6428_v1  ;;  %v6264_v32 = vld [vmem:[%s8972_s5 + $0x64] ss:$8 sps:$4 sm:$0xff]  }
  0x3d   : > { %5413 = vmatprep.subr.bf16.mxu0 %v6428_v1 }
  0x3f   : > { %5354 = vmatpush3.bf16.msra.mxu1 %v6198_v33  ;;  %v6262_v33 = vld [vmem:[%s8972_s5 + $0x60] ss:$8 sps:$4 sm:$0xff]  }
  0x40   : > { %5414 = vmatpush3.bf16.msra.mxu0 %v6199_v34  ;;  %5355 = vmatprep.subr.bf16.mxu1 %v6428_v1  ;;  %v6265_v34 = vld [vmem:[%s8970_s3 + $0xb0] sm:$0xff]  }
  0x41   : > { %5415 = vmatprep.subr.bf16.mxu0 %v6428_v1 }
  0x43   : > { %5356 = vmatpush3.bf16.msra.mxu1 %v6200_v35  ;;  %v6268_v35 = vld [vmem:[%s8972_s5 + $0x74] ss:$8 sps:$4 sm:$0xff]  }
  0x44   : > { %5416 = vmatpush3.bf16.msra.mxu0 %v6201_v36  ;;  %5357 = vmatprep.subr.bf16.mxu1 %v6428_v1  ;;  %v6269_v36 = vld [vmem:[%s8970_s3 + $0xb8] sm:$0xff]  }
  0x45   : > { %5417 = vmatprep.subr.bf16.mxu0 %v6428_v1 }
  0x47   : > { %5358 = vmatpush3.bf16.msra.mxu1 %v6202_v37  ;;  %v890_v37 = vld [vmem:[#allocation3 + $0x4] sm:$0xff] }
  0x48   : > { %5418 = vmatpush3.bf16.msra.mxu0 %v6203_v38  ;;  %5359 = vmatprep.subr.bf16.mxu1 %v6428_v1  ;;  %v891_v38 = vld [vmem:[#allocation3 + $0xc] sm:$0xff] }
  0x49   : > { %5419 = vmatprep.subr.bf16.mxu0 %v6428_v1  ;;  %v6839_v43 = vpack.c.bf16 %v891_v38, %v890_v37  ;;  %v6356_v37 = vld [vmem:[%s8972_s5 + $0x2c4] ss:$8 sps:$4 sm:$0xff]  }
  0x4a   : > { %v7020_v38 = vld [vmem:[%s8978_s11 + $0x8] sm:$0xff] }
  0x4b   : > { %5360 = vmatpush3.bf16.msra.mxu1 %v6204_v39  ;;  %v6266_v39 = vld [vmem:[%s8972_s5 + $0x70] ss:$8 sps:$4 sm:$0xff]  }
  0x4c   : > { %5420 = vmatpush3.bf16.msra.mxu0 %v6205_v41  ;;  %5385 = vmatprep.subr.bf16.mxu1 %v6428_v1  ;;  %v1130_v41 = vld [vmem:[#allocation3] sm:$0xff] }
  0x4d   : > { %1249 = vmatprep.subr.bf16.mxu0 %v6208_v45  ;;  %v1132_v44 = vpack.c.bf16 %v1131_v42, %v1130_v41  ;;  %v6270_v45 = vld [vmem:[%s8972_s5 + $0x100] ss:$8 sps:$4 sm:$0xff]   ;;  %v9017_v41 = vand.u32 4294901760, %v7020_v38 }
  0x4e   : > { %5362 = vmatmul.mubr.bf16.vlgmr.msra.gmra.mrb[4].mxu1 %v451_v46  ;;  %v6275_v46 = vld [vmem:[%s8972_s5 + $0x114] ss:$8 sps:$4 sm:$0xff]  }
  0x4f   : > { %5422 = vmatmul.mubr.bf16.vlgmr.msra.gmra.mrb[4].mxu0 %v889_v47  ;;  %5386 = vmatpush3.bf16.msra.mxu1 %v6209_v48  ;;  %v6278_v47 = vld [vmem:[%s8972_s5 + $0x124] ss:$8 sps:$4 sm:$0xff]   ;;  %v6276_v48 = vld [vmem:[%s8972_s5 + $0x120] ss:$8 sps:$4 sm:$0xff]  }
  0x50   : > { %1250 = vmatpush1.bf16.msra.mxu0 %v6206_v49  ;;  %5387 = vmatprep.subr.bf16.mxu1 %v6428_v1  ;;  %v6281_v49 = vld [vmem:[%s8972_s5 + $0x134] ss:$8 sps:$4 sm:$0xff]  }
  0x51   : > { %1251 = vmatprep.subr.bf16.mxu0 %v6212_v50  ;;  %5401 = vmatprep.mubr.msk.bf16.mxu1 %vm6429_vm0, %v6428_v1  ;;  %v6279_v50 = vld [vmem:[%s8972_s5 + $0x130] ss:$8 sps:$4 sm:$0xff]  }
  0x52   : > { %1281 = vmatprep.mubr.bf16.mxu0 %v8988_v54 }
  0x53   : > { %5388 = vmatpush3.bf16.msra.mxu1 %v6213_v51  ;;  %v6284_v51 = vld [vmem:[%s8972_s5 + $0x144] ss:$8 sps:$4 sm:$0xff]  }
  0x54   : > { %1252 = vmatpush1.bf16.msra.mxu0 %v6210_v52  ;;  %5389 = vmatprep.subr.bf16.mxu1 %v6428_v1  ;;  %v6282_v52 = vld [vmem:[%s8972_s5 + $0x140] ss:$8 sps:$4 sm:$0xff]  }
  0x55   : > { %1253 = vmatprep.subr.bf16.mxu0 %v6216_v53  ;;  %v6287_v53 = vld [vmem:[%s8972_s5 + $0x154] ss:$8 sps:$4 sm:$0xff]  }
  0x57   : > { %5390 = vmatpush3.bf16.msra.mxu1 %v6217_v55  ;;  %v6285_v55 = vld [vmem:[%s8972_s5 + $0x150] ss:$8 sps:$4 sm:$0xff]  }
  0x58   : > { %1254 = vmatpush1.bf16.msra.mxu0 %v6214_v56  ;;  %5391 = vmatprep.subr.bf16.mxu1 %v6428_v1  ;;  %v6290_v56 = vld [vmem:[%s8972_s5 + $0x164] ss:$8 sps:$4 sm:$0xff]  }
  0x59   : > { %1255 = vmatprep.subr.bf16.mxu0 %v6220_v57  ;;  %v6288_v57 = vld [vmem:[%s8972_s5 + $0x160] ss:$8 sps:$4 sm:$0xff]  }
  0x5b   : > { %5392 = vmatpush3.bf16.msra.mxu1 %v6221_v58  ;;  %v6293_v58 = vld [vmem:[%s8972_s5 + $0x174] ss:$8 sps:$4 sm:$0xff]  }
  0x5c   : > { %1256 = vmatpush1.bf16.msra.mxu0 %v6218_v59  ;;  %5393 = vmatprep.subr.bf16.mxu1 %v6428_v1  ;;  %v6291_v59 = vld [vmem:[%s8972_s5 + $0x170] ss:$8 sps:$4 sm:$0xff]  }
  0x5d   : > { %1257 = vmatprep.subr.bf16.mxu0 %v6224_v60  ;;  %v6296_v60 = vld [vmem:[%s8972_s5 + $0x184] ss:$8 sps:$4 sm:$0xff]  }
  0x5f   : > { %5394 = vmatpush3.bf16.msra.mxu1 %v6225_v61  ;;  %v6294_v61 = vld [vmem:[%s8972_s5 + $0x180] ss:$8 sps:$4 sm:$0xff]  }
  0x60   : > { %1258 = vmatpush1.bf16.msra.mxu0 %v6222_v62  ;;  %5395 = vmatprep.subr.bf16.mxu1 %v6428_v1  ;;  %v6299_v62 = vld [vmem:[%s8972_s5 + $0x194] ss:$8 sps:$4 sm:$0xff]  }
  0x61   : > { %1259 = vmatprep.subr.bf16.mxu0 %v6228_v63  ;;  %v6297_v63 = vld [vmem:[%s8972_s5 + $0x190] ss:$8 sps:$4 sm:$0xff]  }
  0x63   : > { %5396 = vmatpush3.bf16.msra.mxu1 %v6229_v0  ;;  %v6302_v0 = vld [vmem:[%s8972_s5 + $0x1a4] ss:$8 sps:$4 sm:$0xff]  }
  0x64   : > { %1260 = vmatpush1.bf16.msra.mxu0 %v6226_v2  ;;  %5397 = vmatprep.subr.bf16.mxu1 %v6428_v1  ;;  %v6300_v2 = vld [vmem:[%s8972_s5 + $0x1a0] ss:$8 sps:$4 sm:$0xff]  }
  0x65   : > { %1261 = vmatprep.subr.bf16.mxu0 %v6232_v3  ;;  %v6303_v3 = vld [vmem:[%s8972_s5 + $0x1b0] ss:$8 sps:$4 sm:$0xff]  }
  0x67   : > { %5398 = vmatpush3.bf16.msra.mxu1 %v6233_v4  ;;  %v6308_v4 = vld [vmem:[%s8972_s5 + $0x1c4] ss:$8 sps:$4 sm:$0xff]  }
  0x68   : > { %1262 = vmatpush1.bf16.msra.mxu0 %v6230_v5  ;;  %5399 = vmatprep.subr.bf16.mxu1 %v6428_v1  ;;  %v6306_v5 = vld [vmem:[%s8972_s5 + $0x1c0] ss:$8 sps:$4 sm:$0xff]  }
  0x69   : > { %1263 = vmatprep.subr.bf16.mxu0 %v6236_v6  ;;  %v6311_v6 = vld [vmem:[%s8972_s5 + $0x1d4] ss:$8 sps:$4 sm:$0xff]  }
  0x6b   : > { %5400 = vmatpush3.bf16.msra.mxu1 %v6237_v8  ;;  %v6314_v8 = vld [vmem:[%s8972_s5 + $0x1e4] ss:$8 sps:$4 sm:$0xff]  }
  0x6c   : > { %1264 = vmatpush1.bf16.msra.mxu0 %v6234_v7  ;;  %5425 = vmatprep.subr.bf16.mxu1 %v6428_v1  ;;  %v6309_v7 = vld [vmem:[%s8972_s5 + $0x1d0] ss:$8 sps:$4 sm:$0xff]  }
  0x6d   : > { %1372 = vmatprep.subr.bf16.mxu0 %v6240_v11  ;;  %v6315_v11 = vld [vmem:[%s8972_s5 + $0x1f0] ss:$8 sps:$4 sm:$0xff]  }
  0x6e   : > { %5402 = vmatmul.mubr.bf16.vlgmr.msra.gmra.mrb[8].mxu1 %v6753_v12 }
  0x6f   : > { %5426 = vmatpush3.bf16.msra.mxu1 %v6241_v15  ;;  %1282 = vmatmul.mubr.bf16.vlgmr.msra.gmra.mrb[8].mxu0 %v1151_v16  ;;  %v6320_v15 = vld [vmem:[%s8972_s5 + $0x204] ss:$8 sps:$4 sm:$0xff]   ;;  %v6318_v16 = vld [vmem:[%s8972_s5 + $0x200] ss:$8 sps:$4 sm:$0xff]  }
  0x70   : > { %1373 = vmatpush1.bf16.msra.mxu0 %v6238_v17  ;;  %5427 = vmatprep.subr.bf16.mxu1 %v6428_v1  ;;  %v6323_v17 = vld [vmem:[%s8972_s5 + $0x214] ss:$8 sps:$4 sm:$0xff]  }
  0x71   : > { %1374 = vmatprep.subr.bf16.mxu0 %v6244_v18  ;;  %5441 = vmatprep.mubr.msk.bf16.mxu1 %vm6429_vm0, %v6428_v1  ;;  %v6321_v18 = vld [vmem:[%s8972_s5 + $0x210] ss:$8 sps:$4 sm:$0xff]  }
  0x72   : > { %1404 = vmatprep.mubr.bf16.mxu0 %v8988_v54 }
  0x73   : > { %5428 = vmatpush3.bf16.msra.mxu1 %v6245_v13  ;;  %v6326_v13 = vld [vmem:[%s8972_s5 + $0x224] ss:$8 sps:$4 sm:$0xff]  }
  0x74   : > { %1375 = vmatpush1.bf16.msra.mxu0 %v6242_v14  ;;  %5429 = vmatprep.subr.bf16.mxu1 %v6428_v1  ;;  %v6324_v14 = vld [vmem:[%s8972_s5 + $0x220] ss:$8 sps:$4 sm:$0xff]  }
  0x75   : > { %1376 = vmatprep.subr.bf16.mxu0 %v6248_v19  ;;  %v6327_v19 = vld [vmem:[%s8972_s5 + $0x230] ss:$8 sps:$4 sm:$0xff]  }
  0x77   : > { %5430 = vmatpush3.bf16.msra.mxu1 %v6249_v20  ;;  %v6332_v20 = vld [vmem:[%s8972_s5 + $0x244] ss:$8 sps:$4 sm:$0xff]  }
  0x78   : > { %1377 = vmatpush1.bf16.msra.mxu0 %v6246_v21  ;;  %5431 = vmatprep.subr.bf16.mxu1 %v6428_v1  ;;  %v6330_v21 = vld [vmem:[%s8972_s5 + $0x240] ss:$8 sps:$4 sm:$0xff]  }
  0x79   : > { %1378 = vmatprep.subr.bf16.mxu0 %v6252_v22  ;;  %v6335_v22 = vld [vmem:[%s8972_s5 + $0x254] ss:$8 sps:$4 sm:$0xff]  }
  0x7b   : > { %5432 = vmatpush3.bf16.msra.mxu1 %v6253_v24  ;;  %v6333_v24 = vld [vmem:[%s8972_s5 + $0x250] ss:$8 sps:$4 sm:$0xff]  }
  0x7c   : > { %1379 = vmatpush1.bf16.msra.mxu0 %v6250_v25  ;;  %5433 = vmatprep.subr.bf16.mxu1 %v6428_v1  ;;  %v6338_v25 = vld [vmem:[%s8972_s5 + $0x264] ss:$8 sps:$4 sm:$0xff]  }
  0x7d   : > { %1380 = vmatprep.subr.bf16.mxu0 %v6256_v26  ;;  %v6336_v26 = vld [vmem:[%s8972_s5 + $0x260] ss:$8 sps:$4 sm:$0xff]  }
  0x7f   : > { %5434 = vmatpush3.bf16.msra.mxu1 %v6257_v27  ;;  %v6341_v27 = vld [vmem:[%s8972_s5 + $0x274] ss:$8 sps:$4 sm:$0xff]  }
  0x80   : > { %1381 = vmatpush1.bf16.msra.mxu0 %v6254_v28  ;;  %5435 = vmatprep.subr.bf16.mxu1 %v6428_v1  ;;  %v6339_v28 = vld [vmem:[%s8972_s5 + $0x270] ss:$8 sps:$4 sm:$0xff]  }
  0x81   : > { %1382 = vmatprep.subr.bf16.mxu0 %v6260_v29  ;;  %v6344_v29 = vld [vmem:[%s8972_s5 + $0x284] ss:$8 sps:$4 sm:$0xff]  }
  0x83   : > { %5436 = vmatpush3.bf16.msra.mxu1 %v6261_v31  ;;  %v6347_v31 = vld [vmem:[%s8972_s5 + $0x294] ss:$8 sps:$4 sm:$0xff]  }
  0x84   : > { %1383 = vmatpush1.bf16.msra.mxu0 %v6258_v30  ;;  %5437 = vmatprep.subr.bf16.mxu1 %v6428_v1  ;;  %v6342_v30 = vld [vmem:[%s8972_s5 + $0x280] ss:$8 sps:$4 sm:$0xff]  }
  0x85   : > { %1384 = vmatprep.subr.bf16.mxu0 %v6264_v32  ;;  %v6345_v32 = vld [vmem:[%s8972_s5 + $0x290] ss:$8 sps:$4 sm:$0xff]  }
  0x87   : > { %5438 = vmatpush3.bf16.msra.mxu1 %v6265_v34  ;;  %v6348_v34 = vld [vmem:[%s8972_s5 + $0x2a0] ss:$8 sps:$4 sm:$0xff]  }
  0x88   : > { %1385 = vmatpush1.bf16.msra.mxu0 %v6262_v33  ;;  %5439 = vmatprep.subr.bf16.mxu1 %v6428_v1  ;;  %v6273_v1 = vld [vmem:[%s8972_s5 + $0x110] ss:$8 sps:$4 sm:$0xff]   ;;  %v6350_v33 = vld [vmem:[%s8972_s5 + $0x2a4] ss:$8 sps:$4 sm:$0xff]  }
  0x89   : > { %1386 = vmatprep.subr.bf16.mxu0 %v6268_v35  ;;  %v6353_v35 = vld [vmem:[%s8972_s5 + $0x2b4] ss:$8 sps:$4 sm:$0xff]  }
  0x8b   : > { %5440 = vmatpush3.bf16.msra.mxu1 %v6269_v36  ;;  %v6351_v36 = vld [vmem:[%s8972_s5 + $0x2b0] ss:$8 sps:$4 sm:$0xff]  }
  0x8c   : > { %1387 = vmatpush1.bf16.msra.mxu0 %v6266_v39  ;;  %v7025_v39 = vld [vmem:[%s8978_s11 + $0x18] sm:$0xff] }
  0x8d   : > { %1512 = vmatprep.subr.bf16.mxu0 %v6272_v40  ;;  %v7030_v40 = vld [vmem:[%s8978_s11] sm:$0xff]  ;;  %v9016_v42 = vand.u32 4294901760, %v7025_v39 }
  0x8e   : > { %5442 = vmatmul.mubr.bf16.vlgmr.msra.gmra.mrb[12].mxu1 %v6839_v43 }
  0x8f   : > { %1405 = vmatmul.mubr.bf16.vlgmr.msra.gmra.mrb[8].mxu0 %v1132_v44  ;;  %v9011_v44 = vand.u32 4294901760, %v7030_v40 }
  0x90   : > { %1513 = vmatpush1.bf16.msra.mxu0 %v6270_v45  ;;  %1544 = vmatprep.mubr.bf16.mxu0 %v8988_v54  ;;  %v7043_v45 = vld [vmem:[%s8978_s11 + $0x28] sm:$0xff] }
  0x91   : > { %1514 = vmatprep.subr.bf16.mxu0 %v6275_v46  ;;  %v7048_v46 = vld [vmem:[%s8978_s11 + $0x38] sm:$0xff] }
  0x94   : > { %1515 = vmatpush1.bf16.msra.mxu0 %v6273_v1 }
  0x95   : > { %1516 = vmatprep.subr.bf16.mxu0 %v6278_v47  ;;  %v9009_v47 = vand.u32 4294901760, %v7043_v45 }
  0x98   : > { %1517 = vmatpush1.bf16.msra.mxu0 %v6276_v48  ;;  %v9000_v48 = vand.u32 4294901760, %v7048_v46 }
  0x99   : > { %1518 = vmatprep.subr.bf16.mxu0 %v6281_v49  ;;  %v7056_v49 = vld [vmem:[%s8978_s11 + $0x20] sm:$0xff] }
  0x9c   : > { %1519 = vmatpush1.bf16.msra.mxu0 %v6279_v50  ;;  %v7061_v50 = vld [vmem:[%s8978_s11 + $0x30] sm:$0xff] }
  0x9d   : > { %1520 = vmatprep.subr.bf16.mxu0 %v6284_v51  ;;  %v7066_v51 = vld [vmem:[%s8978_s11 + $0x48] sm:$0xff] }
  0xa0   : > { %1521 = vmatpush1.bf16.msra.mxu0 %v6282_v52  ;;  %v7072_v52 = vpack.c.bf16 %v9016_v42, %v9017_v41 }
  0xa1   : > { %1522 = vmatprep.subr.bf16.mxu0 %v6287_v53  ;;  %v8999_v53 = vand.u32 4294901760, %v7056_v49 }
  0xa2   : > { %9278 = vst [vmem:[#allocation4_spill] sm:$0xff] %v7072_v52  ;;  %5446 = vmatprep.subr.bf16.mxu1 %v7072_v52 }
  0xa4   : > { %1523 = vmatpush1.bf16.msra.mxu0 %v6285_v55  ;;  %v8998_v55 = vand.u32 4294901760, %v7061_v50 }
  0xa5   : > { %1524 = vmatprep.subr.bf16.mxu0 %v6290_v56  ;;  %v7079_v56 = vld [vmem:[%s8978_s11 + $0x58] sm:$0xff] }
  0xa8   : > { %1525 = vmatpush1.bf16.msra.mxu0 %v6288_v57  ;;  %v8997_v57 = vand.u32 4294901760, %v7066_v51 }
  0xa9   : > { %1526 = vmatprep.subr.bf16.mxu0 %v6293_v58  ;;  %v7085_v58 = vld [vmem:[%s8978_s11 + $0x40] sm:$0xff] }
  0xac   : > { %1527 = vmatpush1.bf16.msra.mxu0 %v6291_v59  ;;  %v7090_v59 = vld [vmem:[%s8978_s11 + $0x50] sm:$0xff] }
  0xad   : > { %1656 = vmatprep.subr.bf16.mxu0 %v6296_v60 }
  0xaf   : > { %1545 = vmatmul.mubr.bf16.vlgmr.msra.gmra.mrb[8].mxu0 %v6594_v23  ;;  %v6305_v23 = vld [vmem:[%s8972_s5 + $0x1b4] ss:$8 sps:$4 sm:$0xff]  }
  0xb0   : > { %1657 = vmatpush1.bf16.msra.mxu0 %v6294_v61  ;;  %1688 = vmatprep.mubr.bf16.mxu0 %v8988_v54  ;;  %v7102_v61 = vpack.c.bf16 %v9000_v48, %v9009_v47 }
  0xb1   : > { %1658 = vmatprep.subr.bf16.mxu0 %v6299_v62  ;;  %v8996_v62 = vand.u32 4294901760, %v7079_v56 }
  0xb2   : > { %9280 = vst [vmem:[#allocation6_spill] sm:$0xff] %v7102_v61 }
  0xb4   : > { %1659 = vmatpush1.bf16.msra.mxu0 %v6297_v63  ;;  %v7108_v63 = vld [vmem:[%s8978_s11 + $0x68] sm:$0xff] }
  0xb5   : > { %1660 = vmatprep.subr.bf16.mxu0 %v6302_v0  ;;  %v7113_v0 = vld [vmem:[%s8978_s11 + $0x78] sm:$0xff] }
  0xb8   : > { %1661 = vmatpush1.bf16.msra.mxu0 %v6300_v2  ;;  %v6354_v2 = vld [vmem:[%s8972_s5 + $0x2c0] ss:$8 sps:$4 sm:$0xff]  }
  0xb9   : > { %1662 = vmatprep.subr.bf16.mxu0 %v6305_v23  ;;  %v6359_v23 = vld [vmem:[%s8972_s5 + $0x2d4] ss:$8 sps:$4 sm:$0xff]  }
  0xbc   : > { %1663 = vmatpush1.bf16.msra.mxu0 %v6303_v3  ;;  %v7127_v3 = vpack.c.bf16 %v8998_v55, %v8999_v53 }
  0xbd   : > { %1664 = vmatprep.subr.bf16.mxu0 %v6308_v4  ;;  %v8995_v4 = vand.u32 4294901760, %v7085_v58 }
  0xbe   : > { %9281 = vst [vmem:[#allocation7_spill] sm:$0xff] %v7127_v3 }
  0xc0   : > { %1665 = vmatpush1.bf16.msra.mxu0 %v6306_v5  ;;  %v8994_v5 = vand.u32 4294901760, %v7090_v59 }
  0xc1   : > { %1666 = vmatprep.subr.bf16.mxu0 %v6311_v6  ;;  %v7136_v6 = vpack.c.bf16 %v8996_v62, %v8997_v57 }
  0xc3   : > { %9282 = vst [vmem:[#allocation8_spill] sm:$0xff] %v7136_v6 }
  0xc4   : > { %1667 = vmatpush1.bf16.msra.mxu0 %v6309_v7  ;;  %v8985_v7 = vand.u32 4294901760, %v7108_v63 }
  0xc5   : > { %1668 = vmatprep.subr.bf16.mxu0 %v6314_v8  ;;  %v8984_v8 = vand.u32 4294901760, %v7113_v0 }
  0xc8   : > { %1669 = vmatpush1.bf16.msra.mxu0 %v6312_v9  ;;  %v7143_v9 = vld [vmem:[%s8978_s11 + $0x60] sm:$0xff] }
  0xc9   : > { %1670 = vmatprep.subr.bf16.mxu0 %v6317_v10  ;;  %v7148_v10 = vld [vmem:[%s8978_s11 + $0x70] sm:$0xff] }
  0xcc   : > { %1671 = vmatpush1.bf16.msra.mxu0 %v6315_v11  ;;  %v7153_v11 = vld [vmem:[%s8978_s11 + $0x88] sm:$0xff] }
  0xcd   : > { %1800 = vmatprep.subr.bf16.mxu0 %v6320_v15  ;;  %v7158_v15 = vld [vmem:[%s8978_s11 + $0x98] sm:$0xff] }
  0xcf   : > { %1689 = vmatmul.mubr.bf16.vlgmr.msra.gmra.mrb[8].mxu0 %v6753_v12  ;;  %v6329_v12 = vld [vmem:[%s8972_s5 + $0x234] ss:$8 sps:$4 sm:$0xff]  }
  0xd0   : > { %1801 = vmatpush1.bf16.msra.mxu0 %v6318_v16  ;;  %1832 = vmatprep.mubr.bf16.mxu0 %v8988_v54  ;;  %v6357_v16 = vld [vmem:[%s8972_s5 + $0x2d0] ss:$8 sps:$4 sm:$0xff]  }
  0xd1   : > { %1802 = vmatprep.subr.bf16.mxu0 %v6323_v17  ;;  %v6362_v17 = vld [vmem:[%s8972_s5 + $0x2e4] ss:$8 sps:$4 sm:$0xff]  }
  0xd4   : > { %1803 = vmatpush1.bf16.msra.mxu0 %v6321_v18 }
  0xd5   : > { %1804 = vmatprep.subr.bf16.mxu0 %v6326_v13  ;;  %v7173_v13 = vpack.c.bf16 %v8994_v5, %v8995_v4 }
  0xd7   : > { %9283 = vst [vmem:[#allocation9_spill] sm:$0xff] %v7173_v13 }
  0xd8   : > { %1805 = vmatpush1.bf16.msra.mxu0 %v6324_v14  ;;  %v8983_v14 = vand.u32 4294901760, %v7143_v9 }
  0xd9   : > { %1806 = vmatprep.subr.bf16.mxu0 %v6329_v12  ;;  %v8982_v12 = vand.u32 4294901760, %v7148_v10 }
  0xdc   : > { %1807 = vmatpush1.bf16.msra.mxu0 %v6327_v19 }
  0xdd   : > { %1808 = vmatprep.subr.bf16.mxu0 %v6332_v20 }
  0xe0   : > { %1809 = vmatpush1.bf16.msra.mxu0 %v6330_v21  ;;  %v7184_v21 = vpack.c.bf16 %v8984_v8, %v8985_v7  ;;  %v6366_v7 = vld [vmem:[%s8972_s5 + $0x300] ss:$8 sps:$4 sm:$0xff]  }
  0xe1   : > { %1810 = vmatprep.subr.bf16.mxu0 %v6335_v22  ;;  %v8981_v22 = vand.u32 4294901760, %v7153_v11 }
  0xe2   : > { %9284 = vst [vmem:[#allocation10_spill] sm:$0xff] %v7184_v21 }
  0xe4   : > { %1811 = vmatpush1.bf16.msra.mxu0 %v6333_v24  ;;  %v8980_v24 = vand.u32 4294901760, %v7158_v15 }
  0xe5   : > { %1812 = vmatprep.subr.bf16.mxu0 %v6338_v25  ;;  %v7191_v25 = vld [vmem:[%s8978_s11 + $0x80] sm:$0xff] }
  0xe8   : > { %1813 = vmatpush1.bf16.msra.mxu0 %v6336_v26  ;;  %v7196_v26 = vld [vmem:[%s8978_s11 + $0x90] sm:$0xff] }
  0xe9   : > { %1814 = vmatprep.subr.bf16.mxu0 %v6341_v27 }
  0xec   : > { %1815 = vmatpush1.bf16.msra.mxu0 %v6339_v28 }
  0xed   : > { %1947 = vmatprep.subr.bf16.mxu0 %v6344_v29  ;;  %v7203_v29 = vld [vmem:[%s8978_s11 + $0xa8] sm:$0xff] }
  0xef   : > { %1833 = vmatmul.mubr.bf16.vlgmr.msra.gmra.mrb[8].mxu0 %v6839_v43  ;;  %v7037_v43 = vld [vmem:[%s8978_s11 + $0x10] sm:$0xff] }
  0xf0   : > { %1948 = vmatpush1.bf16.msra.mxu0 %v6342_v30  ;;  %1979 = vmatprep.mubr.bf16.mxu0 %v8988_v54  ;;  %v9010_v1 = vand.u32 4294901760, %v7037_v43  ;;  %v7208_v30 = vld [vmem:[%s8978_s11 + $0xb8] sm:$0xff] }
  0xf1   : > { %1949 = vmatprep.subr.bf16.mxu0 %v6347_v31 }
  0xf2   : > { %v7096_v60 = vpack.c.bf16 %v9010_v1, %v9011_v44  ;;  %v7446_v1 = vld [vmem:[%s8978_s11 + $0x128] sm:$0xff]  ;;  %v7451_v44 = vld [vmem:[%s8978_s11 + $0x138] sm:$0xff] }
  0xf4   : > { %1950 = vmatpush1.bf16.msra.mxu0 %v6345_v32  ;;  %9279 = vst [vmem:[#allocation5_spill] sm:$0xff] %v7096_v60  ;;  %5448 = vmatpush1.bf16.msra.mxu1 %v7096_v60  ;;  %v6360_v32 = vld [vmem:[%s8972_s5 + $0x2e0] ss:$8 sps:$4 sm:$0xff]  }
  0xf5   : > { %1951 = vmatprep.subr.bf16.mxu0 %v6350_v33  ;;  %5450 = vmatprep.subr.bf16.mxu1 %v7102_v61 }
  0xf8   : > { %1952 = vmatpush1.bf16.msra.mxu0 %v6348_v34  ;;  %5452 = vmatpush1.bf16.msra.mxu1 %v7127_v3  ;;  %v7609_v3 = vld [vmem:[%s8978_s11 + $0x1b0] sm:$0xff] }
  0xf9   : > { %1953 = vmatprep.subr.bf16.mxu0 %v6353_v35  ;;  %5454 = vmatprep.subr.bf16.mxu1 %v7136_v6  ;;  %v6365_v35 = vld [vmem:[%s8972_s5 + $0x2f4] ss:$8 sps:$4 sm:$0xff]   ;;  %9310 = vst [vmem:[#allocation34_spill] sm:$0xff] %v7609_v3  ;;  %v9316_v6 = vand.u32 4294901760, %v7025_v39 }
  0xfc   : > { %1954 = vmatpush1.bf16.msra.mxu0 %v6351_v36  ;;  %5456 = vmatpush1.bf16.msra.mxu1 %v7173_v13  ;;  %v7223_v36 = vpack.c.bf16 %v8982_v12, %v8983_v14 }
  0xfd   : > { %1955 = vmatprep.subr.bf16.mxu0 %v6356_v37  ;;  %v8987_v37 = vand.u32 4294901760, %v7191_v25  ;;  %5458 = vmatprep.subr.bf16.mxu1 %v7184_v21  ;;  %v7596_v21 = vld [vmem:[%s8978_s11 + $0x1a0] sm:$0xff] }
  0xfe   : > { %9285 = vst [vmem:[#allocation11_spill] sm:$0xff] %v7223_v36 }
 0x100   : > { %1956 = vmatpush1.bf16.msra.mxu0 %v6354_v2  ;;  %v8986_v2 = vand.u32 4294901760, %v7196_v26  ;;  %5460 = vmatpush1.bf16.msra.mxu1 %v7223_v36 }
 0x101   : > { %1957 = vmatprep.subr.bf16.mxu0 %v6359_v23  ;;  %v7166_v18 = vpop.f32.mrb[0].mxu1  ;;  %v7232_v23 = vpack.c.bf16 %v8980_v24, %v8981_v22  ;;  %v1848_v24 = vld [vmem:[#allocation3 + $0xd] sm:$0xff] }
 0x102   : > { %v7177_v19 = vpop.f32.mrb[0].mxu0  ;;  %v5343_v20 = vpop.f32.mrb[1].mxu1  ;;  %v6368_v22 = vld [vmem:[%s8972_s5 + $0x304] ss:$8 sps:$4 sm:$0xff]   ;;  %v7257_v12 = vpack.c.bf16 %v8986_v2, %v8987_v37  ;;  %v6371_v2 = vld [vmem:[%s8972_s5 + $0x314] ss:$8 sps:$4 sm:$0xff]  }
 0x103   : > { %v5383_v27 = vpop.f32.mrb[1].mxu0  ;;  %v7198_v28 = vpop.f32.mrb[2].mxu1  ;;  %9286 = vst [vmem:[#allocation12_spill] sm:$0xff] %v7232_v23  ;;  %v7239_v20 = vld [vmem:[%s8978_s11 + $0xa0] sm:$0xff]  ;;  %5462 = vmatprep.subr.bf16.mxu1 %v7232_v23  ;;  %v7565_v23 = vld [vmem:[%s8978_s11 + $0x198] sm:$0xff] }
 0x104   : > { %v7210_v31 = vpop.f32.mrb[2].mxu0  ;;  %1958 = vmatpush1.bf16.msra.mxu0 %v6357_v16  ;;  %v5344_v33 = vpop.f32.mrb[3].mxu1  ;;  %v8993_v16 = vand.u32 4294901760, %v7203_v29  ;;  %v7244_v27 = vld [vmem:[%s8978_s11 + $0xb0] sm:$0xff]  ;;  %9287 = vst [vmem:[#allocation13_spill] sm:$0xff] %v7257_v12  ;;  %5464 = vmatpush1.bf16.msra.mxu1 %v7257_v12  ;;  %9305 = vst [vmem:[#allocation31_spill] sm:$0xff] %v7565_v23 }
 0x105   : > { %v5384_v34 = vpop.f32.mrb[3].mxu0  ;;  %1959 = vmatprep.subr.bf16.mxu0 %v6362_v17  ;;  %v8992_v17 = vand.u32 4294901760, %v7208_v30  ;;  %v6363_v33 = vld [vmem:[%s8972_s5 + $0x2f0] ss:$8 sps:$4 sm:$0xff]   ;;  %v8990_v14 = vand.u32 4294901760, %v7244_v27  ;;  %v9308_v36 = vand.u32 4294901760, %v7565_v23  ;;  %v7627_v23 = vsub.f32 %v7025_v39, %v9316_v6 }
 0x106   : > { %v1847_v34 = vld [vmem:[#allocation3 + $0x5] sm:$0xff]  ;;  %v9325_v39 = vand.u32 4294901760, %v7596_v21  ;;  %v9326_v6 = vand.u32 4294901760, %v7609_v3 }
 0x107   : > { %v1849_v8 = vpack.c.bf16 %v1848_v24, %v1847_v34  ;;  %v6374_v24 = vld [vmem:[%s8972_s5 + $0x324] ss:$8 sps:$4 sm:$0xff]   ;;  %v6378_v34 = vld [vmem:[%s8972_s5 + $0x340] ss:$8 sps:$4 sm:$0xff]   ;;  %9317 = vst [vmem:[#allocation37_spill] sm:$0xff] %v7627_v23 }
 0x108   : > { %1960 = vmatpush1.bf16.msra.mxu0 %v6360_v32  ;;  %v8991_v32 = vand.u32 4294901760, %v7239_v20 }
 0x109   : > { %1961 = vmatprep.subr.bf16.mxu0 %v6365_v35  ;;  %v7266_v35 = vpack.c.bf16 %v8992_v17, %v8993_v16 }
 0x10a   : > { %v7279_v37 = vpack.c.bf16 %v8990_v14, %v8991_v32 }
 0x10b   : > { %9288 = vst [vmem:[#allocation14_spill] sm:$0xff] %v7266_v35  ;;  %5466 = vmatprep.subr.bf16.mxu1 %v7266_v35 }
 0x10c   : > { %1962 = vmatpush1.bf16.msra.mxu0 %v6363_v33  ;;  %9289 = vst [vmem:[#allocation15_spill] sm:$0xff] %v7279_v37  ;;  %5468 = vmatpush1.bf16.msra.mxu1 %v7279_v37  ;;  %v6372_v33 = vld [vmem:[%s8972_s5 + $0x320] ss:$8 sps:$4 sm:$0xff]  }
 0x10d   : > { %2094 = vmatprep.subr.bf16.mxu0 %v6368_v22  ;;  %v6369_v22 = vld [vmem:[%s8972_s5 + $0x310] ss:$8 sps:$4 sm:$0xff]  }
 0x10f   : > { %1980 = vmatmul.mubr.bf16.vlgmr.msra.gmra.mrb[8].mxu0 %v1849_v8  ;;  %v6375_v8 = vld [vmem:[%s8972_s5 + $0x330] ss:$8 sps:$4 sm:$0xff]  }
 0x110   : > { %2095 = vmatpush1.bf16.msra.mxu0 %v6366_v7  ;;  %2126 = vmatprep.mubr.bf16.mxu0 %v8988_v54  ;;  %v6377_v7 = vld [vmem:[%s8972_s5 + $0x334] ss:$8 sps:$4 sm:$0xff]  }
 0x111   : > { %2096 = vmatprep.subr.bf16.mxu0 %v6371_v2  ;;  %v6380_v2 = vld [vmem:[%s8972_s5 + $0x344] ss:$8 sps:$4 sm:$0xff]  }
 0x114   : > { %2097 = vmatpush1.bf16.msra.mxu0 %v6369_v22  ;;  %v6383_v22 = vld [vmem:[%s8972_s5 + $0x354] ss:$8 sps:$4 sm:$0xff]  }
 0x115   : > { %2098 = vmatprep.subr.bf16.mxu0 %v6374_v24  ;;  %v6381_v24 = vld [vmem:[%s8972_s5 + $0x350] ss:$8 sps:$4 sm:$0xff]  }
 0x118   : > { %2099 = vmatpush1.bf16.msra.mxu0 %v6372_v33 }
 0x119   : > { %2100 = vmatprep.subr.bf16.mxu0 %v6377_v7  ;;  %v6386_v7 = vld [vmem:[%s8972_s5 + $0x364] ss:$8 sps:$4 sm:$0xff]  }
 0x11c   : > { %2101 = vmatpush1.bf16.msra.mxu0 %v6375_v8 }
 0x11d   : > { %2102 = vmatprep.subr.bf16.mxu0 %v6380_v2 }
 0x120   : > { %2103 = vmatpush1.bf16.msra.mxu0 %v6378_v34  ;;  %v6384_v34 = vld [vmem:[%s8972_s5 + $0x360] ss:$8 sps:$4 sm:$0xff]  }
 0x121   : > { %v658_v33 = vpop.f32.mrb[4].mxu1  ;;  %2104 = vmatprep.subr.bf16.mxu0 %v6383_v22 }
 0x122   : > { %v659_v8 = vadd.f32 %v658_v33, %v7166_v18  ;;  %v992_v54 = vpop.f32.mrb[4].mxu0  ;;  %v5363_v14 = vpop.f32.mrb[5].mxu1  ;;  %v6389_v18 = vld [vmem:[%s8972_s5 + $0x374] ss:$8 sps:$4 sm:$0xff]  }
 0x123   : > { %v5423_v2 = vpop.f32.mrb[5].mxu0  ;;  %v661_v32 = vpop.f32.mrb[6].mxu1 }
 0x124   : > { %v662_v17 = vadd.f32 %v661_v32, %v7198_v28  ;;  %v995_v16 = vpop.f32.mrb[6].mxu0  ;;  %2105 = vmatpush1.bf16.msra.mxu0 %v6381_v24  ;;  %v5364_v5 = vpop.f32.mrb[7].mxu1  ;;  %v777_v22 = vadd.f32 %v7177_v19, %v659_v8  ;;  %v6387_v28 = vld [vmem:[%s8972_s5 + $0x370] ss:$8 sps:$4 sm:$0xff]   ;;  %v1994_v32 = vld [vmem:[#allocation3 + $0x6] sm:$0xff]  ;;  %v1995_v24 = vld [vmem:[#allocation3 + $0xe] sm:$0xff] }
 0x125   : > { %v5424_v4 = vpop.f32.mrb[7].mxu0  ;;  %2106 = vmatprep.subr.bf16.mxu0 %v6386_v7  ;;  %v1996_v33 = vpack.c.bf16 %v1995_v24, %v1994_v32  ;;  %v7370_v32 = vld [vmem:[%s8978_s11 + $0xe8] sm:$0xff]  ;;  %v7375_v24 = vld [vmem:[%s8978_s11 + $0xf8] sm:$0xff] }
 0x126   : > { %v778_v14 = vadd.f32 %v7210_v31, %v662_v17 }
 0x128   : > { %2107 = vmatpush1.bf16.msra.mxu0 %v6384_v34 }
 0x129   : > { %2108 = vmatprep.subr.bf16.mxu0 %v6389_v18  ;;  %v7334_v18 = vld [vmem:[%s8978_s11 + $0xc8] sm:$0xff] }
 0x12c   : > { %2109 = vmatpush1.bf16.msra.mxu0 %v6387_v28 }
 0x12f   : > { %2127 = vmatmul.mubr.bf16.vlgmr.msra.gmra.mrb[8].mxu0 %v1996_v33  ;;  %v9003_v33 = vand.u32 4294901760, %v7370_v32 }
 0x141   : > { %v878_v5 = vpop.f32.mrb[8].mxu1 }
 0x142   : > { %v885_v4 = vadd.f32 %v878_v5, %v777_v22  ;;  %v5403_v19 = vpop.f32.mrb[9].mxu1  ;;  %v7339_v22 = vld [vmem:[%s8978_s11 + $0xd8] sm:$0xff]  ;;  %v9002_v5 = vand.u32 4294901760, %v7375_v24 }
 0x143   : > { %v881_v7 = vpop.f32.mrb[10].mxu1  ;;  %v7388_v19 = vld [vmem:[%s8978_s11 + $0xf0] sm:$0xff] }
 0x144   : > { %v886_v8 = vadd.f32 %v881_v7, %v778_v14  ;;  %v5404_v2 = vpop.f32.mrb[11].mxu1  ;;  %v999_v62 = vadd.f32 %v992_v54, %v885_v4  ;;  %v9008_v54 = vand.u32 4294901760, %v7334_v18  ;;  %v7383_v4 = vld [vmem:[%s8978_s11 + $0xe0] sm:$0xff] }
 0x145   : > { %v9005_v7 = vand.u32 4294901760, %v7383_v4  ;;  %v7397_v2 = vpack.c.bf16 %v9002_v5, %v9003_v33 }
 0x146   : > { %v1000_v57 = vadd.f32 %v995_v16, %v886_v8  ;;  %v9004_v8 = vand.u32 4294901760, %v7388_v19 }
 0x147   : > { %9294 = vst [vmem:[#allocation20_spill] sm:$0xff] %v7397_v2 }
 0x161   : > { %v1100_v31 = vpop.f32.mrb[12].mxu1 }
 0x162   : > { %v7327_v17 = vadd.f32 %v1100_v31, %v999_v62  ;;  %v5443_v34 = vpop.f32.mrb[13].mxu1  ;;  %v9007_v62 = vand.u32 4294901760, %v7339_v22  ;;  %v7403_v31 = vpack.c.bf16 %v9004_v8, %v9005_v7  ;;  %v7421_v8 = vld [vmem:[%s8978_s11 + $0x100] sm:$0xff]  ;;  %v7426_v7 = vld [vmem:[%s8978_s11 + $0x110] sm:$0xff] }
 0x163   : > { %v1103_v55 = vpop.f32.mrb[14].mxu1  ;;  %v7408_v34 = vld [vmem:[%s8978_s11 + $0x108] sm:$0xff] }
 0x164   : > { %9290 = vst [vmem:[#allocation16_spill] sm:$0xff] %v7327_v17  ;;  %v7329_v53 = vadd.f32 %v1103_v55, %v1000_v57  ;;  %v5444_v48 = vpop.f32.mrb[15].mxu1  ;;  %v7346_v55 = vld [vmem:[%s8978_s11 + $0xc0] sm:$0xff]  ;;  %v7359_v14 = vpack.c.bf16 %v9007_v62, %v9008_v54  ;;  %9295 = vst [vmem:[#allocation21_spill] sm:$0xff] %v7403_v31  ;;  %v9013_v5 = vand.u32 4294901760, %v7408_v34  ;;  %v9014_v62 = vand.u32 4294901760, %v7426_v7 }
 0x165   : > { %v7351_v48 = vld [vmem:[%s8978_s11 + $0xd0] sm:$0xff]  ;;  %v9006_v57 = vand.u32 4294901760, %v7346_v55 }
 0x166   : > { %9291 = vst [vmem:[#allocation17_spill] sm:$0xff] %v7329_v53  ;;  %v9001_v16 = vand.u32 4294901760, %v7351_v48  ;;  %9292 = vst [vmem:[#allocation18_spill] sm:$0xff] %v7359_v14  ;;  %5470 = vmatprep.subr.bf16.mxu1 %v7359_v14  ;;  %v7527_v14 = vld [vmem:[%s8978_s11 + $0x178] sm:$0xff] }
 0x168   : > { %v7365_v28 = vpack.c.bf16 %v9001_v16, %v9006_v57  ;;  %v7413_v16 = vld [vmem:[%s8978_s11 + $0x118] sm:$0xff]  ;;  %v9015_v57 = vand.u32 4294901760, %v7421_v8 }
 0x169   : > { %v9012_v33 = vand.u32 4294901760, %v7413_v16 }
 0x16a   : > { %9293 = vst [vmem:[#allocation19_spill] sm:$0xff] %v7365_v28  ;;  %5472 = vmatpush1.bf16.msra.mxu1 %v7365_v28  ;;  %v7441_v47 = vpack.c.bf16 %v9014_v62, %v9015_v57  ;;  %v7459_v62 = vld [vmem:[%s8978_s11 + $0x120] sm:$0xff]  ;;  %v7464_v57 = vld [vmem:[%s8978_s11 + $0x130] sm:$0xff] }
 0x16b   : > { %5474 = vmatprep.subr.bf16.mxu1 %v7397_v2  ;;  %v7435_v54 = vpack.c.bf16 %v9012_v33, %v9013_v5  ;;  %v9023_v33 = vand.u32 4294901760, %v7446_v1  ;;  %v9022_v5 = vand.u32 4294901760, %v7451_v44  ;;  %v9025_v42 = vand.u32 4294901760, %v7459_v62 }
 0x16c   : > { %9297 = vst [vmem:[#allocation23_spill] sm:$0xff] %v7441_v47  ;;  %v9024_v41 = vand.u32 4294901760, %v7464_v57 }
 0x16d   : > { %9296 = vst [vmem:[#allocation22_spill] sm:$0xff] %v7435_v54  ;;  %v7473_v53 = vpack.c.bf16 %v9022_v5, %v9023_v33 }
 0x16e   : > { %5476 = vmatpush1.bf16.msra.mxu1 %v7403_v31  ;;  %v7479_v17 = vpack.c.bf16 %v9024_v41, %v9025_v42  ;;  %v7497_v41 = vld [vmem:[%s8978_s11 + $0x140] sm:$0xff]  ;;  %v7502_v42 = vld [vmem:[%s8978_s11 + $0x150] sm:$0xff] }
 0x16f   : > { %5478 = vmatprep.subr.bf16.mxu1 %v7435_v54  ;;  %9298 = vst [vmem:[#allocation24_spill] sm:$0xff] %v7473_v53  ;;  %v7489_v54 = vld [vmem:[%s8978_s11 + $0x158] sm:$0xff]  ;;  %v9041_v31 = vand.u32 4294901760, %v7497_v41 }
 0x170   : > { %9299 = vst [vmem:[#allocation25_spill] sm:$0xff] %v7479_v17  ;;  %v9038_v33 = vand.u32 4294901760, %v7489_v54 }
 0x172   : > { %5480 = vmatpush1.bf16.msra.mxu1 %v7441_v47  ;;  %v7484_v47 = vld [vmem:[%s8978_s11 + $0x148] sm:$0xff] }
 0x173   : > { %5482 = vmatprep.subr.bf16.mxu1 %v7473_v53  ;;  %v9039_v5 = vand.u32 4294901760, %v7484_v47  ;;  %v9040_v53 = vand.u32 4294901760, %v7502_v42 }
 0x175   : > { %v7511_v2 = vpack.c.bf16 %v9038_v33, %v9039_v5  ;;  %v7517_v28 = vpack.c.bf16 %v9040_v53, %v9041_v31  ;;  %v9054_v5 = vand.u32 4294901760, %v7527_v14  ;;  %v7535_v53 = vld [vmem:[%s8978_s11 + $0x160] sm:$0xff]  ;;  %v7540_v31 = vld [vmem:[%s8978_s11 + $0x170] sm:$0xff] }
 0x176   : > { %5484 = vmatpush1.bf16.msra.mxu1 %v7479_v17  ;;  %v7522_v17 = vld [vmem:[%s8978_s11 + $0x168] sm:$0xff]  ;;  %v9057_v37 = vand.u32 4294901760, %v7535_v53 }
 0x177   : > { %9300 = vst [vmem:[#allocation26_spill] sm:$0xff] %v7511_v2  ;;  %9301 = vst [vmem:[#allocation27_spill] sm:$0xff] %v7517_v28  ;;  %5486 = vmatprep.subr.bf16.mxu1 %v7511_v2  ;;  %v9055_v33 = vand.u32 4294901760, %v7522_v17  ;;  %v9056_v2 = vand.u32 4294901760, %v7540_v31 }
 0x179   : > { %v7549_v35 = vpack.c.bf16 %v9054_v5, %v9055_v33  ;;  %v7555_v12 = vpack.c.bf16 %v9056_v2, %v9057_v37  ;;  %v7573_v2 = vld [vmem:[%s8978_s11 + $0x180] sm:$0xff]  ;;  %v7578_v37 = vld [vmem:[%s8978_s11 + $0x190] sm:$0xff]  ;;  %v7586_v33 = vld [vmem:[%s8978_s11 + $0x1a8] sm:$0xff] }
 0x17a   : > { %5488 = vmatpush1.bf16.msra.mxu1 %v7517_v28  ;;  %v7560_v28 = vld [vmem:[%s8978_s11 + $0x188] sm:$0xff]  ;;  %9306 = vst [vmem:[#allocation32_spill] sm:$0xff] %v7578_v37  ;;  %v7591_v5 = vld [vmem:[%s8978_s11 + $0x1b8] sm:$0xff]  ;;  %v9311_v60 = vand.u32 4294901760, %v7573_v2  ;;  %v9312_v52 = vand.u32 4294901760, %v7578_v37  ;;  %v9318_v61 = vand.u32 4294901760, %v7586_v33 }
 0x17b   : > { %9302 = vst [vmem:[#allocation28_spill] sm:$0xff] %v7549_v35  ;;  %9303 = vst [vmem:[#allocation29_spill] sm:$0xff] %v7555_v12  ;;  %5490 = vmatprep.subr.bf16.mxu1 %v7549_v35  ;;  %v9319_v37 = vand.u32 4294901760, %v7591_v5 }
 0x17c   : > { %9304 = vst [vmem:[#allocation30_spill] sm:$0xff] %v7560_v28 }
 0x17e   : > { %5492 = vmatpush1.bf16.msra.mxu1 %v7555_v12  ;;  %v9307_v12 = vand.u32 4294901760, %v7560_v28  ;;  %v7616_v28 = vpack.c.bf16 %v9312_v52, %v9311_v60  ;;  %v7634_v52 = vpack.c.bf16 %v9319_v37, %v9318_v61  ;;  %v9321_v60 = vand.u32 4294901760, %v7030_v40 }
 0x17f   : > { %v9093_v37 = vand.u32 4294901760, %v7627_v23 }
 0x180   : > { %v7602_v35 = vpack.c.bf16 %v9308_v36, %v9307_v12  ;;  %9313 = vst [vmem:[#allocation35_spill] sm:$0xff] %v7616_v28  ;;  %v9314_v36 = vand.u32 4294901760, %v7020_v38  ;;  %9320 = vst [vmem:[#allocation38_spill] sm:$0xff] %v7634_v52  ;;  %v7639_v12 = vsub.f32 %v7030_v40, %v9321_v60 }
 0x182   : > { %9309 = vst [vmem:[#allocation33_spill] sm:$0xff] %v7602_v35  ;;  %v7622_v13 = vsub.f32 %v7020_v38, %v9314_v36  ;;  %5494 = vmatprep.subr.bf16.mxu1 %v7602_v35  ;;  %9322 = vst [vmem:[#allocation39_spill] sm:$0xff] %v7639_v12  ;;  %v9323_v38 = vand.u32 4294901760, %v7037_v43  ;;  %v7651_v35 = vpack.c.bf16 %v9326_v6, %v9325_v39  ;;  %v9096_v40 = vand.u32 4294901760, %v7639_v12 }
 0x183   : > { %5496 = vmatpush1.bf16.msra.mxu1 %v7616_v28  ;;  %v9328_v39 = vand.u32 4294901760, %v7043_v45  ;;  %v9329_v28 = vand.u32 4294901760, %v7048_v46 }
 0x184   : > { %9315 = vst [vmem:[#allocation36_spill] sm:$0xff] %v7622_v13  ;;  %v7644_v36 = vsub.f32 %v7037_v43, %v9323_v38  ;;  %9327 = vst [vmem:[#allocation41_spill] sm:$0xff] %v7651_v35  ;;  %v9090_v61 = vand.u32 4294901760, %v7622_v13  ;;  %5498 = vmatprep.subr.bf16.mxu1 %v7634_v52  ;;  %v2385_v38 = vsub.f32 %v7627_v23, %v9093_v37  ;;  %v9331_v37 = vand.u32 4294901760, %v7056_v49 }
 0x185   : > { %v7667_v6 = vsub.f32 %v7043_v45, %v9328_v39  ;;  %v7672_v52 = vsub.f32 %v7048_v46, %v9329_v28  ;;  %v2379_v60 = vsub.f32 %v7639_v12, %v9096_v40  ;;  %v9332_v45 = vand.u32 4294901760, %v7061_v50 }
 0x186   : > { %9324 = vst [vmem:[#allocation40_spill] sm:$0xff] %v7644_v36  ;;  %v2373_v43 = vsub.f32 %v7622_v13, %v9090_v61  ;;  %v9330_v61 = vand.u32 4294901760, %v7644_v36  ;;  %v7683_v23 = vsub.f32 %v7056_v49, %v9331_v37  ;;  %v2386_v28 = vand.u32 4294901760, %v2385_v38 }
 0x187   : > { %v7688_v39 = vsub.f32 %v7061_v50, %v9332_v45  ;;  %5500 = vmatpush1.bf16.msra.mxu1 %v7651_v35  ;;  %v9103_v40 = vand.u32 4294901760, %v7667_v6  ;;  %v9104_v12 = vand.u32 4294901760, %v7672_v52  ;;  %v2380_v3 = vand.u32 4294901760, %v2379_v60 }
 0x188   : > { %v2391_v13 = vsub.f32 %v7644_v36, %v9330_v61  ;;  %v2374_v46 = vand.u32 4294901760, %v2373_v43  ;;  %v9107_v36 = vand.u32 4294901760, %v7683_v23  ;;  %v9334_v38 = vand.u32 4294901760, %v7066_v51 }
 0x189   : > { %9333 = vst [vmem:[#allocation42_spill] sm:$0xff] %v7688_v39  ;;  %v9108_v49 = vand.u32 4294901760, %v7688_v39  ;;  %v2397_v50 = vsub.f32 %v7667_v6, %v9103_v40  ;;  %v2409_v43 = vsub.f32 %v7672_v52, %v9104_v12 }
 0x18a   : > { %v2392_v61 = vand.u32 4294901760, %v2391_v13  ;;  %v5501_v37 = vpack.c.bf16 %v2386_v28, %v2374_v46  ;;  %v7704_v45 = vsub.f32 %v7066_v51, %v9334_v38  ;;  %v2403_v13 = vsub.f32 %v7683_v23, %v9107_v36 }
 0x18b   : > { %v2415_v46 = vsub.f32 %v7688_v39, %v9108_v49  ;;  %v9336_v28 = vand.u32 4294901760, %v7079_v56  ;;  %v2398_v12 = vand.u32 4294901760, %v2397_v50  ;;  %v2410_v35 = vand.u32 4294901760, %v2409_v43 }
 0x18c   : > { %v7706_v60 = vpack.c.bf16 %v2392_v61, %v2380_v3  ;;  %5502 = vmatprep.subr.bf16.mxu1 %v5501_v37  ;;  %v9114_v51 = vand.u32 4294901760, %v7704_v45  ;;  %v9337_v3 = vand.u32 4294901760, %v7085_v58  ;;  %5838 = vmatprep.subr.bf16.mxu0 %v5501_v37  ;;  %v2404_v38 = vand.u32 4294901760, %v2403_v13 }
 0x18d   : > { %v7717_v40 = vsub.f32 %v7079_v56, %v9336_v28  ;;  %v2416_v36 = vand.u32 4294901760, %v2415_v46  ;;  %v9338_v39 = vand.u32 4294901760, %v7090_v59  ;;  %v7732_v50 = vpack.c.bf16 %v2410_v35, %v2398_v12 }
 0x18e   : > { %9335 = vst [vmem:[#allocation43_spill] sm:$0xff] %v7706_v60  ;;  %v7723_v61 = vsub.f32 %v7085_v58, %v9337_v3  ;;  %5840 = vmatpush1.bf16.msra.mxu0 %v7706_v60  ;;  %v2421_v43 = vsub.f32 %v7704_v45, %v9114_v51  ;;  %v9341_v37 = vand.u32 4294901760, %v7108_v63  ;;  %v9343_v12 = vand.u32 4294901760, %v7113_v0 }
 0x18f   : > { %v9112_v49 = vand.u32 4294901760, %v7717_v40  ;;  %v7729_v56 = vsub.f32 %v7090_v59, %v9338_v39  ;;  %9340 = vst [vmem:[#allocation45_spill] sm:$0xff] %v7732_v50  ;;  %v7743_v46 = vpack.c.bf16 %v2416_v36, %v2404_v38  ;;  %v9345_v36 = vand.u32 4294901760, %v7143_v9  ;;  %5842 = vmatprep.subr.bf16.mxu0 %v7732_v50 }
 0x190   : > { %v9111_v58 = vand.u32 4294901760, %v7723_v61  ;;  %v7741_v13 = vsub.f32 %v7108_v63, %v9341_v37  ;;  %v7752_v39 = vsub.f32 %v7113_v0, %v9343_v12  ;;  %v2422_v28 = vand.u32 4294901760, %v2421_v43 }
 0x191   : > { %9339 = vst [vmem:[#allocation44_spill] sm:$0xff] %v7729_v56  ;;  %9342 = vst [vmem:[#allocation46_spill] sm:$0xff] %v7743_v46  ;;  %v2433_v59 = vsub.f32 %v7717_v40, %v9112_v49  ;;  %v9113_v35 = vand.u32 4294901760, %v7729_v56  ;;  %v7761_v38 = vsub.f32 %v7143_v9, %v9345_v36  ;;  %v9346_v12 = vand.u32 4294901760, %v7148_v10 }
 0x192   : > { %9344 = vst [vmem:[#allocation47_spill] sm:$0xff] %v7752_v39  ;;  %v2427_v3 = vsub.f32 %v7723_v61, %v9111_v58  ;;  %v9116_v63 = vand.u32 4294901760, %v7741_v13  ;;  %5844 = vmatpush1.bf16.msra.mxu0 %v7743_v46  ;;  %v9348_v36 = vand.u32 4294901760, %v7153_v11  ;;  %v9352_v60 = vand.u32 4294901760, %v7158_v15 }
 0x193   : > { %v2434_v37 = vand.u32 4294901760, %v2433_v59  ;;  %v2439_v0 = vsub.f32 %v7729_v56, %v9113_v35  ;;  %v7771_v58 = vsub.f32 %v7148_v10, %v9346_v12  ;;  %v9121_v59 = vand.u32 4294901760, %v7761_v38 }
 0x194   : > { %v2428_v49 = vand.u32 4294901760, %v2427_v3  ;;  %v2445_v9 = vsub.f32 %v7741_v13, %v9116_v63  ;;  %v7781_v35 = vsub.f32 %v7153_v11, %v9348_v36  ;;  %v9351_v10 = vand.u32 4294901760, %v7752_v39 }
 0x195   : > { %9347 = vst [vmem:[#allocation48_spill] sm:$0xff] %v7771_v58  ;;  %v7783_v51 = vpack.c.bf16 %v2434_v37, %v2422_v28  ;;  %v2440_v43 = vand.u32 4294901760, %v2439_v0  ;;  %v9119_v3 = vand.u32 4294901760, %v7771_v58  ;;  %v2451_v63 = vsub.f32 %v7761_v38, %v9121_v59 }
 0x196   : > { %9349 = vst [vmem:[#allocation49_spill] sm:$0xff] %v7781_v35  ;;  %v2457_v12 = vsub.f32 %v7752_v39, %v9351_v10  ;;  %v2446_v46 = vand.u32 4294901760, %v2445_v9  ;;  %v9120_v50 = vand.u32 4294901760, %v7781_v35  ;;  %v7796_v11 = vsub.f32 %v7158_v15, %v9352_v60 }
 0x197   : > { %9350 = vst [vmem:[#allocation50_spill] sm:$0xff] %v7783_v51  ;;  %v7798_v28 = vpack.c.bf16 %v2440_v43, %v2428_v49  ;;  %v2463_v0 = vsub.f32 %v7771_v58, %v9119_v3  ;;  %v9355_v9 = vand.u32 4294901760, %v7191_v25  ;;  %5846 = vmatprep.subr.bf16.mxu0 %v7783_v51  ;;  %v2452_v10 = vand.u32 4294901760, %v2451_v63 }
 0x198   : > { %9353 = vst [vmem:[#allocation51_spill] sm:$0xff] %v7796_v11  ;;  %v2458_v37 = vand.u32 4294901760, %v2457_v12  ;;  %v2469_v15 = vsub.f32 %v7781_v35, %v9120_v50  ;;  %v9122_v49 = vand.u32 4294901760, %v7796_v11  ;;  %v9357_v60 = vand.u32 4294901760, %v7196_v26 }
 0x199   : > { %9354 = vst [vmem:[#allocation52_spill] sm:$0xff] %v7798_v28  ;;  %v7806_v36 = vsub.f32 %v7191_v25, %v9355_v9  ;;  %v2464_v3 = vand.u32 4294901760, %v2463_v0  ;;  %v9360_v9 = vand.u32 4294901760, %v7203_v29  ;;  %5848 = vmatpush1.bf16.msra.mxu0 %v7798_v28 }
 0x19a   : > { %v7816_v43 = vsub.f32 %v7196_v26, %v9357_v60  ;;  %v7818_v12 = vpack.c.bf16 %v2458_v37, %v2446_v46  ;;  %v2470_v50 = vand.u32 4294901760, %v2469_v15  ;;  %v2481_v59 = vsub.f32 %v7796_v11, %v9122_v49 }
 0x19b   : > { %9356 = vst [vmem:[#allocation53_spill] sm:$0xff] %v7806_v36  ;;  %v9123_v25 = vand.u32 4294901760, %v7806_v36  ;;  %v7824_v63 = vsub.f32 %v7203_v29, %v9360_v9  ;;  %v9362_v46 = vand.u32 4294901760, %v7208_v30  ;;  %v7836_v0 = vpack.c.bf16 %v2464_v3, %v2452_v10 }
 0x19c   : > { %9358 = vst [vmem:[#allocation54_spill] sm:$0xff] %v7816_v43  ;;  %9359 = vst [vmem:[#allocation55_spill] sm:$0xff] %v7818_v12  ;;  %v9125_v26 = vand.u32 4294901760, %v7816_v43  ;;  %v9365_v15 = vand.u32 4294901760, %v7239_v20  ;;  %5850 = vmatprep.subr.bf16.mxu0 %v7818_v12  ;;  %v2482_v49 = vand.u32 4294901760, %v2481_v59  ;;  %v9367_v10 = vand.u32 4294901760, %v7244_v27 }
 0x19d   : > { %9361 = vst [vmem:[#allocation56_spill] sm:$0xff] %v7824_v63  ;;  %v7834_v37 = vsub.f32 %v7208_v30, %v9362_v46  ;;  %9364 = vst [vmem:[#allocation58_spill] sm:$0xff] %v7836_v0  ;;  %v2475_v29 = vsub.f32 %v7806_v36, %v9123_v25  ;;  %v9127_v60 = vand.u32 4294901760, %v7824_v63  ;;  %v9369_v59 = vand.u32 4294901760, %v7334_v18  ;;  %5852 = vmatpush1.bf16.msra.mxu0 %v7836_v0 }
 0x19e   : > { %v7845_v9 = vsub.f32 %v7239_v20, %v9365_v15  ;;  %v2487_v30 = vsub.f32 %v7816_v43, %v9125_v26  ;;  %v7855_v46 = vsub.f32 %v7244_v27, %v9367_v10  ;;  %v7867_v26 = vpack.c.bf16 %v2482_v49, %v2470_v50 }
 0x19f   : > { %9363 = vst [vmem:[#allocation57_spill] sm:$0xff] %v7834_v37  ;;  %v2476_v25 = vand.u32 4294901760, %v2475_v29  ;;  %v2493_v20 = vsub.f32 %v7824_v63, %v9127_v60  ;;  %v7864_v12 = vsub.f32 %v7334_v18, %v9369_v59  ;;  %v9372_v27 = vand.u32 4294901760, %v7834_v37 }
 0x1a0   : > { %9366 = vst [vmem:[#allocation59_spill] sm:$0xff] %v7845_v9  ;;  %9368 = vst [vmem:[#allocation60_spill] sm:$0xff] %v7855_v46  ;;  %v9129_v15 = vand.u32 4294901760, %v7845_v9  ;;  %v2488_v3 = vand.u32 4294901760, %v2487_v30  ;;  %v9130_v10 = vand.u32 4294901760, %v7855_v46  ;;  %v9373_v18 = vand.u32 4294901760, %v7339_v22  ;;  %5854 = vmatprep.subr.bf16.mxu0 %v7867_v26 }
 0x1a1   : > { %9370 = vst [vmem:[#allocation61_spill] sm:$0xff] %v7864_v12  ;;  %9371 = vst [vmem:[#allocation62_spill] sm:$0xff] %v7867_v26  ;;  %v2505_v29 = vsub.f32 %v7834_v37, %v9372_v27  ;;  %v2494_v28 = vand.u32 4294901760, %v2493_v20  ;;  %v9131_v51 = vand.u32 4294901760, %v7864_v12  ;;  %v9376_v20 = vand.u32 4294901760, %v7346_v55 }
 0x1a2   : > { %v2499_v60 = vsub.f32 %v7845_v9, %v9129_v15  ;;  %v7880_v59 = vsub.f32 %v7339_v22, %v9373_v18  ;;  %v7882_v50 = vpack.c.bf16 %v2488_v3, %v2476_v25  ;;  %v2511_v30 = vsub.f32 %v7855_v46, %v9130_v10 }
 0x1a3   : > { %v2506_v49 = vand.u32 4294901760, %v2505_v29  ;;  %v7890_v27 = vsub.f32 %v7346_v55, %v9376_v20  ;;  %v2517_v22 = vsub.f32 %v7864_v12, %v9131_v51  ;;  %v9378_v3 = vand.u32 4294901760, %v7351_v48 }
 0x1a4   : > { %9374 = vst [vmem:[#allocation63_spill] sm:$0xff] %v7880_v59  ;;  %9375 = vst [vmem:[#allocation64_spill] sm:$0xff] %v7882_v50  ;;  %v2500_v15 = vand.u32 4294901760, %v2499_v60  ;;  %v9133_v25 = vand.u32 4294901760, %v7880_v59  ;;  %v2512_v10 = vand.u32 4294901760, %v2511_v30  ;;  %v9381_v20 = vand.u32 4294901760, %v7370_v32  ;;  %5856 = vmatpush1.bf16.msra.mxu0 %v7882_v50 }
 0x1a5   : > { %9377 = vst [vmem:[#allocation65_spill] sm:$0xff] %v7890_v27  ;;  %v7900_v29 = vsub.f32 %v7351_v48, %v9378_v3  ;;  %v7902_v18 = vpack.c.bf16 %v2506_v49, %v2494_v28  ;;  %v9134_v55 = vand.u32 4294901760, %v7890_v27  ;;  %v2518_v51 = vand.u32 4294901760, %v2517_v22 }
 0x1a6   : > { %v7908_v60 = vsub.f32 %v7370_v32, %v9381_v20  ;;  %v2529_v26 = vsub.f32 %v7880_v59, %v9133_v25  ;;  %v9383_v28 = vand.u32 4294901760, %v7375_v24  ;;  %v7920_v30 = vpack.c.bf16 %v2512_v10, %v2500_v15 }
 0x1a7   : > { %9379 = vst [vmem:[#allocation66_spill] sm:$0xff] %v7900_v29  ;;  %9380 = vst [vmem:[#allocation67_spill] sm:$0xff] %v7902_v18  ;;  %v9136_v48 = vand.u32 4294901760, %v7900_v29  ;;  %v2523_v32 = vsub.f32 %v7890_v27, %v9134_v55  ;;  %v9386_v22 = vand.u32 4294901760, %v7383_v4  ;;  %5858 = vmatprep.subr.bf16.mxu0 %v7902_v18  ;;  %v9388_v10 = vand.u32 4294901760, %v7388_v19 }
 0x1a8   : > { %9382 = vst [vmem:[#allocation68_spill] sm:$0xff] %v7908_v60  ;;  %v7918_v49 = vsub.f32 %v7375_v24, %v9383_v28  ;;  %9385 = vst [vmem:[#allocation70_spill] sm:$0xff] %v7920_v30  ;;  %v9138_v3 = vand.u32 4294901760, %v7908_v60  ;;  %v2530_v25 = vand.u32 4294901760, %v2529_v26  ;;  %v9390_v26 = vand.u32 4294901760, %v7408_v34  ;;  %5860 = vmatpush1.bf16.msra.mxu0 %v7920_v30 }
 0x1a9   : > { %v7929_v20 = vsub.f32 %v7383_v4, %v9386_v22  ;;  %v2535_v24 = vsub.f32 %v7900_v29, %v9136_v48  ;;  %v7939_v28 = vsub.f32 %v7388_v19, %v9388_v10  ;;  %v2524_v55 = vand.u32 4294901760, %v2523_v32 }
 0x1aa   : > { %9384 = vst [vmem:[#allocation69_spill] sm:$0xff] %v7918_v49  ;;  %v2541_v4 = vsub.f32 %v7908_v60, %v9138_v3  ;;  %v7948_v18 = vsub.f32 %v7408_v34, %v9390_v26  ;;  %v7951_v48 = vpack.c.bf16 %v2530_v25, %v2518_v51  ;;  %v9393_v19 = vand.u32 4294901760, %v7918_v49 }
 0x1ab   : > { %9387 = vst [vmem:[#allocation71_spill] sm:$0xff] %v7929_v20  ;;  %9389 = vst [vmem:[#allocation72_spill] sm:$0xff] %v7939_v28  ;;  %v9140_v22 = vand.u32 4294901760, %v7929_v20  ;;  %v2536_v15 = vand.u32 4294901760, %v2535_v24  ;;  %v9141_v10 = vand.u32 4294901760, %v7939_v28  ;;  %v9394_v34 = vand.u32 4294901760, %v7413_v16 }
 0x1ac   : > { %9391 = vst [vmem:[#allocation73_spill] sm:$0xff] %v7948_v18  ;;  %9392 = vst [vmem:[#allocation74_spill] sm:$0xff] %v7951_v48  ;;  %v2553_v32 = vsub.f32 %v7918_v49, %v9393_v19  ;;  %v2542_v50 = vand.u32 4294901760, %v2541_v4  ;;  %v9142_v0 = vand.u32 4294901760, %v7948_v18  ;;  %v9397_v4 = vand.u32 4294901760, %v7421_v8  ;;  %5862 = vmatprep.subr.bf16.mxu0 %v7951_v48 }
 0x1ad   : > { %v2547_v3 = vsub.f32 %v7929_v20, %v9140_v22  ;;  %v7964_v26 = vsub.f32 %v7413_v16, %v9394_v34  ;;  %v7966_v51 = vpack.c.bf16 %v2536_v15, %v2524_v55  ;;  %v2559_v24 = vsub.f32 %v7939_v28, %v9141_v10 }
 0x1ae   : > { %v2554_v25 = vand.u32 4294901760, %v2553_v32  ;;  %v7974_v19 = vsub.f32 %v7421_v8, %v9397_v4  ;;  %v2565_v16 = vsub.f32 %v7948_v18, %v9142_v0  ;;  %v9399_v15 = vand.u32 4294901760, %v7426_v7 }
 0x1af   : > { %9395 = vst [vmem:[#allocation75_spill] sm:$0xff] %v7964_v26  ;;  %9396 = vst [vmem:[#allocation76_spill] sm:$0xff] %v7966_v51  ;;  %v2548_v22 = vand.u32 4294901760, %v2547_v3  ;;  %v9144_v55 = vand.u32 4294901760, %v7964_v26  ;;  %v2560_v10 = vand.u32 4294901760, %v2559_v24  ;;  %v9402_v4 = vand.u32 4294901760, %v7446_v1  ;;  %5864 = vmatpush1.bf16.msra.mxu0 %v7966_v51 }
 0x1b0   : > { %9398 = vst [vmem:[#allocation77_spill] sm:$0xff] %v7974_v19  ;;  %v7984_v32 = vsub.f32 %v7426_v7, %v9399_v15  ;;  %v7986_v34 = vpack.c.bf16 %v2554_v25, %v2542_v50  ;;  %v9145_v8 = vand.u32 4294901760, %v7974_v19  ;;  %v2566_v0 = vand.u32 4294901760, %v2565_v16 }
 0x1b1   : > { %v7992_v3 = vsub.f32 %v7446_v1, %v9402_v4  ;;  %v2577_v48 = vsub.f32 %v7964_v26, %v9144_v55  ;;  %v9404_v50 = vand.u32 4294901760, %v7451_v44  ;;  %v8004_v24 = vpack.c.bf16 %v2560_v10, %v2548_v22 }
 0x1b2   : > { %9400 = vst [vmem:[#allocation78_spill] sm:$0xff] %v7984_v32  ;;  %9401 = vst [vmem:[#allocation79_spill] sm:$0xff] %v7986_v34  ;;  %v9147_v7 = vand.u32 4294901760, %v7984_v32  ;;  %v2571_v1 = vsub.f32 %v7974_v19, %v9145_v8  ;;  %v9407_v16 = vand.u32 4294901760, %v7459_v62  ;;  %5866 = vmatprep.subr.bf16.mxu0 %v7986_v34  ;;  %v9409_v10 = vand.u32 4294901760, %v7464_v57 }
 0x1b3   : > { %9403 = vst [vmem:[#allocation80_spill] sm:$0xff] %v7992_v3  ;;  %v8002_v25 = vsub.f32 %v7451_v44, %v9404_v50  ;;  %9406 = vst [vmem:[#allocation82_spill] sm:$0xff] %v8004_v24  ;;  %v9149_v15 = vand.u32 4294901760, %v7992_v3  ;;  %v2578_v55 = vand.u32 4294901760, %v2577_v48  ;;  %v9411_v48 = vand.u32 4294901760, %v7484_v47  ;;  %5868 = vmatpush1.bf16.msra.mxu0 %v8004_v24 }
 0x1b4   : > { %v8013_v4 = vsub.f32 %v7459_v62, %v9407_v16  ;;  %v2583_v44 = vsub.f32 %v7984_v32, %v9147_v7  ;;  %v8023_v50 = vsub.f32 %v7464_v57, %v9409_v10  ;;  %v2572_v8 = vand.u32 4294901760, %v2571_v1 }
 0x1b5   : > { %9405 = vst [vmem:[#allocation81_spill] sm:$0xff] %v8002_v25  ;;  %v2589_v62 = vsub.f32 %v7992_v3, %v9149_v15  ;;  %v8032_v34 = vsub.f32 %v7484_v47, %v9411_v48  ;;  %v8035_v7 = vpack.c.bf16 %v2578_v55, %v2566_v0  ;;  %v9414_v57 = vand.u32 4294901760, %v8002_v25 }
 0x1b6   : > { %9408 = vst [vmem:[#allocation83_spill] sm:$0xff] %v8013_v4  ;;  %9410 = vst [vmem:[#allocation84_spill] sm:$0xff] %v8023_v50  ;;  %v9151_v16 = vand.u32 4294901760, %v8013_v4  ;;  %v2584_v22 = vand.u32 4294901760, %v2583_v44  ;;  %v9152_v10 = vand.u32 4294901760, %v8023_v50  ;;  %v9415_v47 = vand.u32 4294901760, %v7489_v54 }
 0x1b7   : > { %9412 = vst [vmem:[#allocation85_spill] sm:$0xff] %v8032_v34  ;;  %9413 = vst [vmem:[#allocation86_spill] sm:$0xff] %v8035_v7  ;;  %v2601_v1 = vsub.f32 %v8002_v25, %v9414_v57  ;;  %v2590_v51 = vand.u32 4294901760, %v2589_v62  ;;  %v9153_v30 = vand.u32 4294901760, %v8032_v34  ;;  %v9418_v62 = vand.u32 4294901760, %v7497_v41  ;;  %5870 = vmatprep.subr.bf16.mxu0 %v8035_v7 }
 0x1b8   : > { %v2595_v15 = vsub.f32 %v8013_v4, %v9151_v16  ;;  %v8048_v48 = vsub.f32 %v7489_v54, %v9415_v47  ;;  %v8050_v0 = vpack.c.bf16 %v2584_v22, %v2572_v8  ;;  %v2607_v44 = vsub.f32 %v8023_v50, %v9152_v10 }
 0x1b9   : > { %v2602_v55 = vand.u32 4294901760, %v2601_v1  ;;  %v8058_v57 = vsub.f32 %v7497_v41, %v9418_v62  ;;  %v2613_v54 = vsub.f32 %v8032_v34, %v9153_v30  ;;  %v9420_v22 = vand.u32 4294901760, %v7502_v42 }
 0x1ba   : > { %9416 = vst [vmem:[#allocation87_spill] sm:$0xff] %v8048_v48  ;;  %9417 = vst [vmem:[#allocation88_spill] sm:$0xff] %v8050_v0  ;;  %v2596_v16 = vand.u32 4294901760, %v2595_v15  ;;  %v9155_v8 = vand.u32 4294901760, %v8048_v48  ;;  %v2608_v10 = vand.u32 4294901760, %v2607_v44  ;;  %v9423_v62 = vand.u32 4294901760, %v7522_v17  ;;  %5872 = vmatpush1.bf16.msra.mxu0 %v8050_v0 }
 0x1bb   : > { %9419 = vst [vmem:[#allocation89_spill] sm:$0xff] %v8058_v57  ;;  %v8068_v1 = vsub.f32 %v7502_v42, %v9420_v22  ;;  %v8070_v47 = vpack.c.bf16 %v2602_v55, %v2590_v51  ;;  %v9156_v41 = vand.u32 4294901760, %v8058_v57  ;;  %v2614_v30 = vand.u32 4294901760, %v2613_v54 }
 0x1bc   : > { %v8076_v15 = vsub.f32 %v7522_v17, %v9423_v62  ;;  %v2625_v7 = vsub.f32 %v8048_v48, %v9155_v8  ;;  %v9425_v51 = vand.u32 4294901760, %v7527_v14  ;;  %v8088_v44 = vpack.c.bf16 %v2608_v10, %v2596_v16 }
 0x1bd   : > { %9421 = vst [vmem:[#allocation90_spill] sm:$0xff] %v8068_v1  ;;  %9422 = vst [vmem:[#allocation91_spill] sm:$0xff] %v8070_v47  ;;  %v9159_v42 = vand.u32 4294901760, %v8068_v1  ;;  %v2619_v17 = vsub.f32 %v8058_v57, %v9156_v41  ;;  %v9428_v54 = vand.u32 4294901760, %v7535_v53  ;;  %5874 = vmatprep.subr.bf16.mxu0 %v8070_v47  ;;  %v9430_v10 = vand.u32 4294901760, %v7540_v31  ;;  %v9432_v47 = vld [vmem:[#allocation30_spill] sm:$0xff] }
 0x1be   : > { %9424 = vst [vmem:[#allocation92_spill] sm:$0xff] %v8076_v15  ;;  %v8086_v55 = vsub.f32 %v7527_v14, %v9425_v51  ;;  %9427 = vst [vmem:[#allocation94_spill] sm:$0xff] %v8088_v44  ;;  %v9161_v22 = vand.u32 4294901760, %v8076_v15  ;;  %v2626_v8 = vand.u32 4294901760, %v2625_v7  ;;  %v9433_v7 = vand.u32 4294901760, %v9432_v47  ;;  %5876 = vmatpush1.bf16.msra.mxu0 %v8088_v44 }
 0x1bf   : > { %v8097_v62 = vsub.f32 %v7535_v53, %v9428_v54  ;;  %v2631_v14 = vsub.f32 %v8068_v1, %v9159_v42  ;;  %v8107_v51 = vsub.f32 %v7540_v31, %v9430_v10  ;;  %v2620_v41 = vand.u32 4294901760, %v2619_v17 }
 0x1c0   : > { %9426 = vst [vmem:[#allocation93_spill] sm:$0xff] %v8086_v55  ;;  %v2637_v53 = vsub.f32 %v8076_v15, %v9161_v22  ;;  %v8116_v0 = vsub.f32 %v9432_v47, %v9433_v7  ;;  %v8119_v42 = vpack.c.bf16 %v2626_v8, %v2614_v30  ;;  %v9436_v31 = vand.u32 4294901760, %v8086_v55  ;;  %v9437_v47 = vld [vmem:[#allocation31_spill] sm:$0xff] }
 0x1c1   : > { %9429 = vst [vmem:[#allocation95_spill] sm:$0xff] %v8097_v62  ;;  %9431 = vst [vmem:[#allocation96_spill] sm:$0xff] %v8107_v51  ;;  %v9165_v54 = vand.u32 4294901760, %v8097_v62  ;;  %v2632_v16 = vand.u32 4294901760, %v2631_v14  ;;  %v9166_v10 = vand.u32 4294901760, %v8107_v51  ;;  %v9438_v7 = vand.u32 4294901760, %v9437_v47 }
 0x1c2   : > { %9434 = vst [vmem:[#allocation30_spill] sm:$0xff] %v8116_v0  ;;  %9435 = vst [vmem:[#allocation97_spill] sm:$0xff] %v8119_v42  ;;  %v2649_v17 = vsub.f32 %v8086_v55, %v9436_v31  ;;  %v2638_v24 = vand.u32 4294901760, %v2637_v53  ;;  %v9169_v15 = vand.u32 4294901760, %v8116_v0  ;;  %v9441_v53 = vand.u32 4294901760, %v7573_v2  ;;  %5878 = vmatprep.subr.bf16.mxu0 %v8119_v42 }
 0x1c3   : > { %v2643_v22 = vsub.f32 %v8097_v62, %v9165_v54  ;;  %v8132_v44 = vsub.f32 %v9437_v47, %v9438_v7  ;;  %v8134_v30 = vpack.c.bf16 %v2632_v16, %v2620_v41  ;;  %v2655_v14 = vsub.f32 %v8107_v51, %v9166_v10  ;;  %v9443_v16 = vld [vmem:[#allocation32_spill] sm:$0xff] }
 0x1c4   : > { %v2650_v8 = vand.u32 4294901760, %v2649_v17  ;;  %v8142_v31 = vsub.f32 %v7573_v2, %v9441_v53  ;;  %v2661_v47 = vsub.f32 %v8116_v0, %v9169_v15  ;;  %v9444_v17 = vand.u32 4294901760, %v9443_v16 }
 0x1c5   : > { %9439 = vst [vmem:[#allocation31_spill] sm:$0xff] %v8132_v44  ;;  %9440 = vst [vmem:[#allocation98_spill] sm:$0xff] %v8134_v30  ;;  %v2644_v54 = vand.u32 4294901760, %v2643_v22  ;;  %v9171_v41 = vand.u32 4294901760, %v8132_v44  ;;  %v2656_v51 = vand.u32 4294901760, %v2655_v14  ;;  %v9447_v53 = vand.u32 4294901760, %v7586_v33  ;;  %5880 = vmatpush1.bf16.msra.mxu0 %v8134_v30 }
 0x1c6   : > { %9442 = vst [vmem:[#allocation99_spill] sm:$0xff] %v8142_v31  ;;  %v8152_v7 = vsub.f32 %v9443_v16, %v9444_v17  ;;  %v8154_v10 = vpack.c.bf16 %v2650_v8, %v2638_v24  ;;  %v9172_v2 = vand.u32 4294901760, %v8142_v31  ;;  %v2662_v15 = vand.u32 4294901760, %v2661_v47 }
 0x1c7   : > { %v8160_v22 = vsub.f32 %v7586_v33, %v9447_v53  ;;  %v2673_v42 = vsub.f32 %v8132_v44, %v9171_v41  ;;  %v9449_v24 = vand.u32 4294901760, %v7591_v5  ;;  %v8172_v14 = vpack.c.bf16 %v2656_v51, %v2644_v54  ;;  %v9453_v54 = vld [vmem:[#allocation34_spill] sm:$0xff] }
 0x1c8   : > { %9445 = vst [vmem:[#allocation32_spill] sm:$0xff] %v8152_v7  ;;  %9446 = vst [vmem:[#allocation100_spill] sm:$0xff] %v8154_v10  ;;  %v9175_v16 = vand.u32 4294901760, %v8152_v7  ;;  %v2667_v33 = vsub.f32 %v8142_v31, %v9172_v2  ;;  %v9452_v47 = vand.u32 4294901760, %v7596_v21  ;;  %5882 = vmatprep.subr.bf16.mxu0 %v8154_v10 }
 0x1c9   : > { %9448 = vst [vmem:[#allocation101_spill] sm:$0xff] %v8160_v22  ;;  %v8170_v8 = vsub.f32 %v7591_v5, %v9449_v24  ;;  %9451 = vst [vmem:[#allocation103_spill] sm:$0xff] %v8172_v14  ;;  %v2674_v41 = vand.u32 4294901760, %v2673_v42  ;;  %v9454_v24 = vand.u32 4294901760, %v9453_v54  ;;  %v9455_v30 = vand.u32 4294901760, %v8160_v22  ;;  %5884 = vmatpush1.bf16.msra.mxu0 %v8172_v14 }
 0x1ca   : > { %v8181_v53 = vsub.f32 %v7596_v21, %v9452_v47  ;;  %v2679_v5 = vsub.f32 %v8152_v7, %v9175_v16  ;;  %v2668_v17 = vand.u32 4294901760, %v2667_v33 }
 0x1cb   : > { %9450 = vst [vmem:[#allocation102_spill] sm:$0xff] %v8170_v8  ;;  %v9179_v51 = vand.u32 4294901760, %v8170_v8  ;;  %v8191_v2 = vsub.f32 %v9453_v54, %v9454_v24  ;;  %v2685_v21 = vsub.f32 %v8160_v22, %v9455_v30  ;;  %v8198_v42 = vpack.c.bf16 %v2674_v41, %v2662_v15  ;;  %v9456_v41 = vld [vmem:[#allocation36_spill] sm:$0xff] }
 0x1cc   : > { %v9187_v47 = vand.u32 4294901760, %v8181_v53  ;;  %v2680_v10 = vand.u32 4294901760, %v2679_v5  ;;  %v9457_v5 = vld [vmem:[#allocation37_spill] sm:$0xff] }
 0x1cd   : > { %v2697_v16 = vsub.f32 %v8170_v8, %v9179_v51  ;;  %v9186_v7 = vand.u32 4294901760, %v8191_v2  ;;  %v2686_v54 = vand.u32 4294901760, %v2685_v21  ;;  %v8214_v14 = vpack.c.bf16 %v9457_v5, %v9456_v41  ;;  %5886 = vmatprep.subr.bf16.mxu0 %v8198_v42  ;;  %v9458_v8 = vld [vmem:[#allocation39_spill] sm:$0xff]  ;;  %v9459_v21 = vld [vmem:[#allocation40_spill] sm:$0xff] }
 0x1ce   : > { %v2691_v33 = vsub.f32 %v8181_v53, %v9187_v47  ;;  %v8207_v24 = vpack.c.bf16 %v2680_v10, %v2668_v17  ;;  %v8219_v22 = vpack.c.bf16 %v9459_v21, %v9458_v8 }
 0x1cf   : > { %v2698_v30 = vand.u32 4294901760, %v2697_v16  ;;  %v2703_v15 = vsub.f32 %v8191_v2, %v9186_v7  ;;  %v8226_v16 = vpack.c.bf16 %v7672_v52, %v7667_v6  ;;  %v9460_v7 = vld [vmem:[#allocation42_spill] sm:$0xff] }
 0x1d0   : > { %v2692_v51 = vand.u32 4294901760, %v2691_v33  ;;  %5888 = vmatpush1.bf16.msra.mxu0 %v8207_v24  ;;  %v8232_v47 = vpack.c.bf16 %v9460_v7, %v7683_v23  ;;  %v8243_v33 = vpack.c.bf16 %v7729_v56, %v7723_v61  ;;  %v8263_v56 = vpack.c.bf16 %v7834_v37, %v7824_v63 }
 0x1d1   : > { %v8221_v31 = vpack.c.bf16 %v2698_v30, %v2686_v54  ;;  %v2704_v10 = vand.u32 4294901760, %v2703_v15  ;;  %v8238_v54 = vpack.c.bf16 %v7717_v40, %v7704_v45  ;;  %v8251_v30 = vpack.c.bf16 %v7771_v58, %v7761_v38 }
 0x1d2   : > { %v8255_v15 = vpack.c.bf16 %v7796_v11, %v7781_v35  ;;  %9462 = vst [vmem:[#allocation36_spill] sm:$0xff] %v8263_v56  ;;  %v8271_v58 = vpack.c.bf16 %v7880_v59, %v7864_v12  ;;  %v8275_v11 = vpack.c.bf16 %v7900_v29, %v7890_v27  ;;  %v2143_v35 = vlaneseq }
 0x1d3   : > { %v8228_v17 = vpack.c.bf16 %v2704_v10, %v2692_v51  ;;  %5890 = vmatprep.subr.bf16.mxu0 %v8221_v31  ;;  %v8247_v51 = vpack.c.bf16 %v7752_v39, %v7741_v13  ;;  %v8259_v10 = vpack.c.bf16 %v7816_v43, %v7806_v36  ;;  %v8267_v39 = vpack.c.bf16 %v7855_v46, %v7845_v9 }
 0x1d4   : > { %9464 = vst [vmem:[#allocation39_spill] sm:$0xff] %v8271_v58  ;;  %9465 = vst [vmem:[#allocation40_spill] sm:$0xff] %v8275_v11  ;;  %v8279_v43 = vpack.c.bf16 %v7918_v49, %v7908_v60  ;;  %v8283_v37 = vpack.c.bf16 %v7939_v28, %v7929_v20  ;;  %v2144_v63 = vshrl.u32 %v2143_v35, 7  ;;  %v8287_v46 = vpack.c.bf16 %v7964_v26, %v7948_v18  ;;  %v2141_v28 = vld [vmem:[%s8973_s6] sm:$0x3]  ;;  %v9477_v60 = vld [vmem:[#allocation92_spill] sm:$0xff] }
 0x1d5   : > { %5892 = vmatpush1.bf16.msra.mxu0 %v8228_v17  ;;  %9461 = vst [vmem:[#allocation34_spill] sm:$0xff] %v8259_v10  ;;  %9463 = vst [vmem:[#allocation37_spill] sm:$0xff] %v8267_v39  ;;  %v8291_v59 = vpack.c.bf16 %v7984_v32, %v7974_v19  ;;  %v8297_v27 = vpack.c.bf16 %v8002_v25, %v7992_v3  ;;  %v8306_v35 = vpack.c.bf16 %v8023_v50, %v8013_v4  ;;  %v9488_v4 = vld [vmem:[#allocation101_spill] sm:$0xff] }
 0x1d6   : > { %5894 = vmatprep.subr.bf16.mxu0 %v8214_v14  ;;  %9466 = vst [vmem:[#allocation42_spill] sm:$0xff] %v8279_v43  ;;  %9467 = vst [vmem:[#allocation104_spill] sm:$0xff] %v8283_v37  ;;  %v8293_v29 = vsub.s32 1, %v2144_v63  ;;  %v8302_v20 = vsub.s32 0, %v2144_v63  ;;  %v8311_v32 = vpack.c.bf16 %v8048_v48, %v8032_v34  ;;  %v8316_v25 = vpack.c.bf16 %v8068_v1, %v8058_v57 }
 0x1d7   : > { %9468 = vst [vmem:[#allocation105_spill] sm:$0xff] %v8287_v46  ;;  %9469 = vst [vmem:[#allocation106_spill] sm:$0xff] %v8291_v59  ;;  %v8322_v50 = vpack.c.bf16 %v8086_v55, %v9477_v60  ;;  %v9485_v60 = vld [vmem:[#allocation99_spill] sm:$0xff] }
 0x1d8   : > { %9470 = vst [vmem:[#allocation107_spill] sm:$0xff] %v8293_v29  ;;  %9471 = vst [vmem:[#allocation108_spill] sm:$0xff] %v8297_v27  ;;  %v2150_v26 = vrot.slane %v2141_v28, %v8293_v29  ;;  %v2146_v19 = vrot.slane %v2141_v28, %v8302_v20  ;;  %v9481_v28 = vld [vmem:[#allocation96_spill] sm:$0xff] }
 0x1d9   : > { %9472 = vst [vmem:[#allocation109_spill] sm:$0xff] %v8302_v20  ;;  %9473 = vst [vmem:[#allocation110_spill] sm:$0xff] %v8306_v35  ;;  %v8330_v20 = vpack.c.bf16 %v9481_v28, %v8097_v62  ;;  %v9486_v28 = vld [vmem:[#allocation32_spill] sm:$0xff] }
 0x1da   : > { %9474 = vst [vmem:[#allocation111_spill] sm:$0xff] %v8311_v32  ;;  %9475 = vst [vmem:[#allocation112_spill] sm:$0xff] %v8316_v25  ;;  %v8346_v62 = vpack.c.bf16 %v9486_v28, %v9485_v60 }
 0x1db   : > { %9478 = vst [vmem:[#allocation114_spill] sm:$0xff] %v8322_v50  ;;  %9482 = vst [vmem:[#allocation117_spill] sm:$0xff] %v8330_v20 }
 0x1dc   : > { %9487 = vst [vmem:[#allocation99_spill] sm:$0xff] %v8346_v62 }
 0x202   : > { %v2128_v3 = vpop.f32.mrb[8].mxu0 }
 0x203   : > { %v2130_v18 = vpop.f32.mrb[9].mxu0  ;;  %v8324_v29 = vadd.f32 %v2146_v19, %v2128_v3 }
 0x204   : > { %v8318_v63 = vadd.f32 %v2150_v26, %v2130_v18  ;;  %v2132_v49 = vpop.f32.mrb[10].mxu0 }
 0x205   : > { %9479 = vst [vmem:[#allocation115_spill] sm:$0xff] %v8324_v29  ;;  %v8326_v48 = vadd.f32 %v2146_v19, %v2132_v49  ;;  %v2134_v34 = vpop.f32.mrb[11].mxu0  ;;  %v8342_v49 = vpack.c.bf16 %v8132_v44, %v8116_v0 }
 0x206   : > { %9476 = vst [vmem:[#allocation113_spill] sm:$0xff] %v8318_v63  ;;  %v8332_v1 = vadd.f32 %v2150_v26, %v2134_v34  ;;  %v2165_v57 = vsel %vm2164_vm1, %v8318_v63, 0.0 }
 0x207   : > { %9480 = vst [vmem:[#allocation116_spill] sm:$0xff] %v8326_v48  ;;  %v2157_v18 = vadd.f32 %v8326_v48, %v8324_v29  ;;  %9484 = vst [vmem:[#allocation119_spill] sm:$0xff] %v8342_v49  ;;  %v9489_v48 = vld [vmem:[#allocation102_spill] sm:$0xff] }
 0x208   : > { %9483 = vst [vmem:[#allocation118_spill] sm:$0xff] %v8332_v1  ;;  %v2166_v3 = vsel %vm2164_vm1, %v8332_v1, 0.0  ;;  %v8350_v29 = vpack.c.bf16 %v9489_v48, %v9488_v4  ;;  %v8354_v1 = vpack.c.bf16 %v8191_v2, %v8181_v53 }
 0x209   : > { %v2158_v19 = vrot.slane %v2157_v18, 4  ;;  %v2167_v55 = vadd.f32 %v2166_v3, %v2165_v57 }
 0x20a   : > { %9490 = vst [vmem:[#allocation120_spill] sm:$0xff] %v8350_v29  ;;  %9491 = vst [vmem:[#allocation121_spill] sm:$0xff] %v8354_v1 }
 0x20b   : > { %v2159_v26 = vadd.f32 %v2158_v19, %v2157_v18  ;;  %v2168_v34 = vrot.slane %v2167_v55, 4 }
 0x20d   : > { %v2160_v63 = vrot.slane %v2159_v26, 2  ;;  %v2169_v12 = vadd.f32 %v2168_v34, %v2167_v55 }
 0x20f   : > { %v2161_v44 = vadd.f32 %v2160_v63, %v2159_v26  ;;  %v2170_v0 = vrot.slane %v2169_v12, 2  ;;  %v9494_v26 = vld [vmem:[#allocation46_spill] sm:$0xff] }
 0x211   : > { %v2162_v9 = vrot.slane %v2161_v44, 1  ;;  %v2171_v57 = vadd.f32 %v2170_v0, %v2169_v12 }
 0x213   : > { %v2163_v3 = vadd.f32 %v2162_v9, %v2161_v44  ;;  %v2172_v36 = vrot.slane %v2171_v57, 1  ;;  %v9492_v44 = vld [vmem:[#allocation43_spill] sm:$0xff] }
 0x215   : > { %v8356_v28 = vand.u32 4294901760, %v2163_v3  ;;  %v2173_v18 = vadd.f32 %v2172_v36, %v2171_v57  ;;  %v9495_v57 = vld [vmem:[#allocation50_spill] sm:$0xff] }
 0x217   : > { %v8359_v19 = vsub.f32 %v2163_v3, %v8356_v28  ;;  %v2231_v48 = vsel %vm2164_vm1, %v2173_v18, 0  ;;  %v9496_v3 = vld [vmem:[#allocation52_spill] sm:$0xff]  ;;  %v9497_v18 = vld [vmem:[#allocation55_spill] sm:$0xff] }
 0x218   : > { %v8362_v4 = vand.u32 4294901760, %v2231_v48 }
 0x219   : > { %v9231_v55 = vand.u32 4294901760, %v8359_v19 }
 0x21a   : > { %v8366_v34 = vsub.f32 %v2231_v48, %v8362_v4  ;;  %v9493_v48 = vld [vmem:[#allocation45_spill] sm:$0xff] }
 0x21b   : > { %v2362_v12 = vsub.f32 %v8359_v19, %v9231_v55  ;;  %v9498_v55 = vld [vmem:[#allocation58_spill] sm:$0xff] }
 0x21c   : > { %v2355_v63 = vand.u32 4294901760, %v8366_v34 }
 0x21d   : > { %v2363_v0 = vand.u32 4294901760, %v2362_v12  ;;  %v9500_v12 = vld [vmem:[#allocation64_spill] sm:$0xff] }
 0x21e   : > { %v2356_v36 = vsub.f32 %v8366_v34, %v2355_v63 }
 0x220   : > { %v2357_v9 = vand.u32 4294901760, %v2356_v36  ;;  %v9499_v36 = vld [vmem:[#allocation62_spill] sm:$0xff] }
 0x222   : > { %2358 = vmatprep.mubr.f32.mxu1 %v2357_v9  ;;  %v9501_v9 = vld [vmem:[#allocation67_spill] sm:$0xff] }
 0x223   : > { %2364 = vmatmul.mubr.f32.vlgmr.msra.gmra.mrb[16].mxu1 %v2363_v0  ;;  %v9502_v0 = vld [vmem:[#allocation70_spill] sm:$0xff] }
 0x224   : > { %5504 = vmatpush1.bf16.msra.mxu1 %v9492_v44  ;;  %2715 = vmatprep.mubr.f32.mxu1 %v8362_v4  ;;  %v9503_v44 = vld [vmem:[#allocation74_spill] sm:$0xff] }
 0x225   : > { %5506 = vmatprep.subr.bf16.mxu1 %v9493_v48  ;;  %v9504_v48 = vld [vmem:[#allocation76_spill] sm:$0xff] }
 0x228   : > { %5508 = vmatpush1.bf16.msra.mxu1 %v9494_v26  ;;  %v9505_v26 = vld [vmem:[#allocation79_spill] sm:$0xff] }
 0x229   : > { %5510 = vmatprep.subr.bf16.mxu1 %v9495_v57  ;;  %v9506_v57 = vld [vmem:[#allocation82_spill] sm:$0xff] }
 0x22c   : > { %5512 = vmatpush1.bf16.msra.mxu1 %v9496_v3  ;;  %v9507_v3 = vld [vmem:[#allocation86_spill] sm:$0xff] }
 0x22d   : > { %5514 = vmatprep.subr.bf16.mxu1 %v9497_v18  ;;  %v9508_v18 = vld [vmem:[#allocation88_spill] sm:$0xff] }
 0x230   : > { %5516 = vmatpush1.bf16.msra.mxu1 %v9498_v55  ;;  %v9509_v55 = vld [vmem:[#allocation91_spill] sm:$0xff] }
 0x231   : > { %5518 = vmatprep.subr.bf16.mxu1 %v9499_v36  ;;  %v9510_v36 = vld [vmem:[#allocation94_spill] sm:$0xff] }
 0x234   : > { %5520 = vmatpush1.bf16.msra.mxu1 %v9500_v12  ;;  %v9511_v12 = vld [vmem:[#allocation97_spill] sm:$0xff] }
 0x235   : > { %5522 = vmatprep.subr.bf16.mxu1 %v9501_v9  ;;  %v9512_v9 = vld [vmem:[#allocation98_spill] sm:$0xff] }
 0x238   : > { %5524 = vmatpush1.bf16.msra.mxu1 %v9502_v0  ;;  %v9513_v0 = vld [vmem:[#allocation100_spill] sm:$0xff] }
 0x239   : > { %5526 = vmatprep.subr.bf16.mxu1 %v9503_v44  ;;  %v9514_v44 = vld [vmem:[#allocation103_spill] sm:$0xff] }
 0x23c   : > { %5528 = vmatpush1.bf16.msra.mxu1 %v9504_v48  ;;  %v9520_v48 = vld [vmem:[#allocation9_spill] sm:$0xff] }
 0x23d   : > { %5530 = vmatprep.subr.bf16.mxu1 %v9505_v26  ;;  %v9521_v26 = vld [vmem:[#allocation10_spill] sm:$0xff] }
 0x240   : > { %5532 = vmatpush1.bf16.msra.mxu1 %v9506_v57  ;;  %v9522_v57 = vld [vmem:[#allocation11_spill] sm:$0xff] }
 0x241   : > { %5534 = vmatprep.subr.bf16.mxu1 %v9507_v3  ;;  %v9523_v3 = vld [vmem:[#allocation12_spill] sm:$0xff] }
 0x244   : > { %5536 = vmatpush1.bf16.msra.mxu1 %v9508_v18  ;;  %v9524_v18 = vld [vmem:[#allocation13_spill] sm:$0xff] }
 0x245   : > { %5538 = vmatprep.subr.bf16.mxu1 %v9509_v55  ;;  %v9525_v55 = vld [vmem:[#allocation14_spill] sm:$0xff] }
 0x248   : > { %5540 = vmatpush1.bf16.msra.mxu1 %v9510_v36  ;;  %v9528_v36 = vld [vmem:[#allocation19_spill] sm:$0xff] }
 0x249   : > { %5542 = vmatprep.subr.bf16.mxu1 %v9511_v12  ;;  %v9529_v12 = vld [vmem:[#allocation20_spill] sm:$0xff] }
 0x24c   : > { %5544 = vmatpush1.bf16.msra.mxu1 %v9512_v9  ;;  %v9530_v9 = vld [vmem:[#allocation21_spill] sm:$0xff] }
 0x24d   : > { %5546 = vmatprep.subr.bf16.mxu1 %v9513_v0  ;;  %v9531_v0 = vld [vmem:[#allocation22_spill] sm:$0xff] }
 0x250   : > { %5548 = vmatpush1.bf16.msra.mxu1 %v9514_v44  ;;  %v9532_v44 = vld [vmem:[#allocation23_spill] sm:$0xff] }
 0x251   : > { %5550 = vmatprep.subr.bf16.mxu1 %v8198_v42  ;;  %v9517_v42 = vld [vmem:[#allocation6_spill] sm:$0xff] }
 0x254   : > { %5552 = vmatpush1.bf16.msra.mxu1 %v8207_v24  ;;  %v9518_v24 = vld [vmem:[#allocation7_spill] sm:$0xff] }
 0x255   : > { %5554 = vmatprep.subr.bf16.mxu1 %v8221_v31  ;;  %v9515_v31 = vld [vmem:[#allocation4_spill] sm:$0xff] }
 0x258   : > { %5556 = vmatpush1.bf16.msra.mxu1 %v8228_v17  ;;  %v9519_v17 = vld [vmem:[#allocation8_spill] sm:$0xff] }
 0x259   : > { %5558 = vmatprep.subr.bf16.mxu1 %v8214_v14  ;;  %v9516_v14 = vld [vmem:[#allocation5_spill] sm:$0xff] }
 0x25b   : > { %2717 = vmatmul.mubr.f32.vlgmr.msra.gmra.mrb[16].mxu1 %v8356_v28 }
 0x25c   : > { %5560 = vmatpush1.bf16.msra.mxu1 %v8219_v22  ;;  %2901 = vmatprep.mubr.f32.mxu1 %v8366_v34  ;;  %v9526_v34 = vld [vmem:[#allocation15_spill] sm:$0xff] }
 0x25d   : > { %5562 = vmatprep.subr.bf16.mxu1 %v8226_v16 }
 0x260   : > { %5564 = vmatpush1.bf16.msra.mxu1 %v8232_v47 }
 0x261   : > { %5566 = vmatprep.subr.bf16.mxu1 %v8238_v54 }
 0x264   : > { %5568 = vmatpush1.bf16.msra.mxu1 %v8243_v33 }
 0x265   : > { %5570 = vmatprep.subr.bf16.mxu1 %v8247_v51 }
 0x268   : > { %5572 = vmatpush1.bf16.msra.mxu1 %v8251_v30 }
 0x269   : > { %5574 = vmatprep.subr.bf16.mxu1 %v8255_v15 }
 0x26c   : > { %5576 = vmatpush1.bf16.msra.mxu1 %v8259_v10 }
 0x26d   : > { %5578 = vmatprep.subr.bf16.mxu1 %v8263_v56  ;;  %v9548_v56 = vand.u32 4294901760, %v7672_v52  ;;  %v9553_v52 = vand.u32 4294901760, %v7717_v40  ;;  %v9562_v40 = vand.u32 4294901760, %v7761_v38  ;;  %v9576_v38 = vld [vmem:[#allocation56_spill] sm:$0xff] }
 0x270   : > { %5580 = vmatpush1.bf16.msra.mxu1 %v8267_v39  ;;  %v9547_v39 = vand.u32 4294901760, %v7667_v6  ;;  %v9552_v6 = vand.u32 4294901760, %v7704_v45  ;;  %v9563_v45 = vld [vmem:[#allocation48_spill] sm:$0xff] }
 0x271   : > { %5582 = vmatprep.subr.bf16.mxu1 %v8271_v58 }
 0x272   : > { %v8481_v10 = vpack.c.bf16 %v9548_v56, %v9547_v39  ;;  %v8498_v56 = vpack.c.bf16 %v9553_v52, %v9552_v6  ;;  %v9554_v39 = vand.u32 4294901760, %v7723_v61  ;;  %v9566_v61 = vld [vmem:[#allocation49_spill] sm:$0xff]  ;;  %v9568_v6 = vld [vmem:[#allocation51_spill] sm:$0xff] }
 0x273   : > { %v9569_v52 = vand.u32 4294901760, %v9568_v6  ;;  %v9583_v6 = vld [vmem:[#allocation60_spill] sm:$0xff] }
 0x274   : > { %5584 = vmatpush1.bf16.msra.mxu1 %v8275_v11  ;;  %v9546_v11 = vand.u32 4294901760, %v9459_v21 }
 0x275   : > { %5586 = vmatprep.subr.bf16.mxu1 %v8279_v43  ;;  %v9545_v43 = vand.u32 4294901760, %v9458_v8 }
 0x277   : > { %v8474_v58 = vpack.c.bf16 %v9546_v11, %v9545_v43  ;;  %v9551_v11 = vand.u32 4294901760, %v9460_v7  ;;  %v9559_v7 = vld [vmem:[#allocation47_spill] sm:$0xff] }
 0x278   : > { %5588 = vmatpush1.bf16.msra.mxu1 %v8283_v37  ;;  %v9544_v37 = vld [vmem:[#allocation41_spill] sm:$0xff]  ;;  %v9560_v21 = vand.u32 4294901760, %v9559_v7 }
 0x279   : > { %5590 = vmatprep.subr.bf16.mxu1 %v8287_v46 }
 0x27c   : > { %5592 = vmatpush1.bf16.msra.mxu1 %v8291_v59  ;;  %v9543_v59 = vand.u32 4294901760, %v9457_v5 }
 0x27d   : > { %5594 = vmatprep.subr.bf16.mxu1 %v8297_v27  ;;  %v9542_v27 = vand.u32 4294901760, %v9456_v41  ;;  %v9549_v41 = vand.u32 4294901760, %v8359_v19 }
 0x27f   : > { %v8467_v46 = vpack.c.bf16 %v9543_v59, %v9542_v27  ;;  %v9550_v59 = vand.u32 4294901760, %v7683_v23  ;;  %v9555_v27 = vld [vmem:[#allocation44_spill] sm:$0xff]  ;;  %v9558_v23 = vand.u32 4294901760, %v7741_v13  ;;  %v9571_v13 = vld [vmem:[#allocation53_spill] sm:$0xff] }
 0x280   : > { %5596 = vmatpush1.bf16.msra.mxu1 %v8306_v35  ;;  %v9541_v35 = vld [vmem:[#allocation38_spill] sm:$0xff]  ;;  %v9556_v8 = vand.u32 4294901760, %v9555_v27  ;;  %v9572_v27 = vand.u32 4294901760, %v9571_v13  ;;  %v9586_v13 = vld [vmem:[#allocation61_spill] sm:$0xff] }
 0x281   : > { %5598 = vmatprep.subr.bf16.mxu1 %v8311_v32  ;;  %v9540_v32 = vld [vmem:[#allocation35_spill] sm:$0xff]  ;;  %v8491_v43 = vpack.c.bf16 %v9551_v11, %v9550_v59  ;;  %v9567_v11 = vand.u32 4294901760, %v9566_v61 }
 0x282   : > { %v8505_v5 = vpack.c.bf16 %v9556_v8, %v9554_v39  ;;  %v9573_v8 = vld [vmem:[#allocation54_spill] sm:$0xff]  ;;  %v9581_v61 = vld [vmem:[#allocation59_spill] sm:$0xff] }
 0x283   : > { %v8526_v39 = vpack.c.bf16 %v9569_v52, %v9567_v11  ;;  %v9582_v11 = vand.u32 4294901760, %v9581_v61  ;;  %v9584_v52 = vand.u32 4294901760, %v9583_v6  ;;  %v9596_v61 = vld [vmem:[#allocation68_spill] sm:$0xff]  ;;  %v9598_v6 = vld [vmem:[#allocation69_spill] sm:$0xff] }
 0x284   : > { %5600 = vmatpush1.bf16.msra.mxu1 %v8316_v25  ;;  %v9539_v25 = vld [vmem:[#allocation33_spill] sm:$0xff]  ;;  %9557 = vst [vmem:[#allocation43_spill] sm:$0xff] %v8505_v5 }
 0x285   : > { %5602 = vmatprep.subr.bf16.mxu1 %v8322_v50  ;;  %v9538_v50 = vld [vmem:[#allocation29_spill] sm:$0xff]  ;;  %9570 = vst [vmem:[#allocation50_spill] sm:$0xff] %v8526_v39 }
 0x288   : > { %5604 = vmatpush1.bf16.msra.mxu1 %v8330_v20  ;;  %v9537_v20 = vld [vmem:[#allocation28_spill] sm:$0xff] }
 0x289   : > { %5606 = vmatprep.subr.bf16.mxu1 %v8342_v49  ;;  %v9536_v49 = vld [vmem:[#allocation27_spill] sm:$0xff] }
 0x28c   : > { %5608 = vmatpush1.bf16.msra.mxu1 %v8346_v62  ;;  %v9535_v62 = vld [vmem:[#allocation26_spill] sm:$0xff] }
 0x28d   : > { %5610 = vmatprep.subr.bf16.mxu1 %v8350_v29  ;;  %v9534_v29 = vld [vmem:[#allocation25_spill] sm:$0xff] }
 0x290   : > { %5612 = vmatpush1.bf16.msra.mxu1 %v8354_v1  ;;  %v9533_v1 = vld [vmem:[#allocation24_spill] sm:$0xff] }
 0x291   : > { %5614 = vmatprep.subr.bf16.mxu1 %v9515_v31 }
 0x293   : > { %2904 = vmatmul.mubr.f32.vlgmr.msra.gmra.mrb[16].mxu1 %v8359_v19  ;;  %v8512_v19 = vpack.c.bf16 %v9560_v21, %v9558_v23  ;;  %v9574_v23 = vand.u32 4294901760, %v9573_v8  ;;  %v9577_v21 = vand.u32 4294901760, %v9576_v38  ;;  %v9588_v8 = vld [vmem:[#allocation63_spill] sm:$0xff]  ;;  %v9591_v38 = vld [vmem:[#allocation65_spill] sm:$0xff] }
 0x294   : > { %5616 = vmatpush1.bf16.msra.mxu1 %v9516_v14  ;;  %3033 = vmatprep.mubr.f32.mxu1 %v2355_v63  ;;  %v9527_v63 = vld [vmem:[#allocation18_spill] sm:$0xff] }
 0x295   : > { %5618 = vmatprep.subr.bf16.mxu1 %v9517_v42  ;;  %9561 = vst [vmem:[#allocation45_spill] sm:$0xff] %v8512_v19  ;;  %v8533_v7 = vpack.c.bf16 %v9574_v23, %v9572_v27  ;;  %v9587_v27 = vand.u32 4294901760, %v9586_v13  ;;  %v9589_v23 = vand.u32 4294901760, %v9588_v8  ;;  %v9601_v13 = vld [vmem:[#allocation71_spill] sm:$0xff]  ;;  %v9603_v8 = vld [vmem:[#allocation72_spill] sm:$0xff] }
 0x297   : > { %9575 = vst [vmem:[#allocation52_spill] sm:$0xff] %v8533_v7 }
 0x298   : > { %5620 = vmatpush1.bf16.msra.mxu1 %v9518_v24 }
 0x299   : > { %5622 = vmatprep.subr.bf16.mxu1 %v9519_v17 }
 0x29c   : > { %5624 = vmatpush1.bf16.msra.mxu1 %v9520_v48 }
 0x29d   : > { %5626 = vmatprep.subr.bf16.mxu1 %v9521_v26 }
 0x2a0   : > { %5628 = vmatpush1.bf16.msra.mxu1 %v9522_v57 }
 0x2a1   : > { %5630 = vmatprep.subr.bf16.mxu1 %v9523_v3 }
 0x2a4   : > { %5632 = vmatpush1.bf16.msra.mxu1 %v9524_v18 }
 0x2a5   : > { %5634 = vmatprep.subr.bf16.mxu1 %v9525_v55 }
 0x2a8   : > { %5636 = vmatpush1.bf16.msra.mxu1 %v9526_v34 }
 0x2a9   : > { %5638 = vmatprep.subr.bf16.mxu1 %v9527_v63 }
 0x2ac   : > { %5640 = vmatpush1.bf16.msra.mxu1 %v9528_v36 }
 0x2ad   : > { %5642 = vmatprep.subr.bf16.mxu1 %v9529_v12 }
 0x2b0   : > { %5644 = vmatpush1.bf16.msra.mxu1 %v9530_v9 }
 0x2b1   : > { %5646 = vmatprep.subr.bf16.mxu1 %v9531_v0 }
 0x2b4   : > { %5648 = vmatpush1.bf16.msra.mxu1 %v9532_v44 }
 0x2b5   : > { %5650 = vmatprep.subr.bf16.mxu1 %v9533_v1 }
 0x2b8   : > { %5652 = vmatpush1.bf16.msra.mxu1 %v9534_v29 }
 0x2b9   : > { %5654 = vmatprep.subr.bf16.mxu1 %v9535_v62 }
 0x2bc   : > { %5656 = vmatpush1.bf16.msra.mxu1 %v9536_v49 }
 0x2bd   : > { %5658 = vmatprep.subr.bf16.mxu1 %v9537_v20 }
 0x2c0   : > { %5660 = vmatpush1.bf16.msra.mxu1 %v9538_v50 }
 0x2c1   : > { %5662 = vmatprep.subr.bf16.mxu1 %v9539_v25 }
 0x2c4   : > { %5664 = vmatpush1.bf16.msra.mxu1 %v9540_v32 }
 0x2c5   : > { %5666 = vmatprep.subr.bf16.mxu1 %v9541_v35 }
 0x2c8   : > { %5668 = vmatpush1.bf16.msra.mxu1 %v9544_v37 }
 0x2c9   : > { %5670 = vmatprep.subr.bf16.mxu1 %v8467_v46 }
 0x2cb   : > { %3037 = vmatmul.mubr.f32.vlgmr.msra.gmra.mrb[16].mxu1 %v9549_v41  ;;  %v9564_v41 = vand.u32 4294901760, %v9563_v45 }
 0x2cc   : > { %5672 = vmatpush1.bf16.msra.mxu1 %v8474_v58  ;;  %3276 = vmatprep.mubr.f32.mxu1 %v8362_v4 }
 0x2cd   : > { %5674 = vmatprep.subr.bf16.mxu1 %v8481_v10  ;;  %v8519_v59 = vpack.c.bf16 %v9564_v41, %v9562_v40  ;;  %v9578_v40 = vld [vmem:[#allocation57_spill] sm:$0xff] }
 0x2ce   : > { %v9579_v45 = vand.u32 4294901760, %v9578_v40  ;;  %v9593_v40 = vld [vmem:[#allocation66_spill] sm:$0xff] }
 0x2cf   : > { %9565 = vst [vmem:[#allocation46_spill] sm:$0xff] %v8519_v59 }
 0x2d0   : > { %5676 = vmatpush1.bf16.msra.mxu1 %v8491_v43  ;;  %v8540_v41 = vpack.c.bf16 %v9579_v45, %v9577_v21  ;;  %v9592_v21 = vand.u32 4294901760, %v9591_v38  ;;  %v9594_v45 = vand.u32 4294901760, %v9593_v40  ;;  %v9606_v38 = vld [vmem:[#allocation73_spill] sm:$0xff]  ;;  %v9608_v40 = vld [vmem:[#allocation75_spill] sm:$0xff] }
 0x2d1   : > { %5678 = vmatprep.subr.bf16.mxu1 %v8498_v56 }
 0x2d2   : > { %9580 = vst [vmem:[#allocation55_spill] sm:$0xff] %v8540_v41 }
 0x2d4   : > { %5680 = vmatpush1.bf16.msra.mxu1 %v8505_v5 }
 0x2d5   : > { %5682 = vmatprep.subr.bf16.mxu1 %v8512_v19 }
 0x2d8   : > { %5684 = vmatpush1.bf16.msra.mxu1 %v8519_v59  ;;  %v8547_v59 = vpack.c.bf16 %v9584_v52, %v9582_v11  ;;  %v9597_v11 = vand.u32 4294901760, %v9596_v61  ;;  %v9599_v52 = vand.u32 4294901760, %v9598_v6  ;;  %v9611_v61 = vld [vmem:[#allocation77_spill] sm:$0xff]  ;;  %v9613_v6 = vld [vmem:[#allocation78_spill] sm:$0xff] }
 0x2d9   : > { %5686 = vmatprep.subr.bf16.mxu1 %v8526_v39  ;;  %v8554_v39 = vpack.c.bf16 %v9589_v23, %v9587_v27  ;;  %v9602_v27 = vand.u32 4294901760, %v9601_v13  ;;  %v9604_v23 = vand.u32 4294901760, %v9603_v8  ;;  %v9616_v13 = vld [vmem:[#allocation80_spill] sm:$0xff]  ;;  %v9618_v8 = vld [vmem:[#allocation81_spill] sm:$0xff] }
 0x2da   : > { %9585 = vst [vmem:[#allocation58_spill] sm:$0xff] %v8547_v59 }
 0x2db   : > { %9590 = vst [vmem:[#allocation62_spill] sm:$0xff] %v8554_v39 }
 0x2dc   : > { %5688 = vmatpush1.bf16.msra.mxu1 %v8533_v7  ;;  %v8561_v7 = vpack.c.bf16 %v9594_v45, %v9592_v21  ;;  %v9607_v21 = vand.u32 4294901760, %v9606_v38  ;;  %v9609_v45 = vand.u32 4294901760, %v9608_v40  ;;  %v9621_v38 = vld [vmem:[#allocation83_spill] sm:$0xff]  ;;  %v9623_v40 = vld [vmem:[#allocation84_spill] sm:$0xff] }
 0x2dd   : > { %5690 = vmatprep.subr.bf16.mxu1 %v8540_v41  ;;  %v8568_v41 = vpack.c.bf16 %v9599_v52, %v9597_v11  ;;  %v9612_v11 = vand.u32 4294901760, %v9611_v61  ;;  %v9614_v52 = vand.u32 4294901760, %v9613_v6  ;;  %v9626_v61 = vld [vmem:[#allocation85_spill] sm:$0xff]  ;;  %v9628_v6 = vld [vmem:[#allocation87_spill] sm:$0xff] }
 0x2de   : > { %9595 = vst [vmem:[#allocation64_spill] sm:$0xff] %v8561_v7 }
 0x2df   : > { %9600 = vst [vmem:[#allocation67_spill] sm:$0xff] %v8568_v41 }
 0x2e0   : > { %5692 = vmatpush1.bf16.msra.mxu1 %v8547_v59  ;;  %v8575_v59 = vpack.c.bf16 %v9604_v23, %v9602_v27  ;;  %v9617_v27 = vand.u32 4294901760, %v9616_v13  ;;  %v9619_v23 = vand.u32 4294901760, %v9618_v8  ;;  %v9631_v13 = vld [vmem:[#allocation89_spill] sm:$0xff]  ;;  %v9633_v8 = vld [vmem:[#allocation90_spill] sm:$0xff] }
 0x2e1   : > { %5694 = vmatprep.subr.bf16.mxu1 %v8554_v39  ;;  %v8582_v39 = vpack.c.bf16 %v9609_v45, %v9607_v21  ;;  %v9622_v21 = vand.u32 4294901760, %v9621_v38  ;;  %v9624_v45 = vand.u32 4294901760, %v9623_v40  ;;  %v9636_v38 = vld [vmem:[#allocation92_spill] sm:$0xff]  ;;  %v9638_v40 = vld [vmem:[#allocation93_spill] sm:$0xff] }
 0x2e2   : > { %9605 = vst [vmem:[#allocation70_spill] sm:$0xff] %v8575_v59 }
 0x2e3   : > { %9610 = vst [vmem:[#allocation74_spill] sm:$0xff] %v8582_v39 }
 0x2e4   : > { %5696 = vmatpush1.bf16.msra.mxu1 %v8561_v7  ;;  %v8589_v7 = vpack.c.bf16 %v9614_v52, %v9612_v11  ;;  %v9627_v11 = vand.u32 4294901760, %v9626_v61  ;;  %v9629_v52 = vand.u32 4294901760, %v9628_v6  ;;  %v9641_v61 = vld [vmem:[#allocation95_spill] sm:$0xff]  ;;  %v9643_v6 = vld [vmem:[#allocation96_spill] sm:$0xff] }
 0x2e5   : > { %5698 = vmatprep.subr.bf16.mxu1 %v8568_v41  ;;  %v8596_v41 = vpack.c.bf16 %v9619_v23, %v9617_v27  ;;  %v9632_v27 = vand.u32 4294901760, %v9631_v13  ;;  %v9634_v23 = vand.u32 4294901760, %v9633_v8  ;;  %v9646_v13 = vld [vmem:[#allocation30_spill] sm:$0xff]  ;;  %v9648_v8 = vld [vmem:[#allocation31_spill] sm:$0xff] }
 0x2e6   : > { %9615 = vst [vmem:[#allocation76_spill] sm:$0xff] %v8589_v7 }
 0x2e7   : > { %9620 = vst [vmem:[#allocation79_spill] sm:$0xff] %v8596_v41 }
 0x2e8   : > { %5700 = vmatpush1.bf16.msra.mxu1 %v8575_v59  ;;  %v8603_v59 = vpack.c.bf16 %v9624_v45, %v9622_v21  ;;  %v9637_v21 = vand.u32 4294901760, %v9636_v38  ;;  %v9639_v45 = vand.u32 4294901760, %v9638_v40  ;;  %v9651_v38 = vand.u32 4294901760, %v9485_v60 }
 0x2e9   : > { %5702 = vmatprep.subr.bf16.mxu1 %v8582_v39  ;;  %v8610_v39 = vpack.c.bf16 %v9629_v52, %v9627_v11  ;;  %v9642_v11 = vand.u32 4294901760, %v9641_v61  ;;  %v9644_v52 = vand.u32 4294901760, %v9643_v6  ;;  %v9655_v61 = vld [vmem:[#allocation101_spill] sm:$0xff]  ;;  %v9657_v6 = vld [vmem:[#allocation102_spill] sm:$0xff]  ;;  %v9663_v60 = vmov 0  }
 0x2ea   : > { %9625 = vst [vmem:[#allocation82_spill] sm:$0xff] %v8603_v59 }
 0x2eb   : > { %9630 = vst [vmem:[#allocation86_spill] sm:$0xff] %v8610_v39 }
 0x2ec   : > { %5704 = vmatpush1.bf16.msra.mxu1 %v8589_v7  ;;  %v8617_v7 = vpack.c.bf16 %v9634_v23, %v9632_v27  ;;  %v9647_v27 = vand.u32 4294901760, %v9646_v13  ;;  %v9649_v23 = vand.u32 4294901760, %v9648_v8  ;;  %v9660_v13 = vand.u32 4294901760, %v8181_v53 }
 0x2ed   : > { %5706 = vmatprep.subr.bf16.mxu1 %v8596_v41  ;;  %v8624_v41 = vpack.c.bf16 %v9639_v45, %v9637_v21  ;;  %v9652_v21 = vld [vmem:[#allocation32_spill] sm:$0xff] }
 0x2ee   : > { %9635 = vst [vmem:[#allocation88_spill] sm:$0xff] %v8617_v7  ;;  %v9653_v40 = vand.u32 4294901760, %v9652_v21 }
 0x2ef   : > { %9640 = vst [vmem:[#allocation91_spill] sm:$0xff] %v8624_v41 }
 0x2f0   : > { %5708 = vmatpush1.bf16.msra.mxu1 %v8603_v59  ;;  %v8631_v59 = vpack.c.bf16 %v9644_v52, %v9642_v11  ;;  %v8645_v45 = vpack.c.bf16 %v9653_v40, %v9651_v38  ;;  %v9656_v11 = vand.u32 4294901760, %v9655_v61  ;;  %v9658_v52 = vand.u32 4294901760, %v9657_v6  ;;  %v9665_v38 = vld [vmem:[#allocation115_spill] sm:$0xff]  ;;  %v9667_v40 = vld [vmem:[#allocation116_spill] sm:$0xff] }
 0x2f1   : > { %5710 = vmatprep.subr.bf16.mxu1 %v8610_v39  ;;  %v8638_v39 = vpack.c.bf16 %v9649_v23, %v9647_v27  ;;  %v9661_v27 = vand.u32 4294901760, %v8191_v2  ;;  %v9664_v2 = vld [vmem:[#allocation109_spill] sm:$0xff] }
 0x2f2   : > { %9645 = vst [vmem:[#allocation94_spill] sm:$0xff] %v8631_v59  ;;  %9654 = vst [vmem:[#allocation98_spill] sm:$0xff] %v8645_v45 }
 0x2f3   : > { %9650 = vst [vmem:[#allocation97_spill] sm:$0xff] %v8638_v39  ;;  %v8659_v8 = vpack.c.bf16 %v9661_v27, %v9660_v13 }
 0x2f4   : > { %5712 = vmatpush1.bf16.msra.mxu1 %v8617_v7 }
 0x2f5   : > { %5714 = vmatprep.subr.bf16.mxu1 %v8624_v41  ;;  %v8652_v41 = vpack.c.bf16 %v9658_v52, %v9656_v11  ;;  %9662 = vst [vmem:[#allocation103_spill] sm:$0xff] %v8659_v8  ;;  %v9669_v11 = vld [vmem:[#allocation113_spill] sm:$0xff]  ;;  %v9671_v52 = vld [vmem:[#allocation118_spill] sm:$0xff] }
 0x2f7   : > { %9659 = vst [vmem:[#allocation100_spill] sm:$0xff] %v8652_v41 }
 0x2f8   : > { %5716 = vmatpush1.bf16.msra.mxu1 %v8631_v59 }
 0x2f9   : > { %5718 = vmatprep.subr.bf16.mxu1 %v8638_v39 }
 0x2fc   : > { %5720 = vmatpush1.bf16.msra.mxu1 %v8645_v45 }
 0x2fd   : > { %5722 = vmatprep.subr.bf16.mxu1 %v8652_v41 }
 0x300   : > { %5724 = vmatpush1.bf16.msra.mxu1 %v8659_v8 }
 0x301   : > { %5726 = vmatprep.subr.bf16.mxu1 %v9515_v31 }
 0x303   : > { %3278 = vmatmul.mubr.f32.vlgmr.msra.gmra.mrb[16].mxu1 %v8356_v28 }
 0x304   : > { %5728 = vmatpush1.bf16.msra.mxu1 %v9516_v14  ;;  %3405 = vmatprep.mubr.f32.mxu1 %v8362_v4 }
 0x305   : > { %5730 = vmatprep.subr.bf16.mxu1 %v9517_v42 }
 0x308   : > { %5732 = vmatpush1.bf16.msra.mxu1 %v9518_v24 }
 0x309   : > { %5734 = vmatprep.subr.bf16.mxu1 %v9519_v17 }
 0x30c   : > { %5736 = vmatpush1.bf16.msra.mxu1 %v9520_v48 }
 0x30d   : > { %5738 = vmatprep.subr.bf16.mxu1 %v9521_v26 }
 0x310   : > { %5740 = vmatpush1.bf16.msra.mxu1 %v9522_v57 }
 0x311   : > { %5742 = vmatprep.subr.bf16.mxu1 %v9523_v3 }
 0x314   : > { %5744 = vmatpush1.bf16.msra.mxu1 %v9524_v18 }
 0x315   : > { %5746 = vmatprep.subr.bf16.mxu1 %v9525_v55 }
 0x318   : > { %5748 = vmatpush1.bf16.msra.mxu1 %v9526_v34 }
 0x319   : > { %5750 = vmatprep.subr.bf16.mxu1 %v9527_v63 }
 0x31c   : > { %5752 = vmatpush1.bf16.msra.mxu1 %v9528_v36 }
 0x31d   : > { %5754 = vmatprep.subr.bf16.mxu1 %v9529_v12 }
 0x320   : > { %5756 = vmatpush1.bf16.msra.mxu1 %v9530_v9 }
 0x321   : > { %5758 = vmatprep.subr.bf16.mxu1 %v9531_v0 }
 0x324   : > { %5760 = vmatpush1.bf16.msra.mxu1 %v9532_v44 }
 0x325   : > { %5762 = vmatprep.subr.bf16.mxu1 %v9533_v1 }
 0x328   : > { %5764 = vmatpush1.bf16.msra.mxu1 %v9534_v29 }
 0x329   : > { %5766 = vmatprep.subr.bf16.mxu1 %v9535_v62 }
 0x32c   : > { %5768 = vmatpush1.bf16.msra.mxu1 %v9536_v49 }
 0x32d   : > { %5770 = vmatprep.subr.bf16.mxu1 %v9537_v20 }
 0x330   : > { %5772 = vmatpush1.bf16.msra.mxu1 %v9538_v50 }
 0x331   : > { %5774 = vmatprep.subr.bf16.mxu1 %v9539_v25 }
 0x334   : > { %5776 = vmatpush1.bf16.msra.mxu1 %v9540_v32 }
 0x335   : > { %5778 = vmatprep.subr.bf16.mxu1 %v9541_v35 }
 0x338   : > { %5780 = vmatpush1.bf16.msra.mxu1 %v9544_v37 }
 0x339   : > { %5782 = vmatprep.subr.bf16.mxu1 %v9515_v31 }
 0x33b   : > { %3407 = vmatmul.mubr.f32.vlgmr.msra.gmra.mrb[16].mxu1 %v8356_v28 }
 0x33c   : > { %5784 = vmatpush1.bf16.msra.mxu1 %v9516_v14 }
 0x33d   : > { %5786 = vmatprep.subr.bf16.mxu1 %v9517_v42 }
 0x340   : > { %5788 = vmatpush1.bf16.msra.mxu1 %v9518_v24 }
 0x341   : > { %5790 = vmatprep.subr.bf16.mxu1 %v9519_v17 }
 0x344   : > { %5792 = vmatpush1.bf16.msra.mxu1 %v9520_v48 }
 0x345   : > { %5794 = vmatprep.subr.bf16.mxu1 %v9521_v26 }
 0x348   : > { %5796 = vmatpush1.bf16.msra.mxu1 %v9522_v57 }
 0x349   : > { %5798 = vmatprep.subr.bf16.mxu1 %v9523_v3 }
 0x34c   : > { %5800 = vmatpush1.bf16.msra.mxu1 %v9524_v18 }
 0x34d   : > { %5802 = vmatprep.subr.bf16.mxu1 %v9525_v55 }
 0x350   : > { %5804 = vmatpush1.bf16.msra.mxu1 %v9526_v34 }
 0x351   : > { %5806 = vmatprep.subr.bf16.mxu1 %v9527_v63 }
 0x354   : > { %5808 = vmatpush1.bf16.msra.mxu1 %v9528_v36 }
 0x355   : > { %5810 = vmatprep.subr.bf16.mxu1 %v9529_v12 }
 0x358   : > { %5812 = vmatpush1.bf16.msra.mxu1 %v9530_v9 }
 0x359   : > { %5814 = vmatprep.subr.bf16.mxu1 %v9531_v0 }
 0x35c   : > { %5816 = vmatpush1.bf16.msra.mxu1 %v9532_v44 }
 0x35d   : > { %5818 = vmatprep.subr.bf16.mxu1 %v9533_v1 }
 0x360   : > { %5820 = vmatpush1.bf16.msra.mxu1 %v9534_v29 }
 0x361   : > { %5822 = vmatprep.subr.bf16.mxu1 %v9535_v62 }
 0x364   : > { %5824 = vmatpush1.bf16.msra.mxu1 %v9536_v49 }
 0x365   : > { %5826 = vmatprep.subr.bf16.mxu1 %v9537_v20 }
 0x368   : > { %5828 = vmatpush1.bf16.msra.mxu1 %v9538_v50 }
 0x369   : > { %5830 = vmatprep.subr.bf16.mxu1 %v9539_v25 }
 0x36c   : > { %5832 = vmatpush1.bf16.msra.mxu1 %v9540_v32 }
 0x36d   : > { %5834 = vmatprep.subr.bf16.mxu1 %v9541_v35 }
 0x370   : > { %5836 = vmatpush1.bf16.msra.mxu1 %v9544_v37 }
 0x371   : > { %4798 = vmatprep.subr.bf16.mxu1 %v9663_v60 }
 0x40e   : > { %v3408_v4 = vpop.f32.mrb[16].mxu1 }
 0x40f   : > { %v3416_v53 = vrot.slane %v3408_v4, %v9664_v2  ;;  %v3410_v28 = vpop.f32.mrb[17].mxu1 }
 0x410   : > { %v3420_v23 = vrot.slane %v3410_v28, %v9664_v2 }
 0x411   : > { %v8726_v21 = vsub.f32 %v9665_v38, %v3416_v53  ;;  %v8729_v61 = vsub.f32 %v9667_v40, %v3416_v53 }
 0x412   : > { %v8732_v6 = vsub.f32 %v9669_v11, %v3420_v23  ;;  %v8735_v13 = vsub.f32 %v9671_v52, %v3420_v23 }
 0x413   : > { %9666 = vst [vmem:[#allocation4_spill] sm:$0xff] %v8726_v21  ;;  %9668 = vst [vmem:[#allocation5_spill] sm:$0xff] %v8729_v61  ;;  %v3425_v27 = vmul.f32 %v8726_v21, %v8726_v21  ;;  %v3427_v4 = vmul.f32 %v8729_v61, %v8729_v61 }
 0x414   : > { %9670 = vst [vmem:[#allocation6_spill] sm:$0xff] %v8732_v6  ;;  %v3426_v28 = vmul.f32 %v8732_v6, %v8732_v6  ;;  %v3428_v38 = vmul.f32 %v8735_v13, %v8735_v13 }
 0x415   : > { %v3429_v53 = vadd.f32 %v3427_v4, %v3425_v27 }
 0x416   : > { %v3436_v40 = vsel %vm2164_vm1, %v3426_v28, 0.0  ;;  %v3437_v11 = vsel %vm2164_vm1, %v3428_v38, 0.0  ;;  %v9684_v38 = vld [vmem:[#allocation112_spill] sm:$0xff] }
 0x417   : > { %v3430_v2 = vrot.slane %v3429_v53, 4  ;;  %v3438_v23 = vadd.f32 %v3437_v11, %v3436_v40  ;;  %v9686_v40 = vld [vmem:[#allocation117_spill] sm:$0xff]  ;;  %v9687_v11 = vld [vmem:[#allocation119_spill] sm:$0xff] }
 0x419   : > { %v3431_v52 = vadd.f32 %v3430_v2, %v3429_v53  ;;  %v3439_v8 = vrot.slane %v3438_v23, 4  ;;  %v9685_v53 = vld [vmem:[#allocation114_spill] sm:$0xff] }
 0x41b   : > { %v3432_v41 = vrot.slane %v3431_v52, 2  ;;  %v3440_v21 = vadd.f32 %v3439_v8, %v3438_v23  ;;  %v9674_v8 = vld [vmem:[#allocation37_spill] sm:$0xff]  ;;  %v9688_v23 = vld [vmem:[#allocation99_spill] sm:$0xff] }
 0x41d   : > { %v3433_v45 = vadd.f32 %v3432_v41, %v3431_v52  ;;  %v3441_v39 = vrot.slane %v3440_v21, 2  ;;  %v9689_v52 = vld [vmem:[#allocation120_spill] sm:$0xff] }
 0x41f   : > { %v3442_v61 = vadd.f32 %v3441_v39, %v3440_v21  ;;  %v3434_v59 = vrot.slane %v3433_v45, 1  ;;  %v9677_v21 = vld [vmem:[#allocation42_spill] sm:$0xff] }
 0x421   : > { %v3443_v7 = vrot.slane %v3442_v61, 1  ;;  %v3435_v6 = vadd.f32 %v3434_v59, %v3433_v45 }
 0x423   : > { %v3444_v19 = vadd.f32 %v3443_v7, %v3442_v61  ;;  %v8747_v5 = vand.u32 4294901760, %v3435_v6  ;;  %v9678_v61 = vld [vmem:[#allocation104_spill] sm:$0xff] }
 0x425   : > { %v3446_v27 = vsel %vm2164_vm1, %v3444_v19, 0  ;;  %v8751_v4 = vsub.f32 %v3435_v6, %v8747_v5  ;;  %v9683_v6 = vld [vmem:[#allocation111_spill] sm:$0xff] }
 0x426   : > { %v8753_v28 = vand.u32 4294901760, %v3446_v27 }
 0x427   : > { %v3576_v2 = vand.u32 4294901760, %v8751_v4 }
 0x428   : > { %3930 = vmatprep.mubr.f32.mxu0 %v8753_v28  ;;  %v3569_v41 = vsub.f32 %v3446_v27, %v8753_v28  ;;  %v9690_v27 = vld [vmem:[#allocation121_spill] sm:$0xff] }
 0x429   : > { %3932 = vmatmul.mubr.f32.vlgmr.msra.gmra.mrb[12].mxu0 %v8747_v5  ;;  %v3577_v19 = vsub.f32 %v8751_v4, %v3576_v2 }
 0x42a   : > { %5896 = vmatpush1.bf16.msra.mxu0 %v8219_v22  ;;  %4116 = vmatprep.mubr.f32.mxu0 %v3569_v41  ;;  %v3570_v59 = vand.u32 4294901760, %v3569_v41  ;;  %v9672_v22 = vld [vmem:[#allocation34_spill] sm:$0xff] }
 0x42b   : > { %5898 = vmatprep.subr.bf16.mxu0 %v8226_v16  ;;  %v3578_v45 = vand.u32 4294901760, %v3577_v19  ;;  %v9673_v16 = vld [vmem:[#allocation36_spill] sm:$0xff] }
 0x42c   : > { %v3571_v39 = vsub.f32 %v3569_v41, %v3570_v59  ;;  %v6390_v41 = vld [vmem:[%s8976_s9] sm:$0xff]   ;;  %v6392_v19 = vld [vmem:[%s8976_s9 + $0x10] sm:$0xff]  }
 0x42e   : > { %5900 = vmatpush1.bf16.msra.mxu0 %v8232_v47  ;;  %v3572_v7 = vand.u32 4294901760, %v3571_v39  ;;  %v9675_v47 = vld [vmem:[#allocation39_spill] sm:$0xff]  ;;  %v6393_v39 = vld [vmem:[%s8976_s9 + $0x18] sm:$0xff]  }
 0x42f   : > { %5902 = vmatprep.subr.bf16.mxu0 %v8238_v54  ;;  %v9676_v54 = vld [vmem:[#allocation40_spill] sm:$0xff] }
 0x430   : > { %3573 = vmatprep.mubr.f32.mxu1 %v3572_v7  ;;  %v6394_v7 = vld [vmem:[%s8976_s9 + $0x20] sm:$0xff]  }
 0x431   : > { %3579 = vmatmul.mubr.f32.vlgmr.msra.gmra.mrb[18].mxu1 %v3578_v45  ;;  %v9695_v45 = vld [vmem:[#allocation52_spill] sm:$0xff] }
 0x432   : > { %5904 = vmatpush1.bf16.msra.mxu0 %v8243_v33  ;;  %v9679_v33 = vld [vmem:[#allocation105_spill] sm:$0xff]  ;;  %4799 = vmatpush1.bf16.msra.mxu1 %v6390_v41 }
 0x433   : > { %5906 = vmatprep.subr.bf16.mxu0 %v8247_v51  ;;  %v9680_v51 = vld [vmem:[#allocation106_spill] sm:$0xff]  ;;  %4800 = vmatprep.subr.bf16.mxu1 %v9663_v60 }
 0x436   : > { %5908 = vmatpush1.bf16.msra.mxu0 %v8251_v30  ;;  %v9681_v30 = vld [vmem:[#allocation108_spill] sm:$0xff] }
 0x437   : > { %5910 = vmatprep.subr.bf16.mxu0 %v8255_v15  ;;  %v9682_v15 = vld [vmem:[#allocation110_spill] sm:$0xff] }
 0x43a   : > { %5912 = vmatpush1.bf16.msra.mxu0 %v9672_v22  ;;  %v9696_v22 = vld [vmem:[#allocation55_spill] sm:$0xff] }
 0x43b   : > { %5914 = vmatprep.subr.bf16.mxu0 %v9673_v16  ;;  %v9697_v16 = vld [vmem:[#allocation58_spill] sm:$0xff] }
 0x43e   : > { %5916 = vmatpush1.bf16.msra.mxu0 %v9674_v8  ;;  %v9698_v8 = vld [vmem:[#allocation62_spill] sm:$0xff] }
 0x43f   : > { %5918 = vmatprep.subr.bf16.mxu0 %v9675_v47  ;;  %v9699_v47 = vld [vmem:[#allocation64_spill] sm:$0xff] }
 0x442   : > { %5920 = vmatpush1.bf16.msra.mxu0 %v9676_v54  ;;  %v9700_v54 = vld [vmem:[#allocation67_spill] sm:$0xff] }
 0x443   : > { %5922 = vmatprep.subr.bf16.mxu0 %v9677_v21  ;;  %v9701_v21 = vld [vmem:[#allocation70_spill] sm:$0xff] }
 0x446   : > { %5924 = vmatpush1.bf16.msra.mxu0 %v9678_v61  ;;  %v9702_v61 = vld [vmem:[#allocation74_spill] sm:$0xff] }
 0x447   : > { %5926 = vmatprep.subr.bf16.mxu0 %v9679_v33  ;;  %v9703_v33 = vld [vmem:[#allocation76_spill] sm:$0xff] }
 0x44a   : > { %5928 = vmatpush1.bf16.msra.mxu0 %v9680_v51  ;;  %v9704_v51 = vld [vmem:[#allocation79_spill] sm:$0xff] }
 0x44b   : > { %5930 = vmatprep.subr.bf16.mxu0 %v9681_v30  ;;  %v9705_v30 = vld [vmem:[#allocation82_spill] sm:$0xff] }
 0x44e   : > { %5932 = vmatpush1.bf16.msra.mxu0 %v9682_v15  ;;  %v9706_v15 = vld [vmem:[#allocation86_spill] sm:$0xff] }
 0x44f   : > { %5934 = vmatprep.subr.bf16.mxu0 %v9683_v6  ;;  %v9707_v6 = vld [vmem:[#allocation88_spill] sm:$0xff] }
 0x452   : > { %5936 = vmatpush1.bf16.msra.mxu0 %v9684_v38  ;;  %v9708_v38 = vld [vmem:[#allocation91_spill] sm:$0xff] }
 0x453   : > { %5938 = vmatprep.subr.bf16.mxu0 %v9685_v53  ;;  %v9709_v53 = vld [vmem:[#allocation94_spill] sm:$0xff] }
 0x456   : > { %5940 = vmatpush1.bf16.msra.mxu0 %v9686_v40  ;;  %v9710_v40 = vld [vmem:[#allocation97_spill] sm:$0xff] }
 0x457   : > { %5942 = vmatprep.subr.bf16.mxu0 %v9687_v11  ;;  %v9711_v11 = vld [vmem:[#allocation98_spill] sm:$0xff] }
 0x45a   : > { %5944 = vmatpush1.bf16.msra.mxu0 %v9688_v23  ;;  %v9712_v23 = vld [vmem:[#allocation100_spill] sm:$0xff] }
 0x45b   : > { %5946 = vmatprep.subr.bf16.mxu0 %v9689_v52  ;;  %v9713_v52 = vld [vmem:[#allocation103_spill] sm:$0xff] }
 0x45e   : > { %5948 = vmatpush1.bf16.msra.mxu0 %v9690_v27 }
 0x45f   : > { %5950 = vmatprep.subr.bf16.mxu0 %v9515_v31 }
 0x461   : > { %4119 = vmatmul.mubr.f32.vlgmr.msra.gmra.mrb[12].mxu0 %v8751_v4  ;;  %v9691_v4 = vld [vmem:[#allocation43_spill] sm:$0xff] }
 0x462   : > { %5952 = vmatpush1.bf16.msra.mxu0 %v9516_v14  ;;  %4248 = vmatprep.mubr.f32.mxu0 %v3570_v59  ;;  %v6391_v59 = vld [vmem:[%s8976_s9 + $0x8] sm:$0xff]  }
 0x463   : > { %5954 = vmatprep.subr.bf16.mxu0 %v9517_v42  ;;  %4801 = vmatpush1.bf16.msra.mxu1 %v6391_v59 }
 0x464   : > { %4802 = vmatprep.subr.bf16.mxu1 %v9663_v60 }
 0x466   : > { %5956 = vmatpush1.bf16.msra.mxu0 %v9518_v24 }
 0x467   : > { %5958 = vmatprep.subr.bf16.mxu0 %v9519_v17  ;;  %4803 = vmatpush1.bf16.msra.mxu1 %v6392_v19 }
 0x468   : > { %4804 = vmatprep.subr.bf16.mxu1 %v9663_v60 }
 0x46a   : > { %5960 = vmatpush1.bf16.msra.mxu0 %v9520_v48 }
 0x46b   : > { %5962 = vmatprep.subr.bf16.mxu0 %v9521_v26  ;;  %4805 = vmatpush1.bf16.msra.mxu1 %v6393_v39 }
 0x46c   : > { %4806 = vmatprep.subr.bf16.mxu1 %v9663_v60 }
 0x46e   : > { %5964 = vmatpush1.bf16.msra.mxu0 %v9522_v57 }
 0x46f   : > { %5966 = vmatprep.subr.bf16.mxu0 %v9523_v3  ;;  %4807 = vmatpush1.bf16.msra.mxu1 %v6394_v7 }
 0x470   : > { %4808 = vmatprep.subr.bf16.mxu1 %v9663_v60 }
 0x472   : > { %5968 = vmatpush1.bf16.msra.mxu0 %v9524_v18 }
 0x473   : > { %5970 = vmatprep.subr.bf16.mxu0 %v9525_v55 }
 0x476   : > { %5972 = vmatpush1.bf16.msra.mxu0 %v9526_v34 }
 0x477   : > { %5974 = vmatprep.subr.bf16.mxu0 %v9527_v63 }
 0x47a   : > { %5976 = vmatpush1.bf16.msra.mxu0 %v9528_v36 }
 0x47b   : > { %5978 = vmatprep.subr.bf16.mxu0 %v9529_v12 }
 0x47e   : > { %5980 = vmatpush1.bf16.msra.mxu0 %v9530_v9 }
 0x47f   : > { %5982 = vmatprep.subr.bf16.mxu0 %v9531_v0 }
 0x482   : > { %5984 = vmatpush1.bf16.msra.mxu0 %v9532_v44 }
 0x483   : > { %5986 = vmatprep.subr.bf16.mxu0 %v9533_v1 }
 0x486   : > { %5988 = vmatpush1.bf16.msra.mxu0 %v9534_v29 }
 0x487   : > { %5990 = vmatprep.subr.bf16.mxu0 %v9535_v62 }
 0x48a   : > { %5992 = vmatpush1.bf16.msra.mxu0 %v9536_v49 }
 0x48b   : > { %5994 = vmatprep.subr.bf16.mxu0 %v9537_v20 }
 0x48e   : > { %5996 = vmatpush1.bf16.msra.mxu0 %v9538_v50 }
 0x48f   : > { %5998 = vmatprep.subr.bf16.mxu0 %v9539_v25 }
 0x492   : > { %6000 = vmatpush1.bf16.msra.mxu0 %v9540_v32 }
 0x493   : > { %6002 = vmatprep.subr.bf16.mxu0 %v9541_v35 }
 0x496   : > { %6004 = vmatpush1.bf16.msra.mxu0 %v9544_v37 }
 0x497   : > { %6006 = vmatprep.subr.bf16.mxu0 %v8467_v46  ;;  %v6395_v46 = vld [vmem:[%s8976_s9 + $0x28] sm:$0xff]  }
 0x498   : > { %4809 = vmatpush1.bf16.msra.mxu1 %v6395_v46 }
 0x499   : > { %4252 = vmatmul.mubr.f32.vlgmr.msra.gmra.mrb[12].mxu0 %v3576_v2  ;;  %4810 = vmatprep.subr.bf16.mxu1 %v9663_v60  ;;  %v6397_v2 = vld [vmem:[%s8976_s9 + $0x38] sm:$0xff]  }
 0x49a   : > { %6008 = vmatpush1.bf16.msra.mxu0 %v8474_v58  ;;  %4491 = vmatprep.mubr.f32.mxu0 %v8753_v28  ;;  %v6396_v58 = vld [vmem:[%s8976_s9 + $0x30] sm:$0xff]  }
 0x49b   : > { %6010 = vmatprep.subr.bf16.mxu0 %v8481_v10  ;;  %v9692_v10 = vld [vmem:[#allocation45_spill] sm:$0xff] }
 0x49c   : > { %4811 = vmatpush1.bf16.msra.mxu1 %v6396_v58 }
 0x49d   : > { %4812 = vmatprep.subr.bf16.mxu1 %v9663_v60 }
 0x49e   : > { %6012 = vmatpush1.bf16.msra.mxu0 %v8491_v43  ;;  %v9693_v43 = vld [vmem:[#allocation46_spill] sm:$0xff] }
 0x49f   : > { %6014 = vmatprep.subr.bf16.mxu0 %v8498_v56  ;;  %v9694_v56 = vld [vmem:[#allocation50_spill] sm:$0xff] }
 0x4a0   : > { %4813 = vmatpush1.bf16.msra.mxu1 %v6397_v2 }
 0x4a1   : > { %4814 = vmatprep.subr.bf16.mxu1 %v9663_v60 }
 0x4a2   : > { %6016 = vmatpush1.bf16.msra.mxu0 %v9691_v4 }
 0x4a3   : > { %6018 = vmatprep.subr.bf16.mxu0 %v9692_v10 }
 0x4a6   : > { %6020 = vmatpush1.bf16.msra.mxu0 %v9693_v43 }
 0x4a7   : > { %6022 = vmatprep.subr.bf16.mxu0 %v9694_v56  ;;  %v5039_v56 = vld [vmem:[%s8971_s4] ss:$0 sm:$0xff] }
 0x4aa   : > { %6024 = vmatpush1.bf16.msra.mxu0 %v9695_v45 }
 0x4ab   : > { %6026 = vmatprep.subr.bf16.mxu0 %v9696_v22  ;;  %v9720_v22 = vld [vmem:[#allocation17_spill] sm:$0xff] }
 0x4ae   : > { %6028 = vmatpush1.bf16.msra.mxu0 %v9697_v16  ;;  %v1117_v16 = vadd.f32 %v5039_v56, %v9720_v22 }
 0x4af   : > { %6030 = vmatprep.subr.bf16.mxu0 %v9698_v8 }
 0x4b2   : > { %6032 = vmatpush1.bf16.msra.mxu0 %v9699_v47  ;;  %v5041_v47 = vmul.f32 -1.442695, %v1117_v16 }
 0x4b3   : > { %6034 = vmatprep.subr.bf16.mxu0 %v9700_v54 }
 0x4b6   : > { %6036 = vmatpush1.bf16.msra.mxu0 %v9701_v21 }
 0x4b7   : > { %6038 = vmatprep.subr.bf16.mxu0 %v9702_v61 }
 0x4ba   : > { %6040 = vmatpush1.bf16.msra.mxu0 %v9703_v33 }
 0x4bb   : > { %6042 = vmatprep.subr.bf16.mxu0 %v9704_v51  ;;  %v5250_v51 = vld [vmem:[%s8977_s10] ss:$0 sm:$0xff] }
 0x4be   : > { %6044 = vmatpush1.bf16.msra.mxu0 %v9705_v30 }
 0x4bf   : > { %6046 = vmatprep.subr.bf16.mxu0 %v9706_v15 }
 0x4c2   : > { %6048 = vmatpush1.bf16.msra.mxu0 %v9707_v6 }
 0x4c3   : > { %6050 = vmatprep.subr.bf16.mxu0 %v9708_v38 }
 0x4c6   : > { %6052 = vmatpush1.bf16.msra.mxu0 %v9709_v53  ;;  %v6416_v53 = vld [vmem:[#allocation3 + $0x3] sm:$0xff] }
 0x4c7   : > { %6054 = vmatprep.subr.bf16.mxu0 %v9710_v40 }
 0x4ca   : > { %6056 = vmatpush1.bf16.msra.mxu0 %v9711_v11 }
 0x4cb   : > { %6058 = vmatprep.subr.bf16.mxu0 %v9712_v23 }
 0x4ce   : > { %6060 = vmatpush1.bf16.msra.mxu0 %v9713_v52  ;;  %v6417_v52 = vld [vmem:[#allocation2 + $0x1] sm:$0xff] }
 0x4cf   : > { %6062 = vmatprep.subr.bf16.mxu0 %v9515_v31 }
 0x4d1   : > { %4493 = vmatmul.mubr.f32.vlgmr.msra.gmra.mrb[12].mxu0 %v8747_v5 }
 0x4d2   : > { %6064 = vmatpush1.bf16.msra.mxu0 %v9516_v14  ;;  %4620 = vmatprep.mubr.f32.mxu0 %v8753_v28 }
 0x4d3   : > { %6066 = vmatprep.subr.bf16.mxu0 %v9517_v42 }
 0x4d6   : > { %6068 = vmatpush1.bf16.msra.mxu0 %v9518_v24 }
 0x4d7   : > { %6070 = vmatprep.subr.bf16.mxu0 %v9519_v17  ;;  %v4642_v17 = vld [vmem:[%s8974_s7] sm:$0x3] }
 0x4da   : > { %6072 = vmatpush1.bf16.msra.mxu0 %v9520_v48 }
 0x4db   : > { %6074 = vmatprep.subr.bf16.mxu0 %v9521_v26  ;;  %v4658_v26 = vld [vmem:[%s8975_s8] sm:$0x3] }
 0x4de   : > { %6076 = vmatpush1.bf16.msra.mxu0 %v9522_v57 }
 0x4df   : > { %6078 = vmatprep.subr.bf16.mxu0 %v9523_v3  ;;  %v9714_v3 = vld [vmem:[#allocation109_spill] sm:$0xff] }
 0x4e2   : > { %6080 = vmatpush1.bf16.msra.mxu0 %v9524_v18 }
 0x4e3   : > { %6082 = vmatprep.subr.bf16.mxu0 %v9525_v55  ;;  %v4647_v55 = vrot.slane %v4642_v17, %v9714_v3 }
 0x4e6   : > { %6084 = vmatpush1.bf16.msra.mxu0 %v9526_v34  ;;  %v9715_v34 = vld [vmem:[#allocation107_spill] sm:$0xff] }
 0x4e7   : > { %6086 = vmatprep.subr.bf16.mxu0 %v9527_v63  ;;  %v4651_v63 = vrot.slane %v4642_v17, %v9715_v34  ;;  %v4667_v41 = vrot.slane %v4658_v26, %v9715_v34 }
 0x4ea   : > { %6088 = vmatpush1.bf16.msra.mxu0 %v9528_v36 }
 0x4eb   : > { %6090 = vmatprep.subr.bf16.mxu0 %v9529_v12  ;;  %v9716_v12 = vld [vmem:[#allocation4_spill] sm:$0xff] }
 0x4ee   : > { %6092 = vmatpush1.bf16.msra.mxu0 %v9530_v9 }
 0x4ef   : > { %6094 = vmatprep.subr.bf16.mxu0 %v9531_v0  ;;  %v9717_v0 = vld [vmem:[#allocation5_spill] sm:$0xff] }
 0x4f2   : > { %6096 = vmatpush1.bf16.msra.mxu0 %v9532_v44 }
 0x4f3   : > { %6098 = vmatprep.subr.bf16.mxu0 %v9533_v1 }
 0x4f6   : > { %6100 = vmatpush1.bf16.msra.mxu0 %v9534_v29  ;;  %v6398_v29 = vld [vmem:[%s8976_s9 + $0x40] sm:$0xff]  }
 0x4f7   : > { %6102 = vmatprep.subr.bf16.mxu0 %v9535_v62  ;;  %4815 = vmatpush1.bf16.msra.mxu1 %v6398_v29 }
 0x4f8   : > { %4816 = vmatprep.subr.bf16.mxu1 %v9663_v60 }
 0x4fa   : > { %6104 = vmatpush1.bf16.msra.mxu0 %v9536_v49 }
 0x4fb   : > { %6106 = vmatprep.subr.bf16.mxu0 %v9537_v20  ;;  %v6399_v20 = vld [vmem:[%s8976_s9 + $0x48] sm:$0xff]  }
 0x4fc   : > { %4817 = vmatpush1.bf16.msra.mxu1 %v6399_v20 }
 0x4fd   : > { %4818 = vmatprep.subr.bf16.mxu1 %v9663_v60 }
 0x4fe   : > { %6108 = vmatpush1.bf16.msra.mxu0 %v9538_v50  ;;  %v6403_v50 = vld [vmem:[%s8976_s9 + $0x68] sm:$0xff]  }
 0x4ff   : > { %6110 = vmatprep.subr.bf16.mxu0 %v9539_v25  ;;  %v6402_v25 = vld [vmem:[%s8976_s9 + $0x60] sm:$0xff]  }
 0x502   : > { %6112 = vmatpush1.bf16.msra.mxu0 %v9540_v32  ;;  %v6401_v32 = vld [vmem:[%s8976_s9 + $0x58] sm:$0xff]  }
 0x503   : > { %6114 = vmatprep.subr.bf16.mxu0 %v9541_v35 }
 0x504   : > { %v3580_v31 = vpop.f32.mrb[18].mxu1 }
 0x505   : > { %v3582_v14 = vpop.f32.mrb[19].mxu1  ;;  %v3581_v1 = vadd.f32 1e-05, %v3580_v31 }
 0x506   : > { %6116 = vmatpush1.bf16.msra.mxu0 %v9544_v37  ;;  %v6400_v37 = vld [vmem:[%s8976_s9 + $0x50] sm:$0xff]   ;;  %v3583_v62 = vadd.f32 1e-05, %v3582_v14  ;;  %v6418_v14 = vld [vmem:[#allocation3 + $0xb] sm:$0xff] }
 0x507   : > { %4819 = vmatpush1.bf16.msra.mxu1 %v6400_v37 }
 0x508   : > { %4820 = vmatprep.subr.bf16.mxu1 %v9663_v60 }
 0x509   : > { %4622 = vmatmul.mubr.f32.vlgmr.msra.gmra.mrb[12].mxu0 %v8747_v5  ;;  %v4663_v5 = vrot.slane %v4658_v26, %v9714_v3 }
 0x50b   : > { %4821 = vmatpush1.bf16.msra.mxu1 %v6401_v32  ;;  %v6419_v32 = vld [vmem:[#allocation2 + $0x9] sm:$0xff] }
 0x50c   : > { %4822 = vmatprep.subr.bf16.mxu1 %v9663_v60 }
 0x50f   : > { %4823 = vmatpush1.bf16.msra.mxu1 %v6402_v25 }
 0x510   : > { %4824 = vmatprep.subr.bf16.mxu1 %v9663_v60  ;;  %v9718_v60 = vld [vmem:[#allocation6_spill] sm:$0xff] }
 0x513   : > { %4825 = vmatpush1.bf16.msra.mxu1 %v6403_v50 }
 0x5dc   : > { %v4623_v35 = vpop.f32.mrb[12].mxu0 }
 0x5dd   : > { %v6118_v49 = vadd.f32 %v4623_v35, %v3581_v1  ;;  %v4625_v42 = vpop.f32.mrb[13].mxu0 }
 0x5de   : > { %v6120_v24 = vadd.f32 %v4625_v42, %v3583_v62 }
 0x5df   : > { %6404 = vrsqrt.f32 %v6118_v49 }
 0x5e0   : > { %6406 = vrsqrt.f32 %v6120_v24 }
 0x5e9   : > { %v6405_v48 = vpop.eup %6404 }
 0x5ea   : > { %v6407_v57 = vpop.eup %6406  ;;  %v4633_v18 = vrot.slane %v6405_v48, %v9714_v3 }
 0x5eb   : > { %v4637_v36 = vrot.slane %v6407_v57, %v9714_v3 }
 0x5ec   : > { %v4638_v9 = vmul.f32 %v4633_v18, %v9716_v12  ;;  %v4640_v44 = vmul.f32 %v4633_v18, %v9717_v0 }
 0x5ed   : > { %v4639_v28 = vmul.f32 %v4637_v36, %v9718_v60  ;;  %v4641_v27 = vmul.f32 %v4637_v36, %v8735_v13  ;;  %v9719_v13 = vld [vmem:[#allocation16_spill] sm:$0xff] }
 0x5ee   : > { %v4654_v59 = vmul.f32 %v4647_v55, %v4638_v9  ;;  %v4656_v19 = vmul.f32 %v4647_v55, %v4640_v44  ;;  %v1116_v45 = vadd.f32 %v5039_v56, %v9719_v13 }
 0x5ef   : > { %v4655_v39 = vmul.f32 %v4651_v63, %v4639_v28  ;;  %v4657_v7 = vmul.f32 %v4651_v63, %v4641_v27 }
 0x5f0   : > { %v4670_v46 = vadd.f32 %v4663_v5, %v4654_v59  ;;  %v4672_v58 = vadd.f32 %v4663_v5, %v4656_v19  ;;  %v5040_v8 = vmul.f32 -1.442695, %v1116_v45 }
 0x5f1   : > { %v4671_v4 = vadd.f32 %v4667_v41, %v4655_v39  ;;  %v4673_v10 = vadd.f32 %v4667_v41, %v4657_v7 }
 0x5f2   : > { %v4674_v43 = vpack.c.bf16 %v4672_v58, %v4670_v46  ;;  %6408 = vpow2.f32 %v5040_v8 }
 0x5f3   : > { %v4675_v2 = vpack.c.bf16 %v4673_v10, %v4671_v4  ;;  %6410 = vpow2.f32 %v5041_v47 }
 0x5f5   : > { %5265 = vmatprep.mubr.msk.bf16.mxu1 %vm2164_vm1, %v4675_v2 }
 0x5f6   : > { %4831 = vmatmul.mubr.bf16.vlgmr.msra.gmra.mrb[20].mxu1 %v4674_v43 }
 0x5fc   : > { %v6409_v54 = vpop.eup %6408 }
 0x5fd   : > { %v6411_v21 = vpop.eup %6410  ;;  %v1124_v61 = vadd.f32 1.0, %v6409_v54 }
 0x5fe   : > { %v1125_v33 = vadd.f32 1.0, %v6411_v21 }
 0x5ff   : > { %6412 = vrcp.f32 %v1124_v61 }
 0x600   : > { %6414 = vrcp.f32 %v1125_v33 }
 0x609   : > { %v6413_v20 = vpop.eup %6412 }
 0x60a   : > { %v6415_v50 = vpop.eup %6414 }
 0x6c9   : > { %v4832_v30 = vpop.f32.mrb[20].mxu1 }
 0x6ca   : > { %v4833_v15 = vadd.f32 %v5250_v51, %v4832_v30  ;;  %v4834_v6 = vpop.f32.mrb[21].mxu1 }
 0x6cb   : > { %v4835_v38 = vpop.f32.mrb[22].mxu1 }
 0x6cc   : > { %v4839_v40 = vadd.f32 %v6416_v53, %v4833_v15  ;;  %v4836_v11 = vadd.f32 %v5250_v51, %v4835_v38  ;;  %v4837_v23 = vpop.f32.mrb[23].mxu1 }
 0x6ce   : > { %v4841_v31 = vsub.f32 %v6417_v52, %v4839_v40  ;;  %v4840_v29 = vadd.f32 %v6418_v14, %v4836_v11 }
 0x6d0   : > { %v4843_v37 = vmul.f32 %v6413_v20, %v4841_v31  ;;  %v4842_v25 = vsub.f32 %v6419_v32, %v4840_v29 }
 0x6d2   : > { %v4845_v1 = vadd.f32 %v4843_v37, %v4839_v40  ;;  %v4844_v62 = vmul.f32 %v6415_v50, %v4842_v25 }
 0x6d4   : > { %4847 = vst [vmem:[%s433_s20] sm:$0xff] %v4845_v1  ;;  %v4846_v35 = vadd.f32 %v4844_v62, %v4840_v29 }
 0x6d6   : > { %4848 = vst [vmem:[%s433_s20 + $0x8] sm:$0xff] %v4846_v35 }
 0x6d7 PF: > { %s22_s21 = sadd.s32 1, %s6426_s21  }
 0x6d8   : > { %p19_p4 = scmp.ge.s32.totalorder %s22_s21, 4  }
 0x6da   :  { %21 = sbr.rel (!%p19_p4) target bundleno = 1 (0x1), region = 111 }

</bundles_post_ra>
